<compile_context>
chip_gen: v7x
topology: tpu7x:2x2x1
jax: 0.10.0
libtpu: 0.0.40
codegen_flags: <defaults>
</compile_context>

<pallas_src>
import functools

import jax
import jax.numpy as jnp
from jax import lax
from jax.experimental import pallas as pl
from jax.experimental.pallas import tpu as pltpu


# ----------------------------------------------------------------------------
# Kernel A/B: fused complex 3x3 conv (pad=1, stride=1, bias) as 3 lane-dense
# matmuls (one per kh tap), with optional BN+ReLU magnitude/phase prologue and
# fused BN-statistics epilogue.  Grid iterates over the batch (one image per
# program, "parallel" for megacore).
# ----------------------------------------------------------------------------
def _fused_conv_kernel(*refs, H, W, Cin, Cout, prologue):
    if prologue:
        (xr_ref, xi_ref, sc_ref, sh_ref, w_ref, b_ref,
         or_ref, oi_ref, st_ref, xpad_ref) = refs
    else:
        (xr_ref, xi_ref, w_ref, b_ref,
         or_ref, oi_ref, st_ref, xpad_ref) = refs

    WCo = W * Cout
    xr = xr_ref[0]          # (H, W*Cin), lane-dense
    xi = xi_ref[0]

    if prologue:
        # relu(bn1(|z|)) * exp(i*angle(z)) applied on the lane-dense view.
        sq = xr * xr + xi * xi
        nz = sq > 0.0
        inv = lax.rsqrt(jnp.where(nz, sq, 1.0))      # 1/|z| (guarded)
        m = jnp.maximum((sq * inv) * sc_ref[...] + sh_ref[...], 0.0)
        xr = jnp.where(nz, m * (xr * inv), m)        # angle(0) convention: (cos,sin)=(1,0)
        xi = jnp.where(nz, m * (xi * inv), 0.0)

    # H-padded, real/imag-stacked input built in VMEM (no HBM pad pass).
    # W-padding is folded into the banded weight matrices, so the scratch stays
    # fully lane-dense: (H+2, 2*W*Cin) = (H+2, 256).
    xpad_ref[...] = jnp.zeros_like(xpad_ref)
    xpad_ref[1:H + 1, :] = jnp.concatenate([xr, xi], axis=-1)

    # Three full-MXU-width matmuls: (H, 2*W*Cin) @ (2*W*Cin, 2*W*Cout).
    acc = jnp.dot(xpad_ref[0:H, :], w_ref[0], preferred_element_type=jnp.float32)
    acc += jnp.dot(xpad_ref[1:H + 1, :], w_ref[1], preferred_element_type=jnp.float32)
    acc += jnp.dot(xpad_ref[2:H + 2, :], w_ref[2], preferred_element_type=jnp.float32)
    acc += b_ref[...]

    zr = acc[:, :WCo]       # lane-tile-aligned slices, already in output layout
    zi = acc[:, WCo:]
    or_ref[...] = zr.reshape(1, H, WCo)
    oi_ref[...] = zi.reshape(1, H, WCo)

    # Per-image BN statistics partials (sum |z|, sum |z|^2), lane-dense rows, so
    # the wrapper never re-streams the activation through HBM for batch stats.
    sq2 = zr * zr + zi * zi
    mag_sum = jnp.sum(jnp.sqrt(sq2), axis=0, keepdims=True)    # (1, W*Cout)
    sq_sum = jnp.sum(sq2, axis=0, keepdims=True)               # (1, W*Cout)
    st_ref[...] = jnp.concatenate([mag_sum, sq_sum], axis=0).reshape(1, 2, WCo)


def complex_conv3x3_fused(xr, xi, w_band, b_packed, *, Cin, Cout,
                          scale_t=None, shift_t=None):
    """xr/xi: (N, H, W*Cin) lane-dense. Returns (zr, zi, stats)."""
    N, H, WC = xr.shape
    W = WC // Cin
    WCo = W * Cout
    prologue = scale_t is not None

    x_spec = pl.BlockSpec((1, H, WC), lambda n: (n, 0, 0))
    s_spec = pl.BlockSpec((1, WC), lambda n: (0, 0))
    w_spec = pl.BlockSpec(w_band.shape, lambda n: (0, 0, 0))   # resident across grid
    b_spec = pl.BlockSpec((1, 2 * WCo), lambda n: (0, 0))
    o_spec = pl.BlockSpec((1, H, WCo), lambda n: (n, 0, 0))
    st_spec = pl.BlockSpec((1, 2, WCo), lambda n: (n, 0, 0))

    in_specs = [x_spec, x_spec]
    args = [xr, xi]
    if prologue:
        in_specs += [s_spec, s_spec]
        args += [scale_t, shift_t]
    in_specs += [w_spec, b_spec]
    args += [w_band, b_packed]

    out_shape = (jax.ShapeDtypeStruct((N, H, WCo), jnp.float32),
                 jax.ShapeDtypeStruct((N, H, WCo), jnp.float32),
                 jax.ShapeDtypeStruct((N, 2, WCo), jnp.float32))

    kernel = functools.partial(_fused_conv_kernel, H=H, W=W, Cin=Cin,
                               Cout=Cout, prologue=prologue)
    return pl.pallas_call(
        kernel,
        grid=(N,),
        in_specs=in_specs,
        out_specs=[o_spec, o_spec, st_spec],
        out_shape=out_shape,
        scratch_shapes=[pltpu.VMEM((H + 2, 2 * WC), jnp.float32)],
        compiler_params=pltpu.CompilerParams(
            dimension_semantics=("parallel",)),
    )(*args)


# ----------------------------------------------------------------------------
# Kernel C: fused BN2(|z|) magnitude/phase apply + residual add + final stage.
# The final relu(|s|) * exp(i*angle(s)) of the reference is an exact identity
# (|s| >= 0, and s == 0 maps to 0), so no magnitude/phase round trip is needed.
# Full per-image blocks (tiny), grid parallel over the batch.
# ----------------------------------------------------------------------------
def _bn2_residual_kernel(zr_ref, zi_ref, xr_ref, xi_ref, sc_ref, sh_ref,
                         or_ref, oi_ref):
    r = zr_ref[...]
    i = zi_ref[...]
    sq = r * r + i * i
    nz = sq > 0.0
    inv = lax.rsqrt(jnp.where(nz, sq, 1.0))          # 1/|z| (guarded)
    m = (sq * inv) * sc_ref[...] + sh_ref[...]       # bn2(|z|), no relu
    ur = jnp.where(nz, r * inv, 1.0)                 # cos(angle(z)), angle(0)=0
    ui = jnp.where(nz, i * inv, 0.0)                 # sin(angle(z))
    or_ref[...] = m * ur + xr_ref[...]
    oi_ref[...] = m * ui + xi_ref[...]


def bn2_residual(z2r, z2i, xr, xi, scale_t, shift_t):
    N, H, WC = z2r.shape
    a_spec = pl.BlockSpec((1, H, WC), lambda n: (n, 0, 0))
    s_spec = pl.BlockSpec((1, WC), lambda n: (0, 0))
    out_shape = (jax.ShapeDtypeStruct((N, H, WC), jnp.float32),
                 jax.ShapeDtypeStruct((N, H, WC), jnp.float32))
    return pl.pallas_call(
        _bn2_residual_kernel,
        grid=(N,),
        in_specs=[a_spec, a_spec, a_spec, a_spec, s_spec, s_spec],
        out_specs=[a_spec, a_spec],
        out_shape=out_shape,
        compiler_params=pltpu.CompilerParams(
            dimension_semantics=("parallel",)),
    )(z2r, z2i, xr, xi, scale_t, shift_t)


# ----------------------------------------------------------------------------
# Wrapper-side helpers (weight-sized work only; in a real model these packed
# weights would be precomputed once).
# ----------------------------------------------------------------------------
def _band(wk, W):
    """wk: (3, Cin, Cout) taps for a fixed kh -> banded (W*Cin, W*Cout) matrix.

    band[w'*Cin+ci, w*Cout+co] = wk[w'-w+1, ci, co] if 0 <= w'-w+1 <= 2 else 0,
    which encodes both the kw tap shift and the W-boundary zero padding.
    """
    wp = jnp.arange(W)[:, None]
    wo = jnp.arange(W)[None, :]
    k = wp - wo + 1                                           # (W, W)
    band = sum((k == t).astype(wk.dtype)[:, :, None, None] * wk[t] for t in range(3))
    return band.transpose(0, 2, 1, 3).reshape(W * wk.shape[1], W * wk.shape[2])


def _pack_complex_conv_band(wr, wi, W):
    """(3,3,Cin,Cout) real/imag taps -> (3, 2*W*Cin, 2*W*Cout) banded matrices.

    Input columns are [Xr lane-dense | Xi lane-dense]; output columns are
    [Zr lane-dense | Zi lane-dense]; (Wr+iWi)(Xr+iXi) mixing is folded in.
    """
    mats = []
    for kh in range(3):
        br_ = _band(wr[kh], W)
        bi_ = _band(wi[kh], W)
        top = jnp.concatenate([br_, bi_], axis=1)      # rows fed by Xr
        bot = jnp.concatenate([-bi_, br_], axis=1)     # rows fed by Xi
        mats.append(jnp.concatenate([top, bot], axis=0))
    return jnp.stack(mats, axis=0)


def _pack_bias(br, bi, W):
    """Per-channel complex bias -> (1, 2*W*Cout) lane-dense row."""
    return jnp.concatenate([jnp.tile(br, W), jnp.tile(bi, W)]).reshape(1, -1)


def _bn_affine_from_stats(stats, gamma, beta, count, W, Cout, eps=1e-5):
    """stats: (N, 2, W*Cout) per-image [sum|z|, sum|z|^2] -> per-channel scale/shift."""
    tot = jnp.sum(stats, axis=0).reshape(2, W, Cout).sum(axis=1)   # (2, Cout)
    mean = tot[0] / count
    var = tot[1] / count - mean * mean              # biased variance (PyTorch BN norm)
    scale = gamma * lax.rsqrt(var + eps)
    shift = beta - mean * scale
    return scale, shift


def _tile_per_channel(v, W):
    """(C,) per-channel vector -> (1, W*C) lane-dense broadcast row."""
    return jnp.tile(v, W).reshape(1, -1)


# ----------------------------------------------------------------------------
# BasicBlock forward (NHWC real/imag in, NHWC real/imag out).
# ----------------------------------------------------------------------------
def basic_block_forward(xr_nhwc, xi_nhwc, p):
    N, H, W, Cin = xr_nhwc.shape
    Cout = p["w1r"].shape[-1]
    assert Cin == Cout, "identity residual path requires inplanes == planes"

    # Lane-dense layout (pure reshape of contiguous NHWC, no data movement).
    xr = xr_nhwc.reshape(N, H, W * Cin)
    xi = xi_nhwc.reshape(N, H, W * Cin)

    w1 = _pack_complex_conv_band(p["w1r"], p["w1i"], W)
    b1 = _pack_bias(p["b1r"], p["b1i"], W)
    w2 = _pack_complex_conv_band(p["w2r"], p["w2i"], W)
    b2 = _pack_bias(p["b2r"], p["b2i"], W)

    # conv1 (+ fused per-image BN1 statistics).
    z1r, z1i, st1 = complex_conv3x3_fused(xr, xi, w1, b1, Cin=Cin, Cout=Cout)
    s1, sh1 = _bn_affine_from_stats(st1, p["g1"], p["be1"], N * H * W, W, Cout)

    # relu(bn1(|z|)) * phase fused into conv2's prologue (+ fused BN2 statistics).
    z2r, z2i, st2 = complex_conv3x3_fused(
        z1r, z1i, w2, b2, Cin=Cout, Cout=Cout,
        scale_t=_tile_per_channel(s1, W), shift_t=_tile_per_channel(sh1, W))
    s2, sh2 = _bn_affine_from_stats(st2, p["g2"], p["be2"], N * H * W, W, Cout)

    # bn2(|z|)*phase + residual add + final (identity) relu-magnitude/phase.
    out_r, out_i = bn2_residual(
        z2r, z2i, xr, xi,
        _tile_per_channel(s2, W), _tile_per_channel(sh2, W))
    return out_r.reshape(N, H, W, Cout), out_i.reshape(N, H, W, Cout)


def init_params(key, inplanes, planes):
    ks = jax.random.split(key, 8)
    f = lambda k, s: (0.1 * jax.random.normal(k, s)).astype(jnp.float32)
    return {
        "w1r": f(ks[0], (3, 3, inplanes, planes)),
        "w1i": f(ks[1], (3, 3, inplanes, planes)),
        "b1r": f(ks[2], (planes,)),
        "b1i": f(ks[3], (planes,)),
        "w2r": f(ks[4], (3, 3, planes, planes)),
        "w2i": f(ks[5], (3, 3, planes, planes)),
        "b2r": f(ks[6], (planes,)),
        "b2i": f(ks[7], (planes,)),
        "g1": jnp.ones((planes,), jnp.float32),
        "be1": jnp.zeros((planes,), jnp.float32),
        "g2": jnp.ones((planes,), jnp.float32),
        "be2": jnp.zeros((planes,), jnp.float32),
    }


if __name__ == "__main__":
    # NCHW complex input; C=8, W=16 so W*C == 128 (full lane width on TPU).
    N, C, H, W = 2, 8, 16, 16
    key = jax.random.PRNGKey(0)
    kx_r, kx_i, kp = jax.random.split(key, 3)

    x_r_nchw = jax.random.normal(kx_r, (N, C, H, W), jnp.float32)
    x_i_nchw = jax.random.normal(kx_i, (N, C, H, W), jnp.float32)
    params = init_params(kp, C, C)

    # NCHW -> NHWC for the kernels.
    xr = jnp.transpose(x_r_nchw, (0, 2, 3, 1))
    xi = jnp.transpose(x_i_nchw, (0, 2, 3, 1))

    fwd = jax.jit(basic_block_forward)
    out_r, out_i = fwd(xr, xi, params)
    out_r = jax.block_until_ready(out_r)
    out_i = jax.block_until_ready(out_i)

    # NHWC -> NCHW, pack back into a complex array (matches torch output layout).
    out = (jnp.transpose(out_r, (0, 3, 1, 2))
           + 1j * jnp.transpose(out_i, (0, 3, 1, 2))).astype(jnp.complex64)
    out = jax.block_until_ready(out)

    assert out.shape == (N, C, H, W)
    assert bool(jnp.all(jnp.isfinite(out_r))) and bool(jnp.all(jnp.isfinite(out_i)))
    print("KERNEL_OK")
</pallas_src>

<mosaic_0001>
module attributes {stable_mosaic.version = 11 : i64} {
  func.func @_fused_conv_kernel(%arg0: i32, %arg1: memref<1x16x128xf32, #tpu.memory_space<vmem>>, %arg2: memref<1x16x128xf32, #tpu.memory_space<vmem>>, %arg3: memref<3x256x256xf32, #tpu.memory_space<vmem>>, %arg4: memref<1x256xf32, #tpu.memory_space<vmem>>, %arg5: memref<1x16x128xf32, #tpu.memory_space<vmem>>, %arg6: memref<1x16x128xf32, #tpu.memory_space<vmem>>, %arg7: memref<1x2x128xf32, #tpu.memory_space<vmem>>, %arg8: memref<18x256xf32, #tpu.memory_space<vmem>>) attributes {dimension_semantics = [#tpu.dimension_semantics<parallel>], iteration_bounds = array<i64: 2>, scalar_prefetch = 0 : i64, scratch_operands = 1 : i64, tpu.core_type = #tpu.core_type<tc>, window_params = [{transform_indices = @transform_0, window_bounds = array<i64: 1, 16, 128>}, {transform_indices = @transform_1, window_bounds = array<i64: 1, 16, 128>}, {pipeline_mode = #tpu.pipeline_mode<synchronous>, transform_indices = @transform_2, window_bounds = array<i64: 3, 256, 256>}, {pipeline_mode = #tpu.pipeline_mode<synchronous>, transform_indices = @transform_3, window_bounds = array<i64: 1, 256>}, {transform_indices = @transform_4, window_bounds = array<i64: 1, 16, 128>}, {transform_indices = @transform_5, window_bounds = array<i64: 1, 16, 128>}, {transform_indices = @transform_6, window_bounds = array<i64: 1, 2, 128>}]} {
    %c0 = arith.constant 0 : index
    %c0_0 = arith.constant 0 : index
    %c0_1 = arith.constant 0 : index
    %0 = vector.load %arg1[%c0, %c0_0, %c0_1] : memref<1x16x128xf32, #tpu.memory_space<vmem>>, vector<1x16x128xf32>
    %1 = vector.shape_cast %0 : vector<1x16x128xf32> to vector<16x128xf32>
    %c0_2 = arith.constant 0 : index
    %c0_3 = arith.constant 0 : index
    %c0_4 = arith.constant 0 : index
    %2 = vector.load %arg2[%c0_2, %c0_3, %c0_4] : memref<1x16x128xf32, #tpu.memory_space<vmem>>, vector<1x16x128xf32>
    %3 = vector.shape_cast %2 : vector<1x16x128xf32> to vector<16x128xf32>
    %cst = arith.constant 0.000000e+00 : f32
    %4 = vector.broadcast %cst : f32 to vector<18x256xf32>
    %c0_5 = arith.constant 0 : index
    %c0_6 = arith.constant 0 : index
    %5 = vector.load %arg8[%c0_5, %c0_6] : memref<18x256xf32, #tpu.memory_space<vmem>>, vector<18x256xf32>
    tpu.vector_store %arg8[%c0_5, %c0_6], %4 {strides = array<i32>} : memref<18x256xf32, #tpu.memory_space<vmem>>, vector<18x256xf32>,
    %6 = tpu.concatenate %1, %3 in 1 : vector<16x128xf32>, vector<16x128xf32> -> vector<16x256xf32>
    %c1 = arith.constant 1 : index
    %c0_7 = arith.constant 0 : index
    %7 = vector.load %arg8[%c1, %c0_7] : memref<18x256xf32, #tpu.memory_space<vmem>>, vector<16x256xf32>
    tpu.vector_store %arg8[%c1, %c0_7], %6 {strides = array<i32>} : memref<18x256xf32, #tpu.memory_space<vmem>>, vector<16x256xf32>,
    %c0_8 = arith.constant 0 : index
    %c0_9 = arith.constant 0 : index
    %8 = vector.load %arg8[%c0_8, %c0_9] : memref<18x256xf32, #tpu.memory_space<vmem>>, vector<16x256xf32>
    %c0_10 = arith.constant 0 : index
    %c0_11 = arith.constant 0 : index
    %c0_12 = arith.constant 0 : index
    %9 = vector.load %arg3[%c0_10, %c0_11, %c0_12] : memref<3x256x256xf32, #tpu.memory_space<vmem>>, vector<1x256x256xf32>
    %10 = vector.shape_cast %9 : vector<1x256x256xf32> to vector<256x256xf32>
    %cst_13 = arith.constant dense<0.000000e+00> : vector<16x256xf32>
    %11 = tpu.matmul %8, %10, %cst_13 {dimension_numbers = #tpu.dot_dimension_numbers<[1], [0], [0], [1], [0, 0, 1, 1], [], []>} : vector<16x256xf32>, vector<256x256xf32>, vector<16x256xf32> -> vector<16x256xf32>
    %c1_14 = arith.constant 1 : index
    %c0_15 = arith.constant 0 : index
    %12 = vector.load %arg8[%c1_14, %c0_15] : memref<18x256xf32, #tpu.memory_space<vmem>>, vector<16x256xf32>
    %c1_16 = arith.constant 1 : index
    %c0_17 = arith.constant 0 : index
    %c0_18 = arith.constant 0 : index
    %13 = vector.load %arg3[%c1_16, %c0_17, %c0_18] : memref<3x256x256xf32, #tpu.memory_space<vmem>>, vector<1x256x256xf32>
    %14 = vector.shape_cast %13 : vector<1x256x256xf32> to vector<256x256xf32>
    %cst_19 = arith.constant dense<0.000000e+00> : vector<16x256xf32>
    %15 = tpu.matmul %12, %14, %cst_19 {dimension_numbers = #tpu.dot_dimension_numbers<[1], [0], [0], [1], [0, 0, 1, 1], [], []>} : vector<16x256xf32>, vector<256x256xf32>, vector<16x256xf32> -> vector<16x256xf32>
    %16 = arith.addf %11, %15 : vector<16x256xf32>
    %c2 = arith.constant 2 : index
    %c0_20 = arith.constant 0 : index
    %17 = vector.load %arg8[%c2, %c0_20] : memref<18x256xf32, #tpu.memory_space<vmem>>, vector<16x256xf32>
    %c2_21 = arith.constant 2 : index
    %c0_22 = arith.constant 0 : index
    %c0_23 = arith.constant 0 : index
    %18 = vector.load %arg3[%c2_21, %c0_22, %c0_23] : memref<3x256x256xf32, #tpu.memory_space<vmem>>, vector<1x256x256xf32>
    %19 = vector.shape_cast %18 : vector<1x256x256xf32> to vector<256x256xf32>
    %cst_24 = arith.constant dense<0.000000e+00> : vector<16x256xf32>
    %20 = tpu.matmul %17, %19, %cst_24 {dimension_numbers = #tpu.dot_dimension_numbers<[1], [0], [0], [1], [0, 0, 1, 1], [], []>} : vector<16x256xf32>, vector<256x256xf32>, vector<16x256xf32> -> vector<16x256xf32>
    %21 = arith.addf %16, %20 : vector<16x256xf32>
    %c0_25 = arith.constant 0 : index
    %c0_26 = arith.constant 0 : index
    %22 = vector.load %arg4[%c0_25, %c0_26] : memref<1x256xf32, #tpu.memory_space<vmem>>, vector<1x256xf32>
    %23 = vector.broadcast %22 : vector<1x256xf32> to vector<16x256xf32>
    %24 = arith.addf %21, %23 : vector<16x256xf32>
    %25 = vector.extract_strided_slice %24 {offsets = [0, 0], sizes = [16, 128], strides = [1, 1]} : vector<16x256xf32> to vector<16x128xf32>
    %26 = vector.extract_strided_slice %24 {offsets = [0, 128], sizes = [16, 128], strides = [1, 1]} : vector<16x256xf32> to vector<16x128xf32>
    %27 = vector.shape_cast %25 : vector<16x128xf32> to vector<1x16x128xf32>
    %c0_27 = arith.constant 0 : index
    %c0_28 = arith.constant 0 : index
    %c0_29 = arith.constant 0 : index
    %28 = vector.load %arg5[%c0_27, %c0_28, %c0_29] : memref<1x16x128xf32, #tpu.memory_space<vmem>>, vector<1x16x128xf32>
    tpu.vector_store %arg5[%c0_27, %c0_28, %c0_29], %27 {strides = array<i32>} : memref<1x16x128xf32, #tpu.memory_space<vmem>>, vector<1x16x128xf32>,
    %29 = vector.shape_cast %26 : vector<16x128xf32> to vector<1x16x128xf32>
    %c0_30 = arith.constant 0 : index
    %c0_31 = arith.constant 0 : index
    %c0_32 = arith.constant 0 : index
    %30 = vector.load %arg6[%c0_30, %c0_31, %c0_32] : memref<1x16x128xf32, #tpu.memory_space<vmem>>, vector<1x16x128xf32>
    tpu.vector_store %arg6[%c0_30, %c0_31, %c0_32], %29 {strides = array<i32>} : memref<1x16x128xf32, #tpu.memory_space<vmem>>, vector<1x16x128xf32>,
    %31 = arith.mulf %25, %25 : vector<16x128xf32>
    %32 = arith.mulf %26, %26 : vector<16x128xf32>
    %33 = arith.addf %31, %32 : vector<16x128xf32>
    %34 = math.sqrt %33 : vector<16x128xf32>
    %cst_33 = arith.constant dense<0.000000e+00> : vector<128xf32>
    %35 = vector.multi_reduction <add>, %34, %cst_33 [0] : vector<16x128xf32> to vector<128xf32>
    %36 = vector.shape_cast %35 : vector<128xf32> to vector<1x128xf32>
    %cst_34 = arith.constant dense<0.000000e+00> : vector<128xf32>
    %37 = vector.multi_reduction <add>, %33, %cst_34 [0] : vector<16x128xf32> to vector<128xf32>
    %38 = vector.shape_cast %37 : vector<128xf32> to vector<1x128xf32>
    %39 = tpu.concatenate %36, %38 in 0 : vector<1x128xf32>, vector<1x128xf32> -> vector<2x128xf32>
    %40 = vector.shape_cast %39 : vector<2x128xf32> to vector<1x2x128xf32>
    %c0_35 = arith.constant 0 : index
    %c0_36 = arith.constant 0 : index
    %c0_37 = arith.constant 0 : index
    %41 = vector.load %arg7[%c0_35, %c0_36, %c0_37] : memref<1x2x128xf32, #tpu.memory_space<vmem>>, vector<1x2x128xf32>
    tpu.vector_store %arg7[%c0_35, %c0_36, %c0_37], %40 {strides = array<i32>} : memref<1x2x128xf32, #tpu.memory_space<vmem>>, vector<1x2x128xf32>,
    return
  }
  func.func @transform_0(%arg0: i32) -> (i32, i32, i32) {
    %c0_i32 = arith.constant 0 : i32
    %c0_i32_0 = arith.constant 0 : i32
    %c0_i32_1 = arith.constant 0 : i32
    return %arg0, %c0_i32, %c0_i32_0 : i32, i32, i32
  }
  func.func @transform_1(%arg0: i32) -> (i32, i32, i32) {
    %c0_i32 = arith.constant 0 : i32
    %c0_i32_0 = arith.constant 0 : i32
    %c0_i32_1 = arith.constant 0 : i32
    return %arg0, %c0_i32, %c0_i32_0 : i32, i32, i32
  }
  func.func @transform_2(%arg0: i32) -> (i32, i32, i32) {
    %c0_i32 = arith.constant 0 : i32
    %c0_i32_0 = arith.constant 0 : i32
    %c0_i32_1 = arith.constant 0 : i32
    %c0_i32_2 = arith.constant 0 : i32
    return %c0_i32, %c0_i32_0, %c0_i32_1 : i32, i32, i32
  }
  func.func @transform_3(%arg0: i32) -> (i32, i32) {
    %c0_i32 = arith.constant 0 : i32
    %c0_i32_0 = arith.constant 0 : i32
    %c0_i32_1 = arith.constant 0 : i32
    return %c0_i32, %c0_i32_0 : i32, i32
  }
  func.func @transform_4(%arg0: i32) -> (i32, i32, i32) {
    %c0_i32 = arith.constant 0 : i32
    %c0_i32_0 = arith.constant 0 : i32
    %c0_i32_1 = arith.constant 0 : i32
    return %arg0, %c0_i32, %c0_i32_0 : i32, i32, i32
  }
  func.func @transform_5(%arg0: i32) -> (i32, i32, i32) {
    %c0_i32 = arith.constant 0 : i32
    %c0_i32_0 = arith.constant 0 : i32
    %c0_i32_1 = arith.constant 0 : i32
    return %arg0, %c0_i32, %c0_i32_0 : i32, i32, i32
  }
  func.func @transform_6(%arg0: i32) -> (i32, i32, i32) {
    %c0_i32 = arith.constant 0 : i32
    %c0_i32_0 = arith.constant 0 : i32
    %c0_i32_1 = arith.constant 0 : i32
    return %arg0, %c0_i32, %c0_i32_0 : i32, i32, i32
  }
}

module attributes {stable_mosaic.version = 11 : i64} {
  func.func @_bn2_residual_kernel(%arg0: i32, %arg1: memref<1x16x128xf32, #tpu.memory_space<vmem>>, %arg2: memref<1x16x128xf32, #tpu.memory_space<vmem>>, %arg3: memref<1x16x128xf32, #tpu.memory_space<vmem>>, %arg4: memref<1x16x128xf32, #tpu.memory_space<vmem>>, %arg5: memref<1x128xf32, #tpu.memory_space<vmem>>, %arg6: memref<1x128xf32, #tpu.memory_space<vmem>>, %arg7: memref<1x16x128xf32, #tpu.memory_space<vmem>>, %arg8: memref<1x16x128xf32, #tpu.memory_space<vmem>>) attributes {dimension_semantics = [#tpu.dimension_semantics<parallel>], iteration_bounds = array<i64: 2>, scalar_prefetch = 0 : i64, scratch_operands = 0 : i64, tpu.core_type = #tpu.core_type<tc>, window_params = [{transform_indices = @transform_0, window_bounds = array<i64: 1, 16, 128>}, {transform_indices = @transform_1, window_bounds = array<i64: 1, 16, 128>}, {transform_indices = @transform_2, window_bounds = array<i64: 1, 16, 128>}, {transform_indices = @transform_3, window_bounds = array<i64: 1, 16, 128>}, {pipeline_mode = #tpu.pipeline_mode<synchronous>, transform_indices = @transform_4, window_bounds = array<i64: 1, 128>}, {pipeline_mode = #tpu.pipeline_mode<synchronous>, transform_indices = @transform_5, window_bounds = array<i64: 1, 128>}, {transform_indices = @transform_6, window_bounds = array<i64: 1, 16, 128>}, {transform_indices = @transform_7, window_bounds = array<i64: 1, 16, 128>}]} {
    %c0 = arith.constant 0 : index
    %c0_0 = arith.constant 0 : index
    %c0_1 = arith.constant 0 : index
    %0 = vector.load %arg1[%c0, %c0_0, %c0_1] : memref<1x16x128xf32, #tpu.memory_space<vmem>>, vector<1x16x128xf32>
    %c0_2 = arith.constant 0 : index
    %c0_3 = arith.constant 0 : index
    %c0_4 = arith.constant 0 : index
    %1 = vector.load %arg2[%c0_2, %c0_3, %c0_4] : memref<1x16x128xf32, #tpu.memory_space<vmem>>, vector<1x16x128xf32>
    %2 = arith.mulf %0, %0 : vector<1x16x128xf32>
    %3 = arith.mulf %1, %1 : vector<1x16x128xf32>
    %4 = arith.addf %2, %3 : vector<1x16x128xf32>
    %cst = arith.constant 0.000000e+00 : f32
    %5 = vector.broadcast %cst : f32 to vector<1x16x128xf32>
    %6 = arith.cmpf ogt, %4, %5 : vector<1x16x128xf32>
    %cst_5 = arith.constant 1.000000e+00 : f32
    %7 = vector.broadcast %cst_5 : f32 to vector<1x16x128xf32>
    %8 = arith.select %6, %4, %7 : vector<1x16x128xi1>, vector<1x16x128xf32>
    %9 = math.rsqrt %8 : vector<1x16x128xf32>
    %10 = arith.mulf %4, %9 : vector<1x16x128xf32>
    %c0_6 = arith.constant 0 : index
    %c0_7 = arith.constant 0 : index
    %11 = vector.load %arg5[%c0_6, %c0_7] : memref<1x128xf32, #tpu.memory_space<vmem>>, vector<1x128xf32>
    %12 = vector.shape_cast %11 : vector<1x128xf32> to vector<1x1x128xf32>
    %13 = vector.broadcast %12 : vector<1x1x128xf32> to vector<1x16x128xf32>
    %14 = arith.mulf %10, %13 : vector<1x16x128xf32>
    %c0_8 = arith.constant 0 : index
    %c0_9 = arith.constant 0 : index
    %15 = vector.load %arg6[%c0_8, %c0_9] : memref<1x128xf32, #tpu.memory_space<vmem>>, vector<1x128xf32>
    %16 = vector.shape_cast %15 : vector<1x128xf32> to vector<1x1x128xf32>
    %17 = vector.broadcast %16 : vector<1x1x128xf32> to vector<1x16x128xf32>
    %18 = arith.addf %14, %17 : vector<1x16x128xf32>
    %19 = arith.mulf %0, %9 : vector<1x16x128xf32>
    %cst_10 = arith.constant 1.000000e+00 : f32
    %20 = vector.broadcast %cst_10 : f32 to vector<1x16x128xf32>
    %21 = arith.select %6, %19, %20 : vector<1x16x128xi1>, vector<1x16x128xf32>
    %22 = arith.mulf %1, %9 : vector<1x16x128xf32>
    %cst_11 = arith.constant 0.000000e+00 : f32
    %23 = vector.broadcast %cst_11 : f32 to vector<1x16x128xf32>
    %24 = arith.select %6, %22, %23 : vector<1x16x128xi1>, vector<1x16x128xf32>
    %25 = arith.mulf %18, %21 : vector<1x16x128xf32>
    %c0_12 = arith.constant 0 : index
    %c0_13 = arith.constant 0 : index
    %c0_14 = arith.constant 0 : index
    %26 = vector.load %arg3[%c0_12, %c0_13, %c0_14] : memref<1x16x128xf32, #tpu.memory_space<vmem>>, vector<1x16x128xf32>
    %27 = arith.addf %25, %26 : vector<1x16x128xf32>
    %c0_15 = arith.constant 0 : index
    %c0_16 = arith.constant 0 : index
    %c0_17 = arith.constant 0 : index
    %28 = vector.load %arg7[%c0_15, %c0_16, %c0_17] : memref<1x16x128xf32, #tpu.memory_space<vmem>>, vector<1x16x128xf32>
    tpu.vector_store %arg7[%c0_15, %c0_16, %c0_17], %27 {strides = array<i32>} : memref<1x16x128xf32, #tpu.memory_space<vmem>>, vector<1x16x128xf32>,
    %29 = arith.mulf %18, %24 : vector<1x16x128xf32>
    %c0_18 = arith.constant 0 : index
    %c0_19 = arith.constant 0 : index
    %c0_20 = arith.constant 0 : index
    %30 = vector.load %arg4[%c0_18, %c0_19, %c0_20] : memref<1x16x128xf32, #tpu.memory_space<vmem>>, vector<1x16x128xf32>
    %31 = arith.addf %29, %30 : vector<1x16x128xf32>
    %c0_21 = arith.constant 0 : index
    %c0_22 = arith.constant 0 : index
    %c0_23 = arith.constant 0 : index
    %32 = vector.load %arg8[%c0_21, %c0_22, %c0_23] : memref<1x16x128xf32, #tpu.memory_space<vmem>>, vector<1x16x128xf32>
    tpu.vector_store %arg8[%c0_21, %c0_22, %c0_23], %31 {strides = array<i32>} : memref<1x16x128xf32, #tpu.memory_space<vmem>>, vector<1x16x128xf32>,
    return
  }
  func.func @transform_0(%arg0: i32) -> (i32, i32, i32) {
    %c0_i32 = arith.constant 0 : i32
    %c0_i32_0 = arith.constant 0 : i32
    %c0_i32_1 = arith.constant 0 : i32
    return %arg0, %c0_i32, %c0_i32_0 : i32, i32, i32
  }
  func.func @transform_1(%arg0: i32) -> (i32, i32, i32) {
    %c0_i32 = arith.constant 0 : i32
    %c0_i32_0 = arith.constant 0 : i32
    %c0_i32_1 = arith.constant 0 : i32
    return %arg0, %c0_i32, %c0_i32_0 : i32, i32, i32
  }
  func.func @transform_2(%arg0: i32) -> (i32, i32, i32) {
    %c0_i32 = arith.constant 0 : i32
    %c0_i32_0 = arith.constant 0 : i32
    %c0_i32_1 = arith.constant 0 : i32
    return %arg0, %c0_i32, %c0_i32_0 : i32, i32, i32
  }
  func.func @transform_3(%arg0: i32) -> (i32, i32, i32) {
    %c0_i32 = arith.constant 0 : i32
    %c0_i32_0 = arith.constant 0 : i32
    %c0_i32_1 = arith.constant 0 : i32
    return %arg0, %c0_i32, %c0_i32_0 : i32, i32, i32
  }
  func.func @transform_4(%arg0: i32) -> (i32, i32) {
    %c0_i32 = arith.constant 0 : i32
    %c0_i32_0 = arith.constant 0 : i32
    %c0_i32_1 = arith.constant 0 : i32
    return %c0_i32, %c0_i32_0 : i32, i32
  }
  func.func @transform_5(%arg0: i32) -> (i32, i32) {
    %c0_i32 = arith.constant 0 : i32
    %c0_i32_0 = arith.constant 0 : i32
    %c0_i32_1 = arith.constant 0 : i32
    return %c0_i32, %c0_i32_0 : i32, i32
  }
  func.func @transform_6(%arg0: i32) -> (i32, i32, i32) {
    %c0_i32 = arith.constant 0 : i32
    %c0_i32_0 = arith.constant 0 : i32
    %c0_i32_1 = arith.constant 0 : i32
    return %arg0, %c0_i32, %c0_i32_0 : i32, i32, i32
  }
  func.func @transform_7(%arg0: i32) -> (i32, i32, i32) {
    %c0_i32 = arith.constant 0 : i32
    %c0_i32_0 = arith.constant 0 : i32
    %c0_i32_1 = arith.constant 0 : i32
    return %arg0, %c0_i32, %c0_i32_0 : i32, i32, i32
  }
}

module attributes {stable_mosaic.version = 11 : i64} {
  func.func @_fused_conv_kernel(%arg0: i32, %arg1: memref<1x16x128xf32, #tpu.memory_space<vmem>>, %arg2: memref<1x16x128xf32, #tpu.memory_space<vmem>>, %arg3: memref<1x128xf32, #tpu.memory_space<vmem>>, %arg4: memref<1x128xf32, #tpu.memory_space<vmem>>, %arg5: memref<3x256x256xf32, #tpu.memory_space<vmem>>, %arg6: memref<1x256xf32, #tpu.memory_space<vmem>>, %arg7: memref<1x16x128xf32, #tpu.memory_space<vmem>>, %arg8: memref<1x16x128xf32, #tpu.memory_space<vmem>>, %arg9: memref<1x2x128xf32, #tpu.memory_space<vmem>>, %arg10: memref<18x256xf32, #tpu.memory_space<vmem>>) attributes {dimension_semantics = [#tpu.dimension_semantics<parallel>], iteration_bounds = array<i64: 2>, scalar_prefetch = 0 : i64, scratch_operands = 1 : i64, tpu.core_type = #tpu.core_type<tc>, window_params = [{transform_indices = @transform_0, window_bounds = array<i64: 1, 16, 128>}, {transform_indices = @transform_1, window_bounds = array<i64: 1, 16, 128>}, {pipeline_mode = #tpu.pipeline_mode<synchronous>, transform_indices = @transform_2, window_bounds = array<i64: 1, 128>}, {pipeline_mode = #tpu.pipeline_mode<synchronous>, transform_indices = @transform_3, window_bounds = array<i64: 1, 128>}, {pipeline_mode = #tpu.pipeline_mode<synchronous>, transform_indices = @transform_4, window_bounds = array<i64: 3, 256, 256>}, {pipeline_mode = #tpu.pipeline_mode<synchronous>, transform_indices = @transform_5, window_bounds = array<i64: 1, 256>}, {transform_indices = @transform_6, window_bounds = array<i64: 1, 16, 128>}, {transform_indices = @transform_7, window_bounds = array<i64: 1, 16, 128>}, {transform_indices = @transform_8, window_bounds = array<i64: 1, 2, 128>}]} {
    %c0 = arith.constant 0 : index
    %c0_0 = arith.constant 0 : index
    %c0_1 = arith.constant 0 : index
    %0 = vector.load %arg1[%c0, %c0_0, %c0_1] : memref<1x16x128xf32, #tpu.memory_space<vmem>>, vector<1x16x128xf32>
    %1 = vector.shape_cast %0 : vector<1x16x128xf32> to vector<16x128xf32>
    %c0_2 = arith.constant 0 : index
    %c0_3 = arith.constant 0 : index
    %c0_4 = arith.constant 0 : index
    %2 = vector.load %arg2[%c0_2, %c0_3, %c0_4] : memref<1x16x128xf32, #tpu.memory_space<vmem>>, vector<1x16x128xf32>
    %3 = vector.shape_cast %2 : vector<1x16x128xf32> to vector<16x128xf32>
    %4 = arith.mulf %1, %1 : vector<16x128xf32>
    %5 = arith.mulf %3, %3 : vector<16x128xf32>
    %6 = arith.addf %4, %5 : vector<16x128xf32>
    %cst = arith.constant 0.000000e+00 : f32
    %7 = vector.broadcast %cst : f32 to vector<16x128xf32>
    %8 = arith.cmpf ogt, %6, %7 : vector<16x128xf32>
    %cst_5 = arith.constant 1.000000e+00 : f32
    %9 = vector.broadcast %cst_5 : f32 to vector<16x128xf32>
    %10 = arith.select %8, %6, %9 : vector<16x128xi1>, vector<16x128xf32>
    %11 = math.rsqrt %10 : vector<16x128xf32>
    %12 = arith.mulf %6, %11 : vector<16x128xf32>
    %c0_6 = arith.constant 0 : index
    %c0_7 = arith.constant 0 : index
    %13 = vector.load %arg3[%c0_6, %c0_7] : memref<1x128xf32, #tpu.memory_space<vmem>>, vector<1x128xf32>
    %14 = vector.broadcast %13 : vector<1x128xf32> to vector<16x128xf32>
    %15 = arith.mulf %12, %14 : vector<16x128xf32>
    %c0_8 = arith.constant 0 : index
    %c0_9 = arith.constant 0 : index
    %16 = vector.load %arg4[%c0_8, %c0_9] : memref<1x128xf32, #tpu.memory_space<vmem>>, vector<1x128xf32>
    %17 = vector.broadcast %16 : vector<1x128xf32> to vector<16x128xf32>
    %18 = arith.addf %15, %17 : vector<16x128xf32>
    %cst_10 = arith.constant 0.000000e+00 : f32
    %19 = vector.broadcast %cst_10 : f32 to vector<16x128xf32>
    %20 = arith.maximumf %18, %19 : vector<16x128xf32>
    %21 = arith.mulf %1, %11 : vector<16x128xf32>
    %22 = arith.mulf %20, %21 : vector<16x128xf32>
    %23 = arith.select %8, %22, %20 : vector<16x128xi1>, vector<16x128xf32>
    %24 = arith.mulf %3, %11 : vector<16x128xf32>
    %25 = arith.mulf %20, %24 : vector<16x128xf32>
    %cst_11 = arith.constant 0.000000e+00 : f32
    %26 = vector.broadcast %cst_11 : f32 to vector<16x128xf32>
    %27 = arith.select %8, %25, %26 : vector<16x128xi1>, vector<16x128xf32>
    %cst_12 = arith.constant 0.000000e+00 : f32
    %28 = vector.broadcast %cst_12 : f32 to vector<18x256xf32>
    %c0_13 = arith.constant 0 : index
    %c0_14 = arith.constant 0 : index
    %29 = vector.load %arg10[%c0_13, %c0_14] : memref<18x256xf32, #tpu.memory_space<vmem>>, vector<18x256xf32>
    tpu.vector_store %arg10[%c0_13, %c0_14], %28 {strides = array<i32>} : memref<18x256xf32, #tpu.memory_space<vmem>>, vector<18x256xf32>,
    %30 = tpu.concatenate %23, %27 in 1 : vector<16x128xf32>, vector<16x128xf32> -> vector<16x256xf32>
    %c1 = arith.constant 1 : index
    %c0_15 = arith.constant 0 : index
    %31 = vector.load %arg10[%c1, %c0_15] : memref<18x256xf32, #tpu.memory_space<vmem>>, vector<16x256xf32>
    tpu.vector_store %arg10[%c1, %c0_15], %30 {strides = array<i32>} : memref<18x256xf32, #tpu.memory_space<vmem>>, vector<16x256xf32>,
    %c0_16 = arith.constant 0 : index
    %c0_17 = arith.constant 0 : index
    %32 = vector.load %arg10[%c0_16, %c0_17] : memref<18x256xf32, #tpu.memory_space<vmem>>, vector<16x256xf32>
    %c0_18 = arith.constant 0 : index
    %c0_19 = arith.constant 0 : index
    %c0_20 = arith.constant 0 : index
    %33 = vector.load %arg5[%c0_18, %c0_19, %c0_20] : memref<3x256x256xf32, #tpu.memory_space<vmem>>, vector<1x256x256xf32>
    %34 = vector.shape_cast %33 : vector<1x256x256xf32> to vector<256x256xf32>
    %cst_21 = arith.constant dense<0.000000e+00> : vector<16x256xf32>
    %35 = tpu.matmul %32, %34, %cst_21 {dimension_numbers = #tpu.dot_dimension_numbers<[1], [0], [0], [1], [0, 0, 1, 1], [], []>} : vector<16x256xf32>, vector<256x256xf32>, vector<16x256xf32> -> vector<16x256xf32>
    %c1_22 = arith.constant 1 : index
    %c0_23 = arith.constant 0 : index
    %36 = vector.load %arg10[%c1_22, %c0_23] : memref<18x256xf32, #tpu.memory_space<vmem>>, vector<16x256xf32>
    %c1_24 = arith.constant 1 : index
    %c0_25 = arith.constant 0 : index
    %c0_26 = arith.constant 0 : index
    %37 = vector.load %arg5[%c1_24, %c0_25, %c0_26] : memref<3x256x256xf32, #tpu.memory_space<vmem>>, vector<1x256x256xf32>
    %38 = vector.shape_cast %37 : vector<1x256x256xf32> to vector<256x256xf32>
    %cst_27 = arith.constant dense<0.000000e+00> : vector<16x256xf32>
    %39 = tpu.matmul %36, %38, %cst_27 {dimension_numbers = #tpu.dot_dimension_numbers<[1], [0], [0], [1], [0, 0, 1, 1], [], []>} : vector<16x256xf32>, vector<256x256xf32>, vector<16x256xf32> -> vector<16x256xf32>
    %40 = arith.addf %35, %39 : vector<16x256xf32>
    %c2 = arith.constant 2 : index
    %c0_28 = arith.constant 0 : index
    %41 = vector.load %arg10[%c2, %c0_28] : memref<18x256xf32, #tpu.memory_space<vmem>>, vector<16x256xf32>
    %c2_29 = arith.constant 2 : index
    %c0_30 = arith.constant 0 : index
    %c0_31 = arith.constant 0 : index
    %42 = vector.load %arg5[%c2_29, %c0_30, %c0_31] : memref<3x256x256xf32, #tpu.memory_space<vmem>>, vector<1x256x256xf32>
    %43 = vector.shape_cast %42 : vector<1x256x256xf32> to vector<256x256xf32>
    %cst_32 = arith.constant dense<0.000000e+00> : vector<16x256xf32>
    %44 = tpu.matmul %41, %43, %cst_32 {dimension_numbers = #tpu.dot_dimension_numbers<[1], [0], [0], [1], [0, 0, 1, 1], [], []>} : vector<16x256xf32>, vector<256x256xf32>, vector<16x256xf32> -> vector<16x256xf32>
    %45 = arith.addf %40, %44 : vector<16x256xf32>
    %c0_33 = arith.constant 0 : index
    %c0_34 = arith.constant 0 : index
    %46 = vector.load %arg6[%c0_33, %c0_34] : memref<1x256xf32, #tpu.memory_space<vmem>>, vector<1x256xf32>
    %47 = vector.broadcast %46 : vector<1x256xf32> to vector<16x256xf32>
    %48 = arith.addf %45, %47 : vector<16x256xf32>
    %49 = vector.extract_strided_slice %48 {offsets = [0, 0], sizes = [16, 128], strides = [1, 1]} : vector<16x256xf32> to vector<16x128xf32>
    %50 = vector.extract_strided_slice %48 {offsets = [0, 128], sizes = [16, 128], strides = [1, 1]} : vector<16x256xf32> to vector<16x128xf32>
    %51 = vector.shape_cast %49 : vector<16x128xf32> to vector<1x16x128xf32>
    %c0_35 = arith.constant 0 : index
    %c0_36 = arith.constant 0 : index
    %c0_37 = arith.constant 0 : index
    %52 = vector.load %arg7[%c0_35, %c0_36, %c0_37] : memref<1x16x128xf32, #tpu.memory_space<vmem>>, vector<1x16x128xf32>
    tpu.vector_store %arg7[%c0_35, %c0_36, %c0_37], %51 {strides = array<i32>} : memref<1x16x128xf32, #tpu.memory_space<vmem>>, vector<1x16x128xf32>,
    %53 = vector.shape_cast %50 : vector<16x128xf32> to vector<1x16x128xf32>
    %c0_38 = arith.constant 0 : index
    %c0_39 = arith.constant 0 : index
    %c0_40 = arith.constant 0 : index
    %54 = vector.load %arg8[%c0_38, %c0_39, %c0_40] : memref<1x16x128xf32, #tpu.memory_space<vmem>>, vector<1x16x128xf32>
    tpu.vector_store %arg8[%c0_38, %c0_39, %c0_40], %53 {strides = array<i32>} : memref<1x16x128xf32, #tpu.memory_space<vmem>>, vector<1x16x128xf32>,
    %55 = arith.mulf %49, %49 : vector<16x128xf32>
    %56 = arith.mulf %50, %50 : vector<16x128xf32>
    %57 = arith.addf %55, %56 : vector<16x128xf32>
    %58 = math.sqrt %57 : vector<16x128xf32>
    %cst_41 = arith.constant dense<0.000000e+00> : vector<128xf32>
    %59 = vector.multi_reduction <add>, %58, %cst_41 [0] : vector<16x128xf32> to vector<128xf32>
    %60 = vector.shape_cast %59 : vector<128xf32> to vector<1x128xf32>
    %cst_42 = arith.constant dense<0.000000e+00> : vector<128xf32>
    %61 = vector.multi_reduction <add>, %57, %cst_42 [0] : vector<16x128xf32> to vector<128xf32>
    %62 = vector.shape_cast %61 : vector<128xf32> to vector<1x128xf32>
    %63 = tpu.concatenate %60, %62 in 0 : vector<1x128xf32>, vector<1x128xf32> -> vector<2x128xf32>
    %64 = vector.shape_cast %63 : vector<2x128xf32> to vector<1x2x128xf32>
    %c0_43 = arith.constant 0 : index
    %c0_44 = arith.constant 0 : index
    %c0_45 = arith.constant 0 : index
    %65 = vector.load %arg9[%c0_43, %c0_44, %c0_45] : memref<1x2x128xf32, #tpu.memory_space<vmem>>, vector<1x2x128xf32>
    tpu.vector_store %arg9[%c0_43, %c0_44, %c0_45], %64 {strides = array<i32>} : memref<1x2x128xf32, #tpu.memory_space<vmem>>, vector<1x2x128xf32>,
    return
  }
  func.func @transform_0(%arg0: i32) -> (i32, i32, i32) {
    %c0_i32 = arith.constant 0 : i32
    %c0_i32_0 = arith.constant 0 : i32
    %c0_i32_1 = arith.constant 0 : i32
    return %arg0, %c0_i32, %c0_i32_0 : i32, i32, i32
  }
  func.func @transform_1(%arg0: i32) -> (i32, i32, i32) {
    %c0_i32 = arith.constant 0 : i32
    %c0_i32_0 = arith.constant 0 : i32
    %c0_i32_1 = arith.constant 0 : i32
    return %arg0, %c0_i32, %c0_i32_0 : i32, i32, i32
  }
  func.func @transform_2(%arg0: i32) -> (i32, i32) {
    %c0_i32 = arith.constant 0 : i32
    %c0_i32_0 = arith.constant 0 : i32
    %c0_i32_1 = arith.constant 0 : i32
    return %c0_i32, %c0_i32_0 : i32, i32
  }
  func.func @transform_3(%arg0: i32) -> (i32, i32) {
    %c0_i32 = arith.constant 0 : i32
    %c0_i32_0 = arith.constant 0 : i32
    %c0_i32_1 = arith.constant 0 : i32
    return %c0_i32, %c0_i32_0 : i32, i32
  }
  func.func @transform_4(%arg0: i32) -> (i32, i32, i32) {
    %c0_i32 = arith.constant 0 : i32
    %c0_i32_0 = arith.constant 0 : i32
    %c0_i32_1 = arith.constant 0 : i32
    %c0_i32_2 = arith.constant 0 : i32
    return %c0_i32, %c0_i32_0, %c0_i32_1 : i32, i32, i32
  }
  func.func @transform_5(%arg0: i32) -> (i32, i32) {
    %c0_i32 = arith.constant 0 : i32
    %c0_i32_0 = arith.constant 0 : i32
    %c0_i32_1 = arith.constant 0 : i32
    return %c0_i32, %c0_i32_0 : i32, i32
  }
  func.func @transform_6(%arg0: i32) -> (i32, i32, i32) {
    %c0_i32 = arith.constant 0 : i32
    %c0_i32_0 = arith.constant 0 : i32
    %c0_i32_1 = arith.constant 0 : i32
    return %arg0, %c0_i32, %c0_i32_0 : i32, i32, i32
  }
  func.func @transform_7(%arg0: i32) -> (i32, i32, i32) {
    %c0_i32 = arith.constant 0 : i32
    %c0_i32_0 = arith.constant 0 : i32
    %c0_i32_1 = arith.constant 0 : i32
    return %arg0, %c0_i32, %c0_i32_0 : i32, i32, i32
  }
  func.func @transform_8(%arg0: i32) -> (i32, i32, i32) {
    %c0_i32 = arith.constant 0 : i32
    %c0_i32_0 = arith.constant 0 : i32
    %c0_i32_1 = arith.constant 0 : i32
    return %arg0, %c0_i32, %c0_i32_0 : i32, i32, i32
  }
}

</mosaic_0001>

<bundles_post_ra>
// kernel: tile.48
= control target key start
LH: loop header
LB: loop body
LE: loop exit
PB: predicated region body
PF: predicated region fallthrough
CT: control target
= control target key end

     0   :  { %2 = vsyncpa [#allocation1], 0  ;;  %s47_s6 = smov [#allocation0]   ;;  %s76_s0 = inlined_call_operand.hbm [shape: f32[8], index: 0, kind: input, shape index: {}]   ;;  %s77_s1 = inlined_call_operand.vmem [shape: f32[16,8], index: 1, kind: output, shape index: {}]  }
   0x1   :  { %s9_s7 = sshll.u32 %s47_s6, 4  ;;  %s23_s10 = scalar_lea.hbm %s76_s0, 16  ;;  %s10_s7 = int_to_ptr.vmem [resolvable:$true] %s9_s7 }
   0x2   :  { %p24_p0 = scmp.ne.s32.totalorder %s76_s0, %s23_s10  ;;  %p27_p1 = scmp.lt.u32.totalorder %s23_s10, %s76_s0 }
   0x4   :  { %p29_p2 = pnand %p27_p1, %p24_p0 }
   0x6   :  { %32 = shalt.err (!%p29_p2)
}
   0x7   :  { %s33_s15 = scalar_lea.vmem %s10_s7, 16  ;;  %s37_s16 = scalar_lea.vmem %s10_s7, 32 }
   0x8   :  { %p34_p3 = scmp.ne.s32.totalorder %s10_s7, %s33_s15  ;;  %p38_p4 = scmp.lt.s32.totalorder %s10_s7, %s10_s7 }
   0x9   :  { %p39_p5 = scmp.lt.s32.totalorder %s37_s16, %s33_s15 }
   0xb   :  { %p40_p6 = por %p39_p5, %p38_p4 }
   0xd   :  { %p41_p7 = pnand %p40_p6, %p34_p3 }
   0xf   :  { %44 = shalt.err (!%p41_p7)
}
  0x10   :  { %12 = dma.hbm_to_vmem [thread:$0]  %s76_s0, 16, %s10_s7, [#allocation1]  }
  0x11   :  { %45 = dma.done.wait [#allocation1], 16  }
  0x12   :  { %46 = vsyncadd [#allocation1], 4294967280  ;;  %v16_v0 = vld [vmem:[#allocation0] ss:$0 sm:$0xff] }
  0x13   :  { %17 = vst [vmem:[%s77_s1] sm:$0xff] %v16_v0  ;;  %21 = vst [vmem:[%s77_s1 + $0x8] sm:$0xff] %v16_v0 }
  0x14   :  { %20 = vsyncpa [#allocation1], 1 }

// kernel: tile.49
= control target key start
LH: loop header
LB: loop body
LE: loop exit
PB: predicated region body
PF: predicated region fallthrough
CT: control target
= control target key end

     0   :  { %s131_s10 = smov 120   ;;  %s132_s11 = smov 104   ;;  %vm3_vm0 = vcmask 64512   ;;  %vm9_vm1 = vcmask 1048512   ;;  %vm15_vm2 = vcmask 982912   ;;  %vm21_vm3 = vcmask 917312   ;;  %s207_s0 = inlined_call_operand.vmem [shape: f32[16,8], index: 0, kind: input, shape index: {}]   ;;  %s208_s1 = inlined_call_operand.vmem [shape: f32[128], index: 1, kind: output, shape index: {}]  }
   0x1   :  { %v101_v0 = vld [vmem:[%s207_s0 + $0xf] sm:$0x1]   ;;  %v103_v1 = vld [vmem:[%s207_s0 + $0xd] sm:$0x1]   ;;  %v102_v2 = vld [vmem:[%s207_s0 + $0xe] sm:$0x1]  }
   0x2   :  { %7 = vrot.lane.b32.xlu0 %v101_v0, %s131_s10  ;;  %19 = vrot.lane.b32.xlu1 %v103_v1, %s132_s11  ;;  %v104_v3 = vld [vmem:[%s207_s0 + $0xc] sm:$0x1]   ;;  %s133_s16 = smov 112   ;;  %s134_s17 = smov 96   ;;  %v105_v4 = vld [vmem:[%s207_s0 + $0xb] sm:$0x1]  }
   0x3   :  { %v106_v5 = vld [vmem:[%s207_s0 + $0xa] sm:$0x1]   ;;  %v2_v6 = vld [vmem:[%s207_s0] sm:$0x1]   ;;  %s135_s24 = smov 88   ;;  %s136_s25 = smov 80  }
   0x4   :  { %4 = vst.msk [vmem:[#allocation0] sm:$0x1] %vm3_vm0, %v2_v6   ;;  %v107_v7 = vld [vmem:[%s207_s0 + $0x9] sm:$0x1]   ;;  %v108_v8 = vld [vmem:[%s207_s0 + $0x8] sm:$0x1]  }
   0x5   :  { %s137_s30 = smov 72   ;;  %s138_s2 = smov 64   ;;  %v109_v9 = vld [vmem:[%s207_s0 + $0x7] sm:$0x1]   ;;  %v110_v10 = vld [vmem:[%s207_s0 + $0x6] sm:$0x1]  }
   0x6   :  { %13 = vrot.lane.b32.xlu0 %v102_v2, %s133_s16  ;;  %25 = vrot.lane.b32.xlu1 %v104_v3, %s134_s17  ;;  %s139_s7 = smov 56   ;;  %s140_s8 = smov 48   ;;  %v111_v11 = vld [vmem:[%s207_s0 + $0x5] sm:$0x1]   ;;  %v112_v12 = vld [vmem:[%s207_s0 + $0x4] sm:$0x1]  }
   0x7   :  { %s141_s13 = smov 40   ;;  %s142_s14 = smov 32   ;;  %v113_v13 = vld [vmem:[%s207_s0 + $0x3] sm:$0x1]   ;;  %v114_v14 = vld [vmem:[%s207_s0 + $0x2] sm:$0x1]  }
   0x8   :  { %s143_s19 = smov 24   ;;  %s144_s20 = smov 16   ;;  %v115_v15 = vld [vmem:[%s207_s0 + $0x1] sm:$0x1]   ;;  %vm27_vm4 = vcmask 851712   ;;  %vm33_vm5 = vcmask 786112  }
   0x9   :  { %s145_s0 = smov 8   ;;  %vm39_vm6 = vcmask 720512   ;;  %vm45_vm7 = vcmask 654912   ;;  %vm51_vm8 = vcmask 589312   ;;  %vm57_vm9 = vcmask 523712  }
   0xa   :  { %31 = vrot.lane.b32.xlu0 %v105_v4, %s135_s24  ;;  %37 = vrot.lane.b32.xlu1 %v106_v5, %s136_s25  ;;  %vm63_vm10 = vcmask 458112   ;;  %vm69_vm11 = vcmask 392512   ;;  %vm75_vm12 = vcmask 326912   ;;  %vm81_vm13 = vcmask 261312  }
   0xb   :  { %vm87_vm14 = vcmask 195712   ;;  %vm93_vm15 = vcmask 130112  }
   0xe   :  { %43 = vrot.lane.b32.xlu0 %v107_v7, %s137_s30  ;;  %49 = vrot.lane.b32.xlu1 %v108_v8, %s138_s2 }
  0x12   :  { %55 = vrot.lane.b32.xlu0 %v109_v9, %s139_s7  ;;  %61 = vrot.lane.b32.xlu1 %v110_v10, %s140_s8 }
  0x16   :  { %67 = vrot.lane.b32.xlu0 %v111_v11, %s141_s13  ;;  %73 = vrot.lane.b32.xlu1 %v112_v12, %s142_s14 }
  0x1a   :  { %79 = vrot.lane.b32.xlu0 %v113_v13, %s143_s19  ;;  %85 = vrot.lane.b32.xlu1 %v114_v14, %s144_s20 }
  0x1e   :  { %91 = vrot.lane.b32.xlu0 %v115_v15, %s145_s0 }
  0x74   :  { %v8_v16 = vpop.permute.xlu0 %7   ;;  %v20_v17 = vpop.permute.xlu1 %19  }
  0x75   :  { %10 = vst.msk [vmem:[#allocation0] sm:$0x1] %vm9_vm1, %v8_v16  }
  0x78   :  { %v14_v18 = vpop.permute.xlu0 %13   ;;  %v26_v19 = vpop.permute.xlu1 %25  }
  0x79   :  { %16 = vst.msk [vmem:[#allocation0] sm:$0x1] %vm15_vm2, %v14_v18  }
  0x7a   :  { %22 = vst.msk [vmem:[#allocation0] sm:$0x1] %vm21_vm3, %v20_v17  }
  0x7b   :  { %28 = vst.msk [vmem:[#allocation0] sm:$0x1] %vm27_vm4, %v26_v19  }
  0x7c   :  { %v32_v20 = vpop.permute.xlu0 %31   ;;  %v38_v21 = vpop.permute.xlu1 %37  }
  0x7d   :  { %34 = vst.msk [vmem:[#allocation0] sm:$0x1] %vm33_vm5, %v32_v20  }
  0x7e   :  { %40 = vst.msk [vmem:[#allocation0] sm:$0x1] %vm39_vm6, %v38_v21  }
  0x80   :  { %v44_v22 = vpop.permute.xlu0 %43   ;;  %v50_v23 = vpop.permute.xlu1 %49  }
  0x81   :  { %46 = vst.msk [vmem:[#allocation0] sm:$0x1] %vm45_vm7, %v44_v22  }
  0x82   :  { %52 = vst.msk [vmem:[#allocation0] sm:$0x1] %vm51_vm8, %v50_v23  }
  0x84   :  { %v56_v24 = vpop.permute.xlu0 %55   ;;  %v62_v25 = vpop.permute.xlu1 %61  }
  0x85   :  { %58 = vst.msk [vmem:[#allocation0] sm:$0x1] %vm57_vm9, %v56_v24  }
  0x86   :  { %64 = vst.msk [vmem:[#allocation0] sm:$0x1] %vm63_vm10, %v62_v25  }
  0x88   :  { %v68_v26 = vpop.permute.xlu0 %67   ;;  %v74_v27 = vpop.permute.xlu1 %73  }
  0x89   :  { %70 = vst.msk [vmem:[#allocation0] sm:$0x1] %vm69_vm11, %v68_v26  }
  0x8a   :  { %76 = vst.msk [vmem:[#allocation0] sm:$0x1] %vm75_vm12, %v74_v27  }
  0x8c   :  { %v80_v28 = vpop.permute.xlu0 %79   ;;  %v86_v29 = vpop.permute.xlu1 %85  }
  0x8d   :  { %82 = vst.msk [vmem:[#allocation0] sm:$0x1] %vm81_vm13, %v80_v28  }
  0x8e   :  { %88 = vst.msk [vmem:[#allocation0] sm:$0x1] %vm87_vm14, %v86_v29  }
  0x90   :  { %v92_v30 = vpop.permute.xlu0 %91  }
  0x91   :  { %94 = vst.msk [vmem:[#allocation0] sm:$0x1] %vm93_vm15, %v92_v30  }
  0x98   :  { %v98_v31 = vld [vmem:[#allocation0] sm:$0x1] }
  0x99   :  { %100 = vst [vmem:[%s208_s1] sm:$0x1] %v98_v31 }

// kernel: tile.58
= control target key start
LH: loop header
LB: loop body
LE: loop exit
PB: predicated region body
PF: predicated region fallthrough
CT: control target
= control target key end

     0   :  { %s28_s0 = inlined_call_operand.vmem [shape: f32[8], index: 0, kind: input, shape index: {}]   ;;  %s29_s1 = inlined_call_operand.vmem [shape: f32[16,8], index: 1, kind: output, shape index: {}]  }
   0x1   :  { %v4_v0 = vld [vmem:[%s28_s0] ss:$0 sm:$0xff] }
   0x2   :  { %5 = vst [vmem:[%s29_s1] sm:$0xff] %v4_v0  ;;  %8 = vst [vmem:[%s29_s1 + $0x8] sm:$0xff] %v4_v0 }

// kernel: neg.11
= control target key start
LH: loop header
LB: loop body
LE: loop exit
PB: predicated region body
PF: predicated region fallthrough
CT: control target
= control target key end

     0   :  { %s264_s0 = inlined_call_operand.vmem [shape: f32[128,128], index: 0, kind: input, shape index: {}]   ;;  %s265_s1 = inlined_call_operand.vmem [shape: f32[128,128], index: 1, kind: output, shape index: {}]  }
   0x1   :  { %v2_v0 = vld [vmem:[%s264_s0] sm:$0xff]  ;;  %v128_v1 = vld [vmem:[%s264_s0 + $0x8] sm:$0xff]  ;;  %v130_v2 = vld [vmem:[%s264_s0 + $0x10] sm:$0xff] }
   0x2   :  { %v5_v3 = vxor.u32 2147483648, %v2_v0  ;;  %v12_v4 = vxor.u32 2147483648, %v128_v1  ;;  %v20_v5 = vxor.u32 2147483648, %v130_v2  ;;  %v132_v6 = vld [vmem:[%s264_s0 + $0x18] sm:$0xff]  ;;  %v134_v7 = vld [vmem:[%s264_s0 + $0x20] sm:$0xff]  ;;  %v136_v8 = vld [vmem:[%s264_s0 + $0x28] sm:$0xff] }
   0x3   :  { %v28_v9 = vxor.u32 2147483648, %v132_v6  ;;  %v36_v10 = vxor.u32 2147483648, %v134_v7  ;;  %v44_v11 = vxor.u32 2147483648, %v136_v8  ;;  %v138_v12 = vld [vmem:[%s264_s0 + $0x30] sm:$0xff]  ;;  %v140_v13 = vld [vmem:[%s264_s0 + $0x38] sm:$0xff]  ;;  %v142_v14 = vld [vmem:[%s264_s0 + $0x40] sm:$0xff] }
   0x4   :  { %7 = vst [vmem:[%s265_s1] sm:$0xff] %v5_v3  ;;  %129 = vst [vmem:[%s265_s1 + $0x8] sm:$0xff] %v12_v4  ;;  %v52_v15 = vxor.u32 2147483648, %v138_v12  ;;  %v60_v16 = vxor.u32 2147483648, %v140_v13  ;;  %v68_v17 = vxor.u32 2147483648, %v142_v14  ;;  %v144_v18 = vld [vmem:[%s264_s0 + $0x48] sm:$0xff]  ;;  %v146_v19 = vld [vmem:[%s264_s0 + $0x50] sm:$0xff] }
   0x5   :  { %131 = vst [vmem:[%s265_s1 + $0x10] sm:$0xff] %v20_v5  ;;  %v148_v20 = vld [vmem:[%s264_s0 + $0x58] sm:$0xff]  ;;  %133 = vst [vmem:[%s265_s1 + $0x18] sm:$0xff] %v28_v9  ;;  %v76_v21 = vxor.u32 2147483648, %v144_v18  ;;  %v84_v22 = vxor.u32 2147483648, %v146_v19  ;;  %v150_v24 = vld [vmem:[%s264_s0 + $0x60] sm:$0xff] }
   0x6   :  { %135 = vst [vmem:[%s265_s1 + $0x20] sm:$0xff] %v36_v10  ;;  %137 = vst [vmem:[%s265_s1 + $0x28] sm:$0xff] %v44_v11  ;;  %v92_v23 = vxor.u32 2147483648, %v148_v20  ;;  %v152_v25 = vld [vmem:[%s264_s0 + $0x68] sm:$0xff]  ;;  %v154_v26 = vld [vmem:[%s264_s0 + $0x70] sm:$0xff]  ;;  %v100_v27 = vxor.u32 2147483648, %v150_v24 }
   0x7   :  { %139 = vst [vmem:[%s265_s1 + $0x30] sm:$0xff] %v52_v15  ;;  %141 = vst [vmem:[%s265_s1 + $0x38] sm:$0xff] %v60_v16  ;;  %v108_v28 = vxor.u32 2147483648, %v152_v25  ;;  %v116_v29 = vxor.u32 2147483648, %v154_v26  ;;  %v156_v30 = vld [vmem:[%s264_s0 + $0x78] sm:$0xff] }
   0x8   :  { %143 = vst [vmem:[%s265_s1 + $0x40] sm:$0xff] %v68_v17  ;;  %145 = vst [vmem:[%s265_s1 + $0x48] sm:$0xff] %v76_v21  ;;  %v124_v31 = vxor.u32 2147483648, %v156_v30 }
   0x9   :  { %147 = vst [vmem:[%s265_s1 + $0x50] sm:$0xff] %v84_v22  ;;  %149 = vst [vmem:[%s265_s1 + $0x58] sm:$0xff] %v92_v23 }
   0xa   :  { %151 = vst [vmem:[%s265_s1 + $0x60] sm:$0xff] %v100_v27  ;;  %153 = vst [vmem:[%s265_s1 + $0x68] sm:$0xff] %v108_v28 }
   0xb   :  { %155 = vst [vmem:[%s265_s1 + $0x70] sm:$0xff] %v116_v29  ;;  %157 = vst [vmem:[%s265_s1 + $0x78] sm:$0xff] %v124_v31 }

// kernel: basic_block_forward.3
= control target key start
LH: loop header
LB: loop body
LE: loop exit
PB: predicated region body
PF: predicated region fallthrough
CT: control target
= control target key end

     0   :  { %s1433_s21 = smov 0   ;;  %s2083_s0 = inlined_call_operand.vmem [shape: f32[2,16,128], index: 0, kind: input, shape index: {}]   ;;  %s2084_s1 = inlined_call_operand.vmem [shape: f32[2,16,128], index: 1, kind: input, shape index: {}]   ;;  %s2085_s2 = inlined_call_operand.vmem [shape: f32[3,256,256], index: 2, kind: input, shape index: {}]   ;;  %s2086_s3 = inlined_call_operand.vmem [shape: f32[1,256], index: 3, kind: input, shape index: {}]   ;;  %s2087_s4 = inlined_call_operand.vmem [shape: f32[2,16,128], index: 4, kind: output, shape index: {0}]   ;;  %s2088_s5 = inlined_call_operand.vmem [shape: f32[2,16,128], index: 5, kind: output, shape index: {1}]   ;;  %s2089_s6 = inlined_call_operand.vmem [shape: f32[2,2,128], index: 6, kind: output, shape index: {2}]  }
   0x1 LB: > { %s996_s22 = sadd.s32 4294967295, %s1395_s21   ;;  %p1000_p0 = scmp.ge.s32.totalorder %s1395_s21, 1  ;;  %s1395_s21 = sphi %s1433_s21, %s17_s21  }
   0x2   : > { %p227_p1 = scmp.lt.s32.totalorder %s1395_s21, 3 }
   0x4   : > { %p228_p2 = pnand %p1000_p0, %p227_p1 }
   0x5   : > { %v1011_v0 = vld [vmem:[%s2085_s2 + $0x208] sm:$0xff] (!%p228_p2)  ;;  %v1013_v1 = vld [vmem:[%s2085_s2 + $0x218] sm:$0xff] (!%p228_p2)  ;;  %v1010_v5 = vld [vmem:[%s2085_s2 + $0x200] sm:$0xff] (!%p228_p2)  ;;  %v1397_v7 = vmov (!%p228_p2), 0.0   ;;  %p1647_p3 = scmp.lt.s32.totalorder (!%p228_p2), %s996_s22, 1  ;;  %vm309_vm0 = vcmask (!%p228_p2), 1040384  }
   0x6   : > { %231 = sbr.rel (%p228_p2) target bundleno = 389 (0x185), region = 36  ;;  %v333_v2 = vld [vmem:[%s2085_s2 + $0x8] sm:$0xff] (!%p228_p2)  ;;  %v1144_v3 = vpack.c.bf16 (!%p228_p2), %v1013_v1, %v1011_v0  ;;  %v335_v4 = vld [vmem:[%s2085_s2 + $0x18] sm:$0xff] (!%p228_p2)  ;;  %v1012_v6 = vld [vmem:[%s2085_s2 + $0x210] sm:$0xff] (!%p228_p2)  ;;  %300 = vst [vmem:[#allocation2 + $0x8] sm:$0xff] (!%p228_p2), %v1397_v7  ;;  %vm471_vm1 = vcmask (!%p228_p2), 1046528  }
   0x7   : > { %299 = vst [vmem:[#allocation2] sm:$0xff] (!%p228_p2), %v1397_v7  ;;  %303 = vst [vmem:[#allocation2 + $0x20] sm:$0x3] (!%p228_p2), %v1397_v7  ;;  %v1208_v8 = vpack.c.bf16 (!%p228_p2), %v335_v4, %v333_v2  ;;  %v1146_v9 = vpack.c.bf16 (!%p228_p2), %v1012_v6, %v1010_v5  ;;  %v332_v10 = vld [vmem:[%s2085_s2] sm:$0xff] (!%p228_p2)  ;;  %v334_v11 = vld [vmem:[%s2085_s2 + $0x10] sm:$0xff] (!%p228_p2)  ;;  %vm713_vm2 = vcmask (!%p228_p2), 1045504  }
   0x8   : > { %304 = vst [vmem:[#allocation2 + $0x28] sm:$0x3] (!%p228_p2), %v1397_v7  ;;  %v1015_v12 = vld [vmem:[%s2085_s2 + $0x228] sm:$0xff] (!%p228_p2)  ;;  %1145 = vmatprep.subr.bf16.mxu1 (!%p228_p2), %v1144_v3  ;;  %v1210_v13 = vpack.c.bf16 (!%p228_p2), %v334_v11, %v332_v10  ;;  %v1017_v14 = vld [vmem:[%s2085_s2 + $0x238] sm:$0xff] (!%p228_p2)  ;;  %v1014_v19 = vld [vmem:[%s2085_s2 + $0x220] sm:$0xff] (!%p228_p2) }
   0x9   : > { %v337_v15 = vld [vmem:[%s2085_s2 + $0x28] sm:$0xff] (!%p228_p2)  ;;  %v339_v16 = vld [vmem:[%s2085_s2 + $0x38] sm:$0xff] (!%p228_p2)  ;;  %1209 = vmatprep.subr.bf16.mxu0 (!%p228_p2), %v1208_v8  ;;  %1147 = vmatpush1.bf16.msra.mxu1 (!%p228_p2), %v1146_v9  ;;  %v1148_v17 = vpack.c.bf16 (!%p228_p2), %v1017_v14, %v1015_v12  ;;  %v1016_v20 = vld [vmem:[%s2085_s2 + $0x230] sm:$0xff] (!%p228_p2) }
   0xa   : > { %v1212_v18 = vpack.c.bf16 (!%p228_p2), %v339_v16, %v337_v15  ;;  %v336_v21 = vld [vmem:[%s2085_s2 + $0x20] sm:$0xff] (!%p228_p2)  ;;  %1211 = vmatpush1.bf16.msra.mxu0 (!%p228_p2), %v1210_v13  ;;  %v1150_v22 = vpack.c.bf16 (!%p228_p2), %v1016_v20, %v1014_v19  ;;  %v338_v23 = vld [vmem:[%s2085_s2 + $0x30] sm:$0xff] (!%p228_p2)  ;;  %v1019_v24 = vld [vmem:[%s2085_s2 + $0x248] sm:$0xff] (!%p228_p2) }
   0xb   : > { %v1021_v25 = vld [vmem:[%s2085_s2 + $0x258] sm:$0xff] (!%p228_p2)  ;;  %1149 = vmatprep.subr.bf16.mxu1 (!%p228_p2), %v1148_v17  ;;  %v1214_v26 = vpack.c.bf16 (!%p228_p2), %v338_v23, %v336_v21  ;;  %v341_v28 = vld [vmem:[%s2085_s2 + $0x48] sm:$0xff] (!%p228_p2)  ;;  %v1018_v30 = vld [vmem:[%s2085_s2 + $0x240] sm:$0xff] (!%p228_p2) }
   0xc   : > { %1213 = vmatprep.subr.bf16.mxu0 (!%p228_p2), %v1212_v18  ;;  %v1152_v27 = vpack.c.bf16 (!%p228_p2), %v1021_v25, %v1019_v24  ;;  %v343_v29 = vld [vmem:[%s2085_s2 + $0x58] sm:$0xff] (!%p228_p2)  ;;  %v1020_v32 = vld [vmem:[%s2085_s2 + $0x250] sm:$0xff] (!%p228_p2)  ;;  %v340_v33 = vld [vmem:[%s2085_s2 + $0x40] sm:$0xff] (!%p228_p2) }
   0xd   : > { %v1216_v31 = vpack.c.bf16 %v343_v29, %v341_v28  ;;  %v342_v34 = vld [vmem:[%s2085_s2 + $0x50] sm:$0xff]  ;;  %1151 = vmatpush1.bf16.msra.mxu1 %v1150_v22  ;;  %v1154_v35 = vpack.c.bf16 %v1020_v32, %v1018_v30  ;;  %v1023_v36 = vld [vmem:[%s2085_s2 + $0x268] sm:$0xff]  ;;  %v1025_v37 = vld [vmem:[%s2085_s2 + $0x278] sm:$0xff]  ;;  %s2092_s22 = smov (!%p1647_p3, %s996_s22), 1 }
   0xe   : > { %v345_v38 = vld [vmem:[%s2085_s2 + $0x68] sm:$0xff]  ;;  %1215 = vmatpush1.bf16.msra.mxu0 %v1214_v26  ;;  %1153 = vmatprep.subr.bf16.mxu1 %v1152_v27  ;;  %v1218_v39 = vpack.c.bf16 %v342_v34, %v340_v33  ;;  %v1156_v40 = vpack.c.bf16 %v1025_v37, %v1023_v36  ;;  %v347_v41 = vld [vmem:[%s2085_s2 + $0x78] sm:$0xff]  ;;  %v1022_v42 = vld [vmem:[%s2085_s2 + $0x260] sm:$0xff]  ;;  %s1706_s14 = sshll.u32 %s2092_s22, 4 }
   0xf   : > { %v1024_v43 = vld [vmem:[%s2085_s2 + $0x270] sm:$0xff]  ;;  %1217 = vmatprep.subr.bf16.mxu0 %v1216_v31  ;;  %v1220_v44 = vpack.c.bf16 %v347_v41, %v345_v38  ;;  %v344_v45 = vld [vmem:[%s2085_s2 + $0x60] sm:$0xff]  ;;  %v1027_v47 = vld [vmem:[%s2085_s2 + $0x288] sm:$0xff]  ;;  %s280_s11 = scalar_lea.vmem %s2084_s1, %s1706_s14  ;;  %s275_s23 = scalar_lea.vmem %s2083_s0, %s1706_s14 }
  0x10   : > { %v346_v46 = vld [vmem:[%s2085_s2 + $0x70] sm:$0xff]  ;;  %v1029_v48 = vld [vmem:[%s2085_s2 + $0x298] sm:$0xff]  ;;  %v349_v49 = vld [vmem:[%s2085_s2 + $0x88] sm:$0xff]  ;;  %v1158_v51 = vpack.c.bf16 %v1024_v43, %v1022_v42  ;;  %s285_s9 = scalar_lea.vmem %s2087_s4, %s1706_s14  ;;  %s290_s13 = scalar_lea.vmem %s2088_s5, %s1706_s14 }
  0x11   : > { %v351_v50 = vld [vmem:[%s2085_s2 + $0x98] sm:$0xff]  ;;  %1155 = vmatpush1.bf16.msra.mxu1 %v1154_v35  ;;  %v1222_v52 = vpack.c.bf16 %v346_v46, %v344_v45  ;;  %v1160_v53 = vpack.c.bf16 %v1029_v48, %v1027_v47  ;;  %v1026_v54 = vld [vmem:[%s2085_s2 + $0x280] sm:$0xff]  ;;  %v1028_v55 = vld [vmem:[%s2085_s2 + $0x290] sm:$0xff]  ;;  %s1009_s14 = sshll.u32 %s2092_s22, 1 }
  0x12   : > { %1219 = vmatpush1.bf16.msra.mxu0 %v1218_v39  ;;  %1157 = vmatprep.subr.bf16.mxu1 %v1156_v40  ;;  %v348_v56 = vld [vmem:[%s2085_s2 + $0x80] sm:$0xff]  ;;  %v1224_v57 = vpack.c.bf16 %v351_v50, %v349_v49  ;;  %v350_v58 = vld [vmem:[%s2085_s2 + $0x90] sm:$0xff]  ;;  %v1031_v59 = vld [vmem:[%s2085_s2 + $0x2a8] sm:$0xff]  ;;  %v1162_v63 = vpack.c.bf16 %v1028_v55, %v1026_v54  ;;  %s294_s16 = scalar_lea.vmem %s2089_s6, %s1009_s14 }
  0x13   : > { %1221 = vmatprep.subr.bf16.mxu0 %v1220_v44  ;;  %v1033_v60 = vld [vmem:[%s2085_s2 + $0x2b8] sm:$0xff]  ;;  %v353_v61 = vld [vmem:[%s2085_s2 + $0xa8] sm:$0xff]  ;;  %v1226_v0 = vpack.c.bf16 %v350_v58, %v348_v56  ;;  %v1030_v2 = vld [vmem:[%s2085_s2 + $0x2a0] sm:$0xff] }
  0x14   : > { %v355_v62 = vld [vmem:[%s2085_s2 + $0xb8] sm:$0xff]  ;;  %v1164_v1 = vpack.c.bf16 %v1033_v60, %v1031_v59  ;;  %v1032_v3 = vld [vmem:[%s2085_s2 + $0x2b0] sm:$0xff]  ;;  %v352_v4 = vld [vmem:[%s2085_s2 + $0xa0] sm:$0xff] }
  0x15   : > { %1159 = vmatpush1.bf16.msra.mxu1 %v1158_v51  ;;  %v1228_v5 = vpack.c.bf16 %v355_v62, %v353_v61  ;;  %v354_v6 = vld [vmem:[%s2085_s2 + $0xb0] sm:$0xff]  ;;  %v1035_v7 = vld [vmem:[%s2085_s2 + $0x2c8] sm:$0xff]  ;;  %v1037_v8 = vld [vmem:[%s2085_s2 + $0x2d8] sm:$0xff]  ;;  %v1166_v11 = vpack.c.bf16 %v1032_v3, %v1030_v2 }
  0x16   : > { %1223 = vmatpush1.bf16.msra.mxu0 %v1222_v52  ;;  %1161 = vmatprep.subr.bf16.mxu1 %v1160_v53  ;;  %v357_v9 = vld [vmem:[%s2085_s2 + $0xc8] sm:$0xff]  ;;  %v359_v10 = vld [vmem:[%s2085_s2 + $0xd8] sm:$0xff]  ;;  %v1230_v12 = vpack.c.bf16 %v354_v6, %v352_v4  ;;  %v1168_v13 = vpack.c.bf16 %v1037_v8, %v1035_v7  ;;  %v1034_v14 = vld [vmem:[%s2085_s2 + $0x2c0] sm:$0xff] }
  0x17   : > { %1225 = vmatprep.subr.bf16.mxu0 %v1224_v57  ;;  %v1036_v15 = vld [vmem:[%s2085_s2 + $0x2d0] sm:$0xff]  ;;  %v356_v16 = vld [vmem:[%s2085_s2 + $0xc0] sm:$0xff]  ;;  %v1232_v17 = vpack.c.bf16 %v359_v10, %v357_v9  ;;  %v1039_v19 = vld [vmem:[%s2085_s2 + $0x2e8] sm:$0xff] }
  0x18   : > { %v358_v18 = vld [vmem:[%s2085_s2 + $0xd0] sm:$0xff]  ;;  %v1041_v20 = vld [vmem:[%s2085_s2 + $0x2f8] sm:$0xff]  ;;  %v361_v21 = vld [vmem:[%s2085_s2 + $0xe8] sm:$0xff]  ;;  %v1170_v23 = vpack.c.bf16 %v1036_v15, %v1034_v14 }
  0x19   : > { %1163 = vmatpush1.bf16.msra.mxu1 %v1162_v63  ;;  %v363_v22 = vld [vmem:[%s2085_s2 + $0xf8] sm:$0xff]  ;;  %v1234_v24 = vpack.c.bf16 %v358_v18, %v356_v16  ;;  %v1172_v25 = vpack.c.bf16 %v1041_v20, %v1039_v19  ;;  %v1038_v26 = vld [vmem:[%s2085_s2 + $0x2e0] sm:$0xff]  ;;  %v1040_v27 = vld [vmem:[%s2085_s2 + $0x2f0] sm:$0xff] }
  0x1a   : > { %1227 = vmatpush1.bf16.msra.mxu0 %v1226_v0  ;;  %1165 = vmatprep.subr.bf16.mxu1 %v1164_v1  ;;  %v360_v28 = vld [vmem:[%s2085_s2 + $0xe0] sm:$0xff]  ;;  %v1236_v29 = vpack.c.bf16 %v363_v22, %v361_v21  ;;  %v362_v30 = vld [vmem:[%s2085_s2 + $0xf0] sm:$0xff]  ;;  %v1043_v31 = vld [vmem:[%s2085_s2 + $0x308] sm:$0xff]  ;;  %v1174_v35 = vpack.c.bf16 %v1040_v27, %v1038_v26 }
  0x1b   : > { %1229 = vmatprep.subr.bf16.mxu0 %v1228_v5  ;;  %v1045_v32 = vld [vmem:[%s2085_s2 + $0x318] sm:$0xff]  ;;  %v365_v33 = vld [vmem:[%s2085_s2 + $0x108] sm:$0xff]  ;;  %v1238_v36 = vpack.c.bf16 %v362_v30, %v360_v28  ;;  %v1042_v38 = vld [vmem:[%s2085_s2 + $0x300] sm:$0xff] }
  0x1c   : > { %v367_v34 = vld [vmem:[%s2085_s2 + $0x118] sm:$0xff]  ;;  %v1176_v37 = vpack.c.bf16 %v1045_v32, %v1043_v31  ;;  %v1044_v39 = vld [vmem:[%s2085_s2 + $0x310] sm:$0xff]  ;;  %v364_v40 = vld [vmem:[%s2085_s2 + $0x100] sm:$0xff] }
  0x1d   : > { %1167 = vmatpush1.bf16.msra.mxu1 %v1166_v11  ;;  %v1240_v41 = vpack.c.bf16 %v367_v34, %v365_v33  ;;  %v366_v42 = vld [vmem:[%s2085_s2 + $0x110] sm:$0xff]  ;;  %v1047_v43 = vld [vmem:[%s2085_s2 + $0x328] sm:$0xff]  ;;  %v1049_v44 = vld [vmem:[%s2085_s2 + $0x338] sm:$0xff]  ;;  %v1178_v47 = vpack.c.bf16 %v1044_v39, %v1042_v38 }
  0x1e   : > { %1231 = vmatpush1.bf16.msra.mxu0 %v1230_v12  ;;  %1169 = vmatprep.subr.bf16.mxu1 %v1168_v13  ;;  %v369_v45 = vld [vmem:[%s2085_s2 + $0x128] sm:$0xff]  ;;  %v371_v46 = vld [vmem:[%s2085_s2 + $0x138] sm:$0xff]  ;;  %v1242_v48 = vpack.c.bf16 %v366_v42, %v364_v40  ;;  %v1180_v49 = vpack.c.bf16 %v1049_v44, %v1047_v43  ;;  %v1046_v50 = vld [vmem:[%s2085_s2 + $0x320] sm:$0xff] }
  0x1f   : > { %1233 = vmatprep.subr.bf16.mxu0 %v1232_v17  ;;  %v1048_v51 = vld [vmem:[%s2085_s2 + $0x330] sm:$0xff]  ;;  %v368_v52 = vld [vmem:[%s2085_s2 + $0x120] sm:$0xff]  ;;  %v1244_v53 = vpack.c.bf16 %v371_v46, %v369_v45  ;;  %v1051_v55 = vld [vmem:[%s2085_s2 + $0x348] sm:$0xff] }
  0x20   : > { %v370_v54 = vld [vmem:[%s2085_s2 + $0x130] sm:$0xff]  ;;  %v1053_v56 = vld [vmem:[%s2085_s2 + $0x358] sm:$0xff]  ;;  %v373_v57 = vld [vmem:[%s2085_s2 + $0x148] sm:$0xff]  ;;  %v1182_v59 = vpack.c.bf16 %v1048_v51, %v1046_v50 }
  0x21   : > { %1171 = vmatpush1.bf16.msra.mxu1 %v1170_v23  ;;  %v375_v58 = vld [vmem:[%s2085_s2 + $0x158] sm:$0xff]  ;;  %v1246_v60 = vpack.c.bf16 %v370_v54, %v368_v52  ;;  %v1184_v61 = vpack.c.bf16 %v1053_v56, %v1051_v55  ;;  %v1050_v62 = vld [vmem:[%s2085_s2 + $0x340] sm:$0xff]  ;;  %v1052_v63 = vld [vmem:[%s2085_s2 + $0x350] sm:$0xff] }
  0x22   : > { %1235 = vmatpush1.bf16.msra.mxu0 %v1234_v24  ;;  %1173 = vmatprep.subr.bf16.mxu1 %v1172_v25  ;;  %v372_v0 = vld [vmem:[%s2085_s2 + $0x140] sm:$0xff]  ;;  %v1248_v1 = vpack.c.bf16 %v375_v58, %v373_v57  ;;  %v374_v2 = vld [vmem:[%s2085_s2 + $0x150] sm:$0xff]  ;;  %v1055_v3 = vld [vmem:[%s2085_s2 + $0x368] sm:$0xff]  ;;  %v1186_v7 = vpack.c.bf16 %v1052_v63, %v1050_v62 }
  0x23   : > { %1237 = vmatprep.subr.bf16.mxu0 %v1236_v29  ;;  %v1057_v4 = vld [vmem:[%s2085_s2 + $0x378] sm:$0xff]  ;;  %v377_v5 = vld [vmem:[%s2085_s2 + $0x168] sm:$0xff]  ;;  %v1054_v8 = vld [vmem:[%s2085_s2 + $0x360] sm:$0xff]  ;;  %v1250_v11 = vpack.c.bf16 %v374_v2, %v372_v0 }
  0x24   : > { %v379_v6 = vld [vmem:[%s2085_s2 + $0x178] sm:$0xff]  ;;  %v1056_v9 = vld [vmem:[%s2085_s2 + $0x370] sm:$0xff]  ;;  %v376_v10 = vld [vmem:[%s2085_s2 + $0x160] sm:$0xff]  ;;  %v1188_v12 = vpack.c.bf16 %v1057_v4, %v1055_v3 }
  0x25   : > { %1175 = vmatpush1.bf16.msra.mxu1 %v1174_v35  ;;  %v378_v13 = vld [vmem:[%s2085_s2 + $0x170] sm:$0xff]  ;;  %v1059_v14 = vld [vmem:[%s2085_s2 + $0x388] sm:$0xff]  ;;  %v1061_v15 = vld [vmem:[%s2085_s2 + $0x398] sm:$0xff]  ;;  %v1252_v16 = vpack.c.bf16 %v379_v6, %v377_v5  ;;  %v1190_v24 = vpack.c.bf16 %v1056_v9, %v1054_v8 }
  0x26   : > { %1239 = vmatpush1.bf16.msra.mxu0 %v1238_v36  ;;  %1177 = vmatprep.subr.bf16.mxu1 %v1176_v37  ;;  %v381_v17 = vld [vmem:[%s2085_s2 + $0x188] sm:$0xff]  ;;  %v383_v18 = vld [vmem:[%s2085_s2 + $0x198] sm:$0xff]  ;;  %v297_v19 = vld [vmem:[%s280_s11] sm:$0xff]  ;;  %v1254_v28 = vpack.c.bf16 %v378_v13, %v376_v10  ;;  %v1192_v29 = vpack.c.bf16 %v1061_v15, %v1059_v14 }
  0x27   : > { %1241 = vmatprep.subr.bf16.mxu0 %v1240_v41  ;;  %v298_v20 = vld [vmem:[%s280_s11 + $0x8] sm:$0xff]  ;;  %v311_v21 = vrot.slane %v297_v19, 7  ;;  %v295_v22 = vld [vmem:[%s275_s23] sm:$0xff]  ;;  %v1060_v31 = vld [vmem:[%s2085_s2 + $0x390] sm:$0xff]  ;;  %v1256_v33 = vpack.c.bf16 %v383_v18, %v381_v17 }
  0x28   : > { %v296_v23 = vld [vmem:[%s275_s23 + $0x8] sm:$0xff]  ;;  %v314_v25 = vrot.slane %v298_v20, 7  ;;  %v310_v26 = vrot.slane %v295_v22, 7  ;;  %v1058_v30 = vld [vmem:[%s2085_s2 + $0x380] sm:$0xff]  ;;  %v382_v34 = vld [vmem:[%s2085_s2 + $0x190] sm:$0xff] }
  0x29   : > { %1179 = vmatpush1.bf16.msra.mxu1 %v1178_v47  ;;  %v312_v27 = vrot.slane %v296_v23, 7  ;;  %v380_v32 = vld [vmem:[%s2085_s2 + $0x180] sm:$0xff]  ;;  %323 = vst [vmem:[#allocation2 + $0x8] sm:$0xfe] %v311_v21  ;;  %v1063_v35 = vld [vmem:[%s2085_s2 + $0x3a8] sm:$0xff]  ;;  %v1065_v36 = vld [vmem:[%s2085_s2 + $0x3b8] sm:$0xff]  ;;  %v1194_v41 = vpack.c.bf16 %v1060_v31, %v1058_v30 }
  0x2a   : > { %1243 = vmatpush1.bf16.msra.mxu0 %v1242_v48  ;;  %1181 = vmatprep.subr.bf16.mxu1 %v1180_v49  ;;  %v1783_v37 = vsel %vm309_vm0, %v311_v21, %v314_v25  ;;  %322 = vst [vmem:[#allocation2] sm:$0xfe] %v310_v26  ;;  %327 = vst [vmem:[#allocation2 + $0x28] sm:$0x1] %v314_v25  ;;  %v385_v39 = vld [vmem:[%s2085_s2 + $0x1a8] sm:$0xff]  ;;  %v387_v40 = vld [vmem:[%s2085_s2 + $0x1b8] sm:$0xff]  ;;  %v1258_v42 = vpack.c.bf16 %v382_v34, %v380_v32 }
  0x2b   : > { %1245 = vmatprep.subr.bf16.mxu0 %v1244_v53  ;;  %v1786_v38 = vsel %vm309_vm0, %v310_v26, %v312_v27  ;;  %326 = vst [vmem:[#allocation2 + $0x20] sm:$0x1] %v312_v27  ;;  %v1196_v43 = vpack.c.bf16 %v1065_v36, %v1063_v35  ;;  %v1062_v44 = vld [vmem:[%s2085_s2 + $0x3a0] sm:$0xff]  ;;  %v1064_v45 = vld [vmem:[%s2085_s2 + $0x3b0] sm:$0xff]  ;;  %v1260_v47 = vpack.c.bf16 %v387_v40, %v385_v39  ;;  %v1067_v49 = vld [vmem:[%s2085_s2 + $0x3c8] sm:$0xff]  ;;  %v476_v53 = vrot.slane %v1783_v37, 1 }
  0x2c   : > { %v384_v46 = vld [vmem:[%s2085_s2 + $0x1a0] sm:$0xff]  ;;  %v386_v48 = vld [vmem:[%s2085_s2 + $0x1b0] sm:$0xff]  ;;  %v1069_v50 = vld [vmem:[%s2085_s2 + $0x3d8] sm:$0xff]  ;;  %v1198_v54 = vpack.c.bf16 %v1064_v45, %v1062_v44  ;;  %v473_v19 = vrot.slane %v1786_v38, 1 }
  0x2d   : > { %1183 = vmatpush1.bf16.msra.mxu1 %v1182_v59  ;;  %v389_v51 = vld [vmem:[%s2085_s2 + $0x1c8] sm:$0xff]  ;;  %v391_v52 = vld [vmem:[%s2085_s2 + $0x1d8] sm:$0xff]  ;;  %v1262_v57 = vpack.c.bf16 %v386_v48, %v384_v46  ;;  %v1200_v58 = vpack.c.bf16 %v1069_v50, %v1067_v49  ;;  %v1066_v59 = vld [vmem:[%s2085_s2 + $0x3c0] sm:$0xff] }
  0x2e   : > { %1247 = vmatpush1.bf16.msra.mxu0 %v1246_v60  ;;  %1185 = vmatprep.subr.bf16.mxu1 %v1184_v61  ;;  %v1068_v60 = vld [vmem:[%s2085_s2 + $0x3d0] sm:$0xff]  ;;  %v388_v61 = vld [vmem:[%s2085_s2 + $0x1c0] sm:$0xff]  ;;  %v1264_v63 = vpack.c.bf16 %v391_v52, %v389_v51  ;;  %v1073_v2 = vld [vmem:[%s2085_s2 + $0x3f8] sm:$0xff] }
  0x2f   : > { %1249 = vmatprep.subr.bf16.mxu0 %v1248_v1  ;;  %v390_v0 = vld [vmem:[%s2085_s2 + $0x1d0] sm:$0xff]  ;;  %v1071_v1 = vld [vmem:[%s2085_s2 + $0x3e8] sm:$0xff]  ;;  %v395_v4 = vld [vmem:[%s2085_s2 + $0x1f8] sm:$0xff]  ;;  %v1202_v6 = vpack.c.bf16 %v1068_v60, %v1066_v59 }
  0x30   : > { %v397_v55 = vld [vmem:[#allocation2 + $0x8] sm:$0xfe]  ;;  %v1266_v8 = vpack.c.bf16 %v390_v0, %v388_v61  ;;  %v1204_v9 = vpack.c.bf16 %v1073_v2, %v1071_v1  ;;  %v1072_v10 = vld [vmem:[%s2085_s2 + $0x3f0] sm:$0xff]  ;;  %v1074_v22 = vld [vmem:[%s2085_s2 + $0x400] sm:$0xff] }
  0x31   : > { %1187 = vmatpush1.bf16.msra.mxu1 %v1186_v7  ;;  %v329_v56 = vld [vmem:[#allocation2 + $0x8] sm:$0xff]  ;;  %v475_v62 = vrot.slane %v397_v55, 1  ;;  %v1070_v7 = vld [vmem:[%s2085_s2 + $0x3e0] sm:$0xff]  ;;  %v394_v14 = vld [vmem:[%s2085_s2 + $0x1f0] sm:$0xff] }
  0x32   : > { %1251 = vmatpush1.bf16.msra.mxu0 %v1250_v11  ;;  %1189 = vmatprep.subr.bf16.mxu1 %v1188_v12  ;;  %v393_v3 = vld [vmem:[%s2085_s2 + $0x1e8] sm:$0xff]  ;;  %v392_v11 = vld [vmem:[%s2085_s2 + $0x1e0] sm:$0xff]  ;;  %v1206_v17 = vpack.c.bf16 %v1072_v10, %v1070_v7  ;;  %v1076_v23 = vld [vmem:[%s2085_s2 + $0x410] sm:$0xff] }
  0x33   : > { %1253 = vmatprep.subr.bf16.mxu0 %v1252_v16  ;;  %627 = vmatprep.mubr.f32.mxu0 %v329_v56  ;;  %v477_v5 = vsel %vm471_vm1, %v475_v62, %v476_v53  ;;  %v396_v12 = vld [vmem:[#allocation2] sm:$0xfe]  ;;  %v1268_v13 = vpack.c.bf16 %v395_v4, %v393_v3  ;;  %v1075_v15 = vld [vmem:[%s2085_s2 + $0x408] sm:$0xff]  ;;  %v1077_v16 = vld [vmem:[%s2085_s2 + $0x418] sm:$0xff]  ;;  %v1270_v20 = vpack.c.bf16 %v394_v14, %v392_v11 }
  0x34   : > { %550 = vmatprep.mubr.f32.mxu1 %v477_v5  ;;  %v472_v18 = vrot.slane %v396_v12, 1  ;;  %v1272_v21 = vpack.c.bf16 %v1077_v16, %v1075_v15  ;;  %v1081_v25 = vld [vmem:[%s2085_s2 + $0x438] sm:$0xff]  ;;  %v1274_v27 = vpack.c.bf16 %v1076_v23, %v1074_v22  ;;  %v328_v30 = vld [vmem:[#allocation2] sm:$0xff]  ;;  %v399_v32 = vld [vmem:[#allocation2 + $0x28] sm:$0x1] }
  0x35   : > { %1191 = vmatpush1.bf16.msra.mxu1 %v1190_v24  ;;  %v1079_v24 = vld [vmem:[%s2085_s2 + $0x428] sm:$0xff]  ;;  %v1085_v35 = vld [vmem:[%s2085_s2 + $0x458] sm:$0xff]  ;;  %v480_v36 = vrot.slane %v399_v32, 1  ;;  %v1082_v48 = vld [vmem:[%s2085_s2 + $0x440] sm:$0xff] }
  0x36   : > { %1255 = vmatpush1.bf16.msra.mxu0 %v1254_v28  ;;  %1193 = vmatprep.subr.bf16.mxu1 %v1192_v29  ;;  %v474_v26 = vsel %vm471_vm1, %v472_v18, %v473_v19  ;;  %v1078_v28 = vld [vmem:[%s2085_s2 + $0x420] sm:$0xff]  ;;  %v1080_v29 = vld [vmem:[%s2085_s2 + $0x430] sm:$0xff]  ;;  %v1276_v31 = vpack.c.bf16 %v1081_v25, %v1079_v24  ;;  %v1083_v34 = vld [vmem:[%s2085_s2 + $0x448] sm:$0xff] }
  0x37   : > { %1257 = vmatprep.subr.bf16.mxu0 %v1256_v33  ;;  %v398_v33 = vld [vmem:[#allocation2 + $0x20] sm:$0x1]  ;;  %v641_v40 = vld [vmem:[#allocation2 + $0x8] sm:$0xfc]  ;;  %v481_v44 = vsel %vm471_vm1, %v476_v53, %v480_v36  ;;  %v1084_v49 = vld [vmem:[%s2085_s2 + $0x450] sm:$0xff] }
  0x38   : > { %v478_v39 = vrot.slane %v398_v33, 1  ;;  %v717_v46 = vrot.slane %v641_v40, 2  ;;  %v1087_v51 = vld [vmem:[%s2085_s2 + $0x468] sm:$0xff]  ;;  %v1089_v52 = vld [vmem:[%s2085_s2 + $0x478] sm:$0xff]  ;;  %v1090_v62 = vld [vmem:[%s2085_s2 + $0x480] sm:$0xff] }
  0x39   : > { %1195 = vmatpush1.bf16.msra.mxu1 %v1194_v41  ;;  %v718_v41 = vrot.slane %v1783_v37, 2  ;;  %v1284_v56 = vpack.c.bf16 %v1089_v52, %v1087_v51  ;;  %v1093_v59 = vld [vmem:[%s2085_s2 + $0x498] sm:$0xff]  ;;  %v1095_v0 = vld [vmem:[%s2085_s2 + $0x4a8] sm:$0xff]  ;;  %v1094_v4 = vld [vmem:[%s2085_s2 + $0x4a0] sm:$0xff] }
  0x3a   : > { %1259 = vmatpush1.bf16.msra.mxu0 %v1258_v42  ;;  %1197 = vmatprep.subr.bf16.mxu1 %v1196_v43  ;;  %v643_v42 = vld [vmem:[#allocation2 + $0x28] sm:$0x3]  ;;  %v1278_v43 = vpack.c.bf16 %v1080_v29, %v1078_v28  ;;  %v479_v45 = vsel %vm471_vm1, %v473_v19, %v478_v39  ;;  %v1097_v1 = vld [vmem:[%s2085_s2 + $0x4b8] sm:$0xff]  ;;  %v1096_v5 = vld [vmem:[%s2085_s2 + $0x4b0] sm:$0xff] }
  0x3b   : > { %1261 = vmatprep.subr.bf16.mxu0 %v1260_v47  ;;  %v1280_v47 = vpack.c.bf16 %v1085_v35, %v1083_v34  ;;  %v722_v50 = vrot.slane %v643_v42, 2  ;;  %v719_v53 = vsel %vm713_vm2, %v717_v46, %v718_v41  ;;  %v1292_v3 = vpack.c.bf16 %v1097_v1, %v1095_v0  ;;  %v1101_v7 = vld [vmem:[%s2085_s2 + $0x4d8] sm:$0xff]  ;;  %v1098_v10 = vld [vmem:[%s2085_s2 + $0x4c0] sm:$0xff]  ;;  %v1100_v11 = vld [vmem:[%s2085_s2 + $0x4d0] sm:$0xff] }
  0x3c   : > { %v1103_v12 = vld [vmem:[%s2085_s2 + $0x4e8] sm:$0xff]  ;;  %v1298_v14 = vpack.c.bf16 %v1100_v11, %v1098_v10  ;;  %v1102_v16 = vld [vmem:[%s2085_s2 + $0x4e0] sm:$0xff]  ;;  %v1109_v19 = vld [vmem:[%s2085_s2 + $0x518] sm:$0xff] }
  0x3d   : > { %1199 = vmatpush1.bf16.msra.mxu1 %v1198_v54  ;;  %v1282_v54 = vpack.c.bf16 %v1084_v49, %v1082_v48  ;;  %v723_v55 = vsel %vm713_vm2, %v718_v41, %v722_v50  ;;  %v1107_v18 = vld [vmem:[%s2085_s2 + $0x508] sm:$0xff]  ;;  %v1106_v22 = vld [vmem:[%s2085_s2 + $0x500] sm:$0xff]  ;;  %v1108_v23 = vld [vmem:[%s2085_s2 + $0x510] sm:$0xff] }
  0x3e   : > { %1263 = vmatpush1.bf16.msra.mxu0 %v1262_v57  ;;  %1201 = vmatprep.subr.bf16.mxu1 %v1200_v58  ;;  %v1086_v57 = vld [vmem:[%s2085_s2 + $0x460] sm:$0xff]  ;;  %v1091_v58 = vld [vmem:[%s2085_s2 + $0x488] sm:$0xff]  ;;  %v1113_v25 = vld [vmem:[%s2085_s2 + $0x538] sm:$0xff] }
  0x3f   : > { %1265 = vmatprep.subr.bf16.mxu0 %v1264_v63  ;;  %v1288_v61 = vpack.c.bf16 %v1093_v59, %v1091_v58  ;;  %v1092_v63 = vld [vmem:[%s2085_s2 + $0x490] sm:$0xff]  ;;  %v1111_v24 = vld [vmem:[%s2085_s2 + $0x528] sm:$0xff]  ;;  %v1110_v28 = vld [vmem:[%s2085_s2 + $0x520] sm:$0xff] }
  0x40   : > { %v1290_v2 = vpack.c.bf16 %v1092_v63, %v1090_v62  ;;  %v1112_v29 = vld [vmem:[%s2085_s2 + $0x530] sm:$0xff]  ;;  %v1114_v34 = vld [vmem:[%s2085_s2 + $0x540] sm:$0xff]  ;;  %v1119_v36 = vld [vmem:[%s2085_s2 + $0x568] sm:$0xff] }
  0x41   : > { %1203 = vmatpush1.bf16.msra.mxu1 %v1202_v6  ;;  %v1099_v6 = vld [vmem:[%s2085_s2 + $0x4c8] sm:$0xff]  ;;  %v1310_v32 = vpack.c.bf16 %v1112_v29, %v1110_v28  ;;  %v1116_v35 = vld [vmem:[%s2085_s2 + $0x550] sm:$0xff]  ;;  %v1121_v39 = vld [vmem:[%s2085_s2 + $0x578] sm:$0xff] }
  0x42   : > { %1267 = vmatpush1.bf16.msra.mxu0 %v1266_v8  ;;  %1205 = vmatprep.subr.bf16.mxu1 %v1204_v9  ;;  %v1294_v8 = vpack.c.bf16 %v1096_v5, %v1094_v4  ;;  %v1296_v9 = vpack.c.bf16 %v1101_v7, %v1099_v6  ;;  %v1314_v40 = vpack.c.bf16 %v1116_v35, %v1114_v34  ;;  %v1118_v42 = vld [vmem:[%s2085_s2 + $0x560] sm:$0xff]  ;;  %v1124_v49 = vld [vmem:[%s2085_s2 + $0x590] sm:$0xff]  ;;  %v1127_v50 = vld [vmem:[%s2085_s2 + $0x5a8] sm:$0xff]  ;;  %v715_v6 = vrot.slane %v1786_v38, 2 }
  0x43   : > { %1269 = vmatprep.subr.bf16.mxu0 %v1268_v13  ;;  %v1105_v13 = vld [vmem:[%s2085_s2 + $0x4f8] sm:$0xff]  ;;  %v1316_v41 = vpack.c.bf16 %v1121_v39, %v1119_v36  ;;  %v1122_v48 = vld [vmem:[%s2085_s2 + $0x580] sm:$0xff] }
  0x44   : > { %v1300_v15 = vpack.c.bf16 %v1105_v13, %v1103_v12  ;;  %v1129_v51 = vld [vmem:[%s2085_s2 + $0x5b8] sm:$0xff]  ;;  %v1322_v52 = vpack.c.bf16 %v1124_v49, %v1122_v48  ;;  %v1130_v59 = vld [vmem:[%s2085_s2 + $0x5c0] sm:$0xff] }
  0x45   : > { %1207 = vmatpush1.bf16.msra.mxu1 %v1206_v17  ;;  %v1104_v17 = vld [vmem:[%s2085_s2 + $0x4f0] sm:$0xff]  ;;  %v1137_v62 = vld [vmem:[%s2085_s2 + $0x5f8] sm:$0xff]  ;;  %v1134_v1 = vld [vmem:[%s2085_s2 + $0x5e0] sm:$0xff] }
  0x46   : > { %1271 = vmatpush1.bf16.msra.mxu0 %v1270_v20  ;;  %1336 = vmatprep.subr.bf16.mxu1 %v1272_v21  ;;  %v1302_v20 = vpack.c.bf16 %v1104_v17, %v1102_v16  ;;  %v640_v4 = vld [vmem:[#allocation2] sm:$0xfc] }
  0x47   : > { %1273 = vmatprep.subr.bf16.mxu0 %v1272_v21  ;;  %v1304_v21 = vpack.c.bf16 %v1109_v19, %v1107_v18  ;;  %v811_v18 = vlaneseq }
  0x48   : > { %551 = vmatmul.mubr.f32.vlgmr.msra.gmra.mrb[0].mxu1 %v474_v26  ;;  %v1306_v26 = vpack.c.bf16 %v1108_v23, %v1106_v22 }
  0x49   : > { %628 = vmatmul.mubr.f32.vlgmr.msra.gmra.mrb[0].mxu0 %v328_v30  ;;  %1352 = vmatpush1.bf16.msra.mxu1 %v1274_v27  ;;  %v1115_v30 = vld [vmem:[%s2085_s2 + $0x548] sm:$0xff]  ;;  %v812_v19 = vshrl.u32 %v811_v18, 7 }
  0x4a   : > { %1275 = vmatpush1.bf16.msra.mxu0 %v1274_v27  ;;  %1337 = vmatprep.subr.bf16.mxu1 %v1276_v31  ;;  %v1308_v27 = vpack.c.bf16 %v1113_v25, %v1111_v24 }
  0x4b   : > { %1277 = vmatprep.subr.bf16.mxu0 %v1276_v31  ;;  %556 = vmatprep.mubr.f32.mxu1 %v481_v44  ;;  %v1117_v31 = vld [vmem:[%s2085_s2 + $0x558] sm:$0xff]  ;;  %v1123_v44 = vld [vmem:[%s2085_s2 + $0x588] sm:$0xff]  ;;  %v817_v22 = vsub.s32 1, %v812_v19 }
  0x4c   : > { %633 = vmatprep.mubr.f32.mxu0 %v1783_v37  ;;  %557 = vmatmul.mubr.f32.gmra.mrb[2].mxu1 %v479_v45  ;;  %v1088_v37 = vld [vmem:[%s2085_s2 + $0x470] sm:$0xff]  ;;  %v1312_v33 = vpack.c.bf16 %v1117_v31, %v1115_v30  ;;  %v1125_v45 = vld [vmem:[%s2085_s2 + $0x598] sm:$0xff] }
  0x4d   : > { %1353 = vmatpush1.bf16.msra.mxu1 %v1278_v43  ;;  %634 = vmatmul.mubr.f32.gmra.mrb[2].mxu0 %v1786_v38  ;;  %v1286_v60 = vpack.c.bf16 %v1088_v37, %v1086_v57  ;;  %v1133_v57 = vld [vmem:[%s2085_s2 + $0x5d8] sm:$0xff] }
  0x4e   : > { %1279 = vmatpush1.bf16.msra.mxu0 %v1278_v43  ;;  %1338 = vmatprep.subr.bf16.mxu1 %v1280_v47  ;;  %v1120_v43 = vld [vmem:[%s2085_s2 + $0x570] sm:$0xff] }
  0x4f   : > { %1281 = vmatprep.subr.bf16.mxu0 %v1280_v47  ;;  %792 = vmatprep.mubr.f32.mxu0 %v719_v53  ;;  %v1318_v46 = vpack.c.bf16 %v1120_v43, %v1118_v42  ;;  %v1320_v47 = vpack.c.bf16 %v1125_v45, %v1123_v44  ;;  %v1324_v53 = vpack.c.bf16 %v1129_v51, %v1127_v50 }
  0x50   : > { %798 = vmatprep.mubr.f32.mxu1 %v723_v55  ;;  %v1128_v55 = vld [vmem:[%s2085_s2 + $0x5b0] sm:$0xff] }
  0x51   : > { %1354 = vmatpush1.bf16.msra.mxu1 %v1282_v54 }
  0x52   : > { %1283 = vmatpush1.bf16.msra.mxu0 %v1282_v54  ;;  %1339 = vmatprep.subr.bf16.mxu1 %v1284_v56  ;;  %v1126_v54 = vld [vmem:[%s2085_s2 + $0x5a0] sm:$0xff] }
  0x53   : > { %1285 = vmatprep.subr.bf16.mxu0 %v1284_v56  ;;  %v1131_v56 = vld [vmem:[%s2085_s2 + $0x5c8] sm:$0xff]  ;;  %v1326_v37 = vpack.c.bf16 %v1128_v55, %v1126_v54 }
  0x54   : > { %v1328_v58 = vpack.c.bf16 %v1133_v57, %v1131_v56 }
  0x55   : > { %1355 = vmatpush1.bf16.msra.mxu1 %v1286_v60 }
  0x56   : > { %1287 = vmatpush1.bf16.msra.mxu0 %v1286_v60  ;;  %1340 = vmatprep.subr.bf16.mxu1 %v1288_v61  ;;  %v1132_v60 = vld [vmem:[%s2085_s2 + $0x5d0] sm:$0xff] }
  0x57   : > { %1289 = vmatprep.subr.bf16.mxu0 %v1288_v61  ;;  %v1135_v61 = vld [vmem:[%s2085_s2 + $0x5e8] sm:$0xff]  ;;  %v1330_v63 = vpack.c.bf16 %v1132_v60, %v1130_v59 }
  0x58   : > { %v1332_v0 = vpack.c.bf16 %v1137_v62, %v1135_v61 }
  0x59   : > { %1356 = vmatpush1.bf16.msra.mxu1 %v1290_v2 }
  0x5a   : > { %1291 = vmatpush1.bf16.msra.mxu0 %v1290_v2  ;;  %1341 = vmatprep.subr.bf16.mxu1 %v1292_v3  ;;  %v1136_v2 = vld [vmem:[%s2085_s2 + $0x5f0] sm:$0xff] }
  0x5b   : > { %1293 = vmatprep.subr.bf16.mxu0 %v1292_v3  ;;  %v642_v3 = vld [vmem:[#allocation2 + $0x20] sm:$0x3]  ;;  %v1334_v5 = vpack.c.bf16 %v1136_v2, %v1134_v1 }
  0x5c   : > { %v720_v7 = vrot.slane %v642_v3, 2 }
  0x5d   : > { %1357 = vmatpush1.bf16.msra.mxu1 %v1294_v8 }
  0x5e   : > { %1295 = vmatpush1.bf16.msra.mxu0 %v1294_v8  ;;  %1342 = vmatprep.subr.bf16.mxu1 %v1296_v9  ;;  %v714_v8 = vrot.slane %v640_v4, 2 }
  0x5f   : > { %1297 = vmatprep.subr.bf16.mxu0 %v1296_v9  ;;  %v721_v9 = vsel %vm713_vm2, %v715_v6, %v720_v7 }
  0x60   : > { %v716_v10 = vsel %vm713_vm2, %v714_v8, %v715_v6 }
  0x61   : > { %1358 = vmatpush1.bf16.msra.mxu1 %v1298_v14 }
  0x62   : > { %1299 = vmatpush1.bf16.msra.mxu0 %v1298_v14  ;;  %1343 = vmatprep.subr.bf16.mxu1 %v1300_v15 }
  0x63   : > { %1301 = vmatprep.subr.bf16.mxu0 %v1300_v15 }
  0x65   : > { %1359 = vmatpush1.bf16.msra.mxu1 %v1302_v20 }
  0x66   : > { %1303 = vmatpush1.bf16.msra.mxu0 %v1302_v20  ;;  %1344 = vmatprep.subr.bf16.mxu1 %v1304_v21  ;;  %v813_v20 = vsub.s32 0, %v812_v19 }
  0x67   : > { %1305 = vmatprep.subr.bf16.mxu0 %v1304_v21  ;;  %v809_v21 = vld [vmem:[%s2086_s3] sm:$0x3] }
  0x68   : > { %v814_v23 = vrot.slane %v809_v21, %v813_v20  ;;  %v818_v25 = vrot.slane %v809_v21, %v817_v22 }
  0x69   : > { %1360 = vmatpush1.bf16.msra.mxu1 %v1306_v26 }
  0x6a   : > { %1307 = vmatpush1.bf16.msra.mxu0 %v1306_v26  ;;  %1345 = vmatprep.subr.bf16.mxu1 %v1308_v27 }
  0x6b   : > { %1309 = vmatprep.subr.bf16.mxu0 %v1308_v27 }
  0x6d   : > { %1361 = vmatpush1.bf16.msra.mxu1 %v1310_v32 }
  0x6e   : > { %1311 = vmatpush1.bf16.msra.mxu0 %v1310_v32  ;;  %1346 = vmatprep.subr.bf16.mxu1 %v1312_v33 }
  0x6f   : > { %1313 = vmatprep.subr.bf16.mxu0 %v1312_v33 }
  0x71   : > { %1362 = vmatpush1.bf16.msra.mxu1 %v1314_v40 }
  0x72   : > { %1315 = vmatpush1.bf16.msra.mxu0 %v1314_v40  ;;  %1347 = vmatprep.subr.bf16.mxu1 %v1316_v41 }
  0x73   : > { %1317 = vmatprep.subr.bf16.mxu0 %v1316_v41 }
  0x75   : > { %1363 = vmatpush1.bf16.msra.mxu1 %v1318_v46 }
  0x76   : > { %1319 = vmatpush1.bf16.msra.mxu0 %v1318_v46  ;;  %1348 = vmatprep.subr.bf16.mxu1 %v1320_v47 }
  0x77   : > { %1321 = vmatprep.subr.bf16.mxu0 %v1320_v47 }
  0x79   : > { %1364 = vmatpush1.bf16.msra.mxu1 %v1322_v52 }
  0x7a   : > { %1323 = vmatpush1.bf16.msra.mxu0 %v1322_v52  ;;  %1349 = vmatprep.subr.bf16.mxu1 %v1324_v53 }
  0x7b   : > { %1325 = vmatprep.subr.bf16.mxu0 %v1324_v53 }
  0x7d   : > { %1365 = vmatpush1.bf16.msra.mxu1 %v1326_v37 }
  0x7e   : > { %1327 = vmatpush1.bf16.msra.mxu0 %v1326_v37  ;;  %1350 = vmatprep.subr.bf16.mxu1 %v1328_v58 }
  0x7f   : > { %1329 = vmatprep.subr.bf16.mxu0 %v1328_v58 }
  0x81   : > { %1366 = vmatpush1.bf16.msra.mxu1 %v1330_v63 }
  0x82   : > { %1331 = vmatpush1.bf16.msra.mxu0 %v1330_v63  ;;  %1351 = vmatprep.subr.bf16.mxu1 %v1332_v0 }
  0x83   : > { %1333 = vmatprep.subr.bf16.mxu0 %v1332_v0 }
  0x85   : > { %1367 = vmatpush1.bf16.msra.mxu1 %v1334_v5 }
  0x86   : > { %1335 = vmatpush1.bf16.msra.mxu0 %v1334_v5 }
  0x88   : > { %799 = vmatmul.mubr.f32.vlgmr.msra.gmra.mrb[4].mxu1 %v721_v9 }
  0x89   : > { %793 = vmatmul.mubr.f32.vlgmr.msra.gmra.mrb[0].mxu0 %v716_v10 }
 0x11b   : > { %v552_v11 = vpop.f32.mrb[0].mxu1 }
 0x11c   : > { %v554_v12 = vpop.f32.mrb[1].mxu1 }
 0x11f   : > { %v558_v13 = vpop.f32.mrb[2].mxu1 }
 0x120   : > { %v635_v14 = vpop.f32.mrb[2].mxu0  ;;  %v560_v15 = vpop.f32.mrb[3].mxu1 }
 0x121   : > { %v636_v38 = vadd.f32 %v635_v14, %v558_v13  ;;  %v637_v16 = vpop.f32.mrb[3].mxu0 }
 0x122   : > { %v638_v17 = vadd.f32 %v637_v16, %v560_v15 }
 0x15b   : > { %v800_v24 = vpop.f32.mrb[4].mxu1 }
 0x15c   : > { %v794_v26 = vpop.f32.mrb[0].mxu0  ;;  %v807_v27 = vadd.f32 %v800_v24, %v636_v38  ;;  %v802_v28 = vpop.f32.mrb[5].mxu1 }
 0x15d   : > { %v1368_v29 = vadd.f32 %v794_v26, %v552_v11  ;;  %v796_v30 = vpop.f32.mrb[1].mxu0  ;;  %v808_v31 = vadd.f32 %v802_v28, %v638_v17 }
 0x15e   : > { %v823_v32 = vadd.f32 %v814_v23, %v807_v27  ;;  %v1369_v33 = vadd.f32 %v796_v30, %v554_v12 }
 0x15f   : > { %v821_v34 = vadd.f32 %v1368_v29, %v814_v23  ;;  %v824_v35 = vadd.f32 %v818_v25, %v808_v31 }
 0x160   : > { %826 = vst [vmem:[%s285_s9 + $0x8] sm:$0xff] %v823_v32  ;;  %v830_v36 = vmul.f32 %v823_v32, %v823_v32  ;;  %v822_v39 = vadd.f32 %v1369_v33, %v818_v25 }
 0x161   : > { %825 = vst [vmem:[%s285_s9] sm:$0xff] %v821_v34  ;;  %v829_v40 = vmul.f32 %v821_v34, %v821_v34  ;;  %828 = vst [vmem:[%s290_s13 + $0x8] sm:$0xff] %v824_v35  ;;  %v832_v41 = vmul.f32 %v824_v35, %v824_v35 }
 0x162   : > { %827 = vst [vmem:[%s290_s13] sm:$0xff] %v822_v39  ;;  %v831_v42 = vmul.f32 %v822_v39, %v822_v39 }
 0x163   : > { %v834_v43 = vadd.f32 %v832_v41, %v830_v36 }
 0x164   : > { %v833_v44 = vadd.f32 %v831_v42, %v829_v40 }
 0x165   : > { %1385 = vrsqrt.f32 %v834_v43  ;;  %vm844_vm3 = vcmp.eq.f32.partialorder %v834_v43, inf  ;;  %v847_v51 = vand.u32 2147483648, %v834_v43  ;;  %vm846_vm5 = vcmp.eq.f32.partialorder %v834_v43, 0.0 }
 0x166   : > { %1387 = vrsqrt.f32 %v833_v44  ;;  %v856_v45 = vadd.f32 %v834_v43, %v833_v44  ;;  %vm837_vm4 = vcmp.eq.f32.partialorder %v833_v44, inf  ;;  %v840_v53 = vand.u32 2147483648, %v833_v44 }
 0x167   : > { %vm839_vm6 = vcmp.eq.f32.partialorder %v833_v44, 0.0 }
 0x168   : > { %v857_v46 = vrot.slane %v856_v45, 4 }
 0x16a   : > { %v858_v52 = vadd.f32 %v857_v46, %v856_v45 }
 0x16c   : > { %v859_v58 = vrot.slane %v858_v52, 2 }
 0x16e   : > { %v860_v61 = vadd.f32 %v859_v58, %v858_v52 }
 0x16f   : > { %v1386_v47 = vpop.eup %1385 }
 0x170   : > { %v1388_v48 = vpop.eup %1387  ;;  %v843_v49 = vmul.f32 %v1386_v47, %v834_v43  ;;  %v861_v0 = vrot.slane %v860_v61, 1 }
 0x171   : > { %v836_v50 = vmul.f32 %v1388_v48, %v833_v44 }
 0x172   : > { %v845_v54 = vsel %vm844_vm3, %v834_v43, %v843_v49  ;;  %v862_v3 = vadd.f32 %v861_v0, %v860_v61 }
 0x173   : > { %v838_v55 = vsel %vm837_vm4, %v833_v44, %v836_v50  ;;  %v848_v56 = vsel %vm846_vm5, %v847_v51, %v845_v54 }
 0x174   : > { %v841_v57 = vsel %vm839_vm6, %v840_v53, %v838_v55 }
 0x175   : > { %v849_v37 = vadd.f32 %v848_v56, %v841_v57 }
 0x177   : > { %v850_v59 = vrot.slane %v849_v37, 4 }
 0x179   : > { %v851_v60 = vadd.f32 %v850_v59, %v849_v37 }
 0x17b   : > { %v852_v62 = vrot.slane %v851_v60, 2 }
 0x17d   : > { %v853_v63 = vadd.f32 %v852_v62, %v851_v60 }
 0x17f   : > { %v854_v1 = vrot.slane %v853_v63, 1 }
 0x181   : > { %v855_v2 = vadd.f32 %v854_v1, %v853_v63 }
 0x183   : > { %v863_v4 = vsel %vm309_vm0, %v855_v2, %v862_v3 }
 0x184   : > { %864 = vst [vmem:[%s294_s16] sm:$0x3] %v863_v4 }
 0x185 PF: > { %s17_s21 = sadd.s32 1, %s1395_s21  }
 0x186   : > { %p14_p4 = scmp.ge.s32.totalorder %s17_s21, 4  }
 0x188   :  { %16 = sbr.rel (!%p14_p4) target bundleno = 1 (0x1), region = 95 }

// kernel: tile.69
= control target key start
LH: loop header
LB: loop body
LE: loop exit
PB: predicated region body
PF: predicated region fallthrough
CT: control target
= control target key end

     0   :  { %s131_s10 = smov 120   ;;  %s132_s11 = smov 104   ;;  %vm3_vm0 = vcmask 64512   ;;  %vm9_vm1 = vcmask 1048512   ;;  %vm15_vm2 = vcmask 982912   ;;  %vm21_vm3 = vcmask 917312   ;;  %s207_s0 = inlined_call_operand.vmem [shape: f32[16,8], index: 0, kind: input, shape index: {}]   ;;  %s208_s1 = inlined_call_operand.vmem [shape: f32[1,128], index: 1, kind: output, shape index: {}]  }
   0x1   :  { %v101_v0 = vld [vmem:[%s207_s0 + $0xf] sm:$0x1]   ;;  %v103_v1 = vld [vmem:[%s207_s0 + $0xd] sm:$0x1]   ;;  %v102_v2 = vld [vmem:[%s207_s0 + $0xe] sm:$0x1]  }
   0x2   :  { %7 = vrot.lane.b32.xlu0 %v101_v0, %s131_s10  ;;  %19 = vrot.lane.b32.xlu1 %v103_v1, %s132_s11  ;;  %v104_v3 = vld [vmem:[%s207_s0 + $0xc] sm:$0x1]   ;;  %s133_s16 = smov 112   ;;  %s134_s17 = smov 96   ;;  %v105_v4 = vld [vmem:[%s207_s0 + $0xb] sm:$0x1]  }
   0x3   :  { %v106_v5 = vld [vmem:[%s207_s0 + $0xa] sm:$0x1]   ;;  %v2_v6 = vld [vmem:[%s207_s0] sm:$0x1]   ;;  %s135_s24 = smov 88   ;;  %s136_s25 = smov 80  }
   0x4   :  { %4 = vst.msk [vmem:[#allocation0] sm:$0x1] %vm3_vm0, %v2_v6   ;;  %v107_v7 = vld [vmem:[%s207_s0 + $0x9] sm:$0x1]   ;;  %v108_v8 = vld [vmem:[%s207_s0 + $0x8] sm:$0x1]  }
   0x5   :  { %s137_s30 = smov 72   ;;  %s138_s2 = smov 64   ;;  %v109_v9 = vld [vmem:[%s207_s0 + $0x7] sm:$0x1]   ;;  %v110_v10 = vld [vmem:[%s207_s0 + $0x6] sm:$0x1]  }
   0x6   :  { %13 = vrot.lane.b32.xlu0 %v102_v2, %s133_s16  ;;  %25 = vrot.lane.b32.xlu1 %v104_v3, %s134_s17  ;;  %s139_s7 = smov 56   ;;  %s140_s8 = smov 48   ;;  %v111_v11 = vld [vmem:[%s207_s0 + $0x5] sm:$0x1]   ;;  %v112_v12 = vld [vmem:[%s207_s0 + $0x4] sm:$0x1]  }
   0x7   :  { %s141_s13 = smov 40   ;;  %s142_s14 = smov 32   ;;  %v113_v13 = vld [vmem:[%s207_s0 + $0x3] sm:$0x1]   ;;  %v114_v14 = vld [vmem:[%s207_s0 + $0x2] sm:$0x1]  }
   0x8   :  { %s143_s19 = smov 24   ;;  %s144_s20 = smov 16   ;;  %v115_v15 = vld [vmem:[%s207_s0 + $0x1] sm:$0x1]   ;;  %vm27_vm4 = vcmask 851712   ;;  %vm33_vm5 = vcmask 786112  }
   0x9   :  { %s145_s0 = smov 8   ;;  %vm39_vm6 = vcmask 720512   ;;  %vm45_vm7 = vcmask 654912   ;;  %vm51_vm8 = vcmask 589312   ;;  %vm57_vm9 = vcmask 523712  }
   0xa   :  { %31 = vrot.lane.b32.xlu0 %v105_v4, %s135_s24  ;;  %37 = vrot.lane.b32.xlu1 %v106_v5, %s136_s25  ;;  %vm63_vm10 = vcmask 458112   ;;  %vm69_vm11 = vcmask 392512   ;;  %vm75_vm12 = vcmask 326912   ;;  %vm81_vm13 = vcmask 261312  }
   0xb   :  { %vm87_vm14 = vcmask 195712   ;;  %vm93_vm15 = vcmask 130112  }
   0xe   :  { %43 = vrot.lane.b32.xlu0 %v107_v7, %s137_s30  ;;  %49 = vrot.lane.b32.xlu1 %v108_v8, %s138_s2 }
  0x12   :  { %55 = vrot.lane.b32.xlu0 %v109_v9, %s139_s7  ;;  %61 = vrot.lane.b32.xlu1 %v110_v10, %s140_s8 }
  0x16   :  { %67 = vrot.lane.b32.xlu0 %v111_v11, %s141_s13  ;;  %73 = vrot.lane.b32.xlu1 %v112_v12, %s142_s14 }
  0x1a   :  { %79 = vrot.lane.b32.xlu0 %v113_v13, %s143_s19  ;;  %85 = vrot.lane.b32.xlu1 %v114_v14, %s144_s20 }
  0x1e   :  { %91 = vrot.lane.b32.xlu0 %v115_v15, %s145_s0 }
  0x74   :  { %v8_v16 = vpop.permute.xlu0 %7   ;;  %v20_v17 = vpop.permute.xlu1 %19  }
  0x75   :  { %10 = vst.msk [vmem:[#allocation0] sm:$0x1] %vm9_vm1, %v8_v16  }
  0x78   :  { %v14_v18 = vpop.permute.xlu0 %13   ;;  %v26_v19 = vpop.permute.xlu1 %25  }
  0x79   :  { %16 = vst.msk [vmem:[#allocation0] sm:$0x1] %vm15_vm2, %v14_v18  }
  0x7a   :  { %22 = vst.msk [vmem:[#allocation0] sm:$0x1] %vm21_vm3, %v20_v17  }
  0x7b   :  { %28 = vst.msk [vmem:[#allocation0] sm:$0x1] %vm27_vm4, %v26_v19  }
  0x7c   :  { %v32_v20 = vpop.permute.xlu0 %31   ;;  %v38_v21 = vpop.permute.xlu1 %37  }
  0x7d   :  { %34 = vst.msk [vmem:[#allocation0] sm:$0x1] %vm33_vm5, %v32_v20  }
  0x7e   :  { %40 = vst.msk [vmem:[#allocation0] sm:$0x1] %vm39_vm6, %v38_v21  }
  0x80   :  { %v44_v22 = vpop.permute.xlu0 %43   ;;  %v50_v23 = vpop.permute.xlu1 %49  }
  0x81   :  { %46 = vst.msk [vmem:[#allocation0] sm:$0x1] %vm45_vm7, %v44_v22  }
  0x82   :  { %52 = vst.msk [vmem:[#allocation0] sm:$0x1] %vm51_vm8, %v50_v23  }
  0x84   :  { %v56_v24 = vpop.permute.xlu0 %55   ;;  %v62_v25 = vpop.permute.xlu1 %61  }
  0x85   :  { %58 = vst.msk [vmem:[#allocation0] sm:$0x1] %vm57_vm9, %v56_v24  }
  0x86   :  { %64 = vst.msk [vmem:[#allocation0] sm:$0x1] %vm63_vm10, %v62_v25  }
  0x88   :  { %v68_v26 = vpop.permute.xlu0 %67   ;;  %v74_v27 = vpop.permute.xlu1 %73  }
  0x89   :  { %70 = vst.msk [vmem:[#allocation0] sm:$0x1] %vm69_vm11, %v68_v26  }
  0x8a   :  { %76 = vst.msk [vmem:[#allocation0] sm:$0x1] %vm75_vm12, %v74_v27  }
  0x8c   :  { %v80_v28 = vpop.permute.xlu0 %79   ;;  %v86_v29 = vpop.permute.xlu1 %85  }
  0x8d   :  { %82 = vst.msk [vmem:[#allocation0] sm:$0x1] %vm81_vm13, %v80_v28  }
  0x8e   :  { %88 = vst.msk [vmem:[#allocation0] sm:$0x1] %vm87_vm14, %v86_v29  }
  0x90   :  { %v92_v30 = vpop.permute.xlu0 %91  }
  0x91   :  { %94 = vst.msk [vmem:[#allocation0] sm:$0x1] %vm93_vm15, %v92_v30  }
  0x98   :  { %v98_v31 = vld [vmem:[#allocation0] sm:$0x1] }
  0x99   :  { %100 = vst [vmem:[%s208_s1] sm:$0x1] %v98_v31 }

// kernel: basic_block_forward.5
= control target key start
LH: loop header
LB: loop body
LE: loop exit
PB: predicated region body
PF: predicated region fallthrough
CT: control target
= control target key end

     0   :  { %s623_s24 = smov 0   ;;  %s672_s0 = inlined_call_operand.vmem [shape: f32[2,16,128], index: 0, kind: input, shape index: {}]   ;;  %s673_s1 = inlined_call_operand.vmem [shape: f32[2,16,128], index: 1, kind: input, shape index: {}]   ;;  %s674_s2 = inlined_call_operand.vmem [shape: f32[2,16,128], index: 2, kind: input, shape index: {}]   ;;  %s675_s3 = inlined_call_operand.vmem [shape: f32[2,16,128], index: 3, kind: input, shape index: {}]   ;;  %s676_s4 = inlined_call_operand.vmem [shape: f32[1,128], index: 4, kind: input, shape index: {}]   ;;  %s677_s5 = inlined_call_operand.vmem [shape: f32[1,128], index: 5, kind: input, shape index: {}]   ;;  %s678_s6 = inlined_call_operand.vmem [shape: f32[2,16,128], index: 6, kind: output, shape index: {0}]   ;;  %s679_s7 = inlined_call_operand.vmem [shape: f32[2,16,128], index: 7, kind: output, shape index: {1}]  }
   0x1 LB: > { %s536_s25 = sadd.s32 4294967295, %s581_s24   ;;  %p540_p0 = scmp.ge.s32.totalorder %s581_s24, 1  ;;  %s581_s24 = sphi %s623_s24, %s18_s24  }
   0x2   : > { %p270_p1 = scmp.lt.s32.totalorder %s581_s24, 3 }
   0x4   : > { %p271_p2 = pnand %p540_p0, %p270_p1 }
   0x5   : > { %p322_p3 = scmp.lt.s32.totalorder (!%p271_p2), %s536_s25, 1  ;;  %v553_v13 = vld [vmem:[%s676_s4] ss:$0 sm:$0xff] (!%p271_p2) }
   0x6   : > { %274 = sbr.rel (%p271_p2) target bundleno = 47 (0x2f), region = 44  ;;  %v554_v18 = vld [vmem:[%s677_s5] ss:$0 sm:$0xff] (!%p271_p2) }
   0xd   : > { %s681_s25 = smov (!%p322_p3, %s536_s25), 1 }
   0xe   : > { %s631_s26 = sshll.u32 %s681_s25, 4 }
   0xf   : > { %s326_s29 = scalar_lea.vmem %s672_s0, %s631_s26  ;;  %s331_s9 = scalar_lea.vmem %s673_s1, %s631_s26 }
  0x10   : > { %v352_v0 = vld [vmem:[%s326_s29] sm:$0xff]  ;;  %v353_v2 = vld [vmem:[%s326_s29 + $0x8] sm:$0xff]  ;;  %s336_s16 = scalar_lea.vmem %s674_s2, %s631_s26  ;;  %s341_s19 = scalar_lea.vmem %s675_s3, %s631_s26 }
  0x11   : > { %v354_v1 = vld [vmem:[%s331_s9] sm:$0xff]  ;;  %v356_v3 = vmul.f32 %v352_v0, %v352_v0  ;;  %v355_v5 = vld [vmem:[%s331_s9 + $0x8] sm:$0xff]  ;;  %v357_v6 = vmul.f32 %v353_v2, %v353_v2  ;;  %s346_s22 = scalar_lea.vmem %s678_s6, %s631_s26  ;;  %s351_s27 = scalar_lea.vmem %s679_s7, %s631_s26 }
  0x12   : > { %v358_v4 = vmul.f32 %v354_v1, %v354_v1  ;;  %v359_v7 = vmul.f32 %v355_v5, %v355_v5  ;;  %v398_v29 = vld [vmem:[%s336_s16] sm:$0xff]  ;;  %v399_v33 = vld [vmem:[%s336_s16 + $0x8] sm:$0xff] }
  0x13   : > { %v406_v31 = vld [vmem:[%s341_s19] sm:$0xff]  ;;  %v407_v35 = vld [vmem:[%s341_s19 + $0x8] sm:$0xff] }
  0x14   : > { %v360_v8 = vadd.f32 %v358_v4, %v356_v3  ;;  %v361_v9 = vadd.f32 %v359_v7, %v357_v6 }
  0x16   : > { %vm362_vm0 = vcmp.gt.f32.partialorder %v360_v8, 0.0  ;;  %vm363_vm1 = vcmp.gt.f32.partialorder %v361_v9, 0.0 }
  0x17   : > { %v364_v10 = vsel %vm362_vm0, %v360_v8, 1.0  ;;  %v365_v11 = vsel %vm363_vm1, %v361_v9, 1.0 }
  0x18   : > { %571 = vrsqrt.f32 %v364_v10 }
  0x19   : > { %573 = vrsqrt.f32 %v365_v11 }
  0x22   : > { %v572_v12 = vpop.eup %571 }
  0x23   : > { %v574_v14 = vpop.eup %573  ;;  %v368_v15 = vmul.f32 %v572_v12, %v360_v8  ;;  %v388_v16 = vmul.f32 %v572_v12, %v352_v0  ;;  %v392_v17 = vmul.f32 %v572_v12, %v354_v1 }
  0x24   : > { %v369_v19 = vmul.f32 %v574_v14, %v361_v9  ;;  %v389_v20 = vmul.f32 %v574_v14, %v353_v2  ;;  %v393_v21 = vmul.f32 %v574_v14, %v355_v5 }
  0x25   : > { %v377_v22 = vmul.f32 %v553_v13, %v368_v15  ;;  %v390_v23 = vsel %vm362_vm0, %v388_v16, 1.0  ;;  %v394_v25 = vsel %vm362_vm0, %v392_v17, 0.0 }
  0x26   : > { %v378_v24 = vmul.f32 %v553_v13, %v369_v19  ;;  %v391_v27 = vsel %vm363_vm1, %v389_v20, 1.0  ;;  %v395_v28 = vsel %vm363_vm1, %v393_v21, 0.0 }
  0x27   : > { %v386_v26 = vadd.f32 %v554_v18, %v377_v22 }
  0x28   : > { %v387_v30 = vadd.f32 %v554_v18, %v378_v24 }
  0x29   : > { %v396_v32 = vmul.f32 %v390_v23, %v386_v26  ;;  %v404_v34 = vmul.f32 %v394_v25, %v386_v26 }
  0x2a   : > { %v397_v36 = vmul.f32 %v391_v27, %v387_v30  ;;  %v405_v37 = vmul.f32 %v395_v28, %v387_v30 }
  0x2b   : > { %v400_v38 = vadd.f32 %v398_v29, %v396_v32  ;;  %v408_v39 = vadd.f32 %v406_v31, %v404_v34 }
  0x2c   : > { %v401_v40 = vadd.f32 %v399_v33, %v397_v36  ;;  %v409_v41 = vadd.f32 %v407_v35, %v405_v37 }
  0x2d   : > { %402 = vst [vmem:[%s346_s22] sm:$0xff] %v400_v38  ;;  %410 = vst [vmem:[%s351_s27] sm:$0xff] %v408_v39 }
  0x2e   : > { %403 = vst [vmem:[%s346_s22 + $0x8] sm:$0xff] %v401_v40  ;;  %411 = vst [vmem:[%s351_s27 + $0x8] sm:$0xff] %v409_v41 }
  0x2f PF: > { %s18_s24 = sadd.s32 1, %s581_s24  }
  0x30   : > { %p15_p4 = scmp.ge.s32.totalorder %s18_s24, 4  }
  0x32   :  { %17 = sbr.rel (!%p15_p4) target bundleno = 1 (0x1), region = 95 }

// kernel: basic_block_forward.4
= control target key start
LH: loop header
LB: loop body
LE: loop exit
PB: predicated region body
PF: predicated region fallthrough
CT: control target
= control target key end

     0   :  { %s1549_s27 = smov 0   ;;  %s2238_s0 = inlined_call_operand.vmem [shape: f32[2,16,128], index: 0, kind: input, shape index: {}]   ;;  %s2239_s1 = inlined_call_operand.vmem [shape: f32[2,16,128], index: 1, kind: input, shape index: {}]   ;;  %s2240_s2 = inlined_call_operand.vmem [shape: f32[1,128], index: 2, kind: input, shape index: {}]   ;;  %s2241_s3 = inlined_call_operand.vmem [shape: f32[1,128], index: 3, kind: input, shape index: {}]   ;;  %s2242_s4 = inlined_call_operand.vmem [shape: f32[3,256,256], index: 4, kind: input, shape index: {}]   ;;  %s2243_s5 = inlined_call_operand.vmem [shape: f32[1,256], index: 5, kind: input, shape index: {}]   ;;  %s2244_s6 = inlined_call_operand.vmem [shape: f32[2,16,128], index: 6, kind: output, shape index: {0}]   ;;  %s2245_s7 = inlined_call_operand.vmem [shape: f32[2,16,128], index: 7, kind: output, shape index: {1}]   ;;  %s2246_s8 = inlined_call_operand.vmem [shape: f32[2,2,128], index: 8, kind: output, shape index: {2}]  }
   0x1 LB: > { %s1096_s28 = sadd.s32 4294967295, %s1501_s27   ;;  %p1100_p0 = scmp.ge.s32.totalorder %s1501_s27, 1  ;;  %s1501_s27 = sphi %s1549_s27, %s19_s27  }
   0x2   : > { %p277_p1 = scmp.lt.s32.totalorder %s1501_s27, 3 }
   0x4   : > { %p278_p2 = pnand %p1100_p0, %p277_p1 }
   0x5   : > { %v1113_v0 = vld [vmem:[%s2242_s4 + $0x208] sm:$0xff] (!%p278_p2)  ;;  %v1115_v1 = vld [vmem:[%s2242_s4 + $0x218] sm:$0xff] (!%p278_p2)  ;;  %v1112_v5 = vld [vmem:[%s2242_s4 + $0x200] sm:$0xff] (!%p278_p2)  ;;  %v1503_v7 = vmov (!%p278_p2), 0.0   ;;  %p1763_p3 = scmp.lt.s32.totalorder (!%p278_p2), %s1096_s28, 1  ;;  %vm409_vm2 = vcmask (!%p278_p2), 1040384  }
   0x6   : > { %281 = sbr.rel (%p278_p2) target bundleno = 399 (0x18f), region = 44  ;;  %v433_v2 = vld [vmem:[%s2242_s4 + $0x8] sm:$0xff] (!%p278_p2)  ;;  %v1246_v3 = vpack.c.bf16 (!%p278_p2), %v1115_v1, %v1113_v0  ;;  %v435_v4 = vld [vmem:[%s2242_s4 + $0x18] sm:$0xff] (!%p278_p2)  ;;  %v1114_v6 = vld [vmem:[%s2242_s4 + $0x210] sm:$0xff] (!%p278_p2)  ;;  %400 = vst [vmem:[#allocation2 + $0x8] sm:$0xff] (!%p278_p2), %v1503_v7  ;;  %vm571_vm3 = vcmask (!%p278_p2), 1046528  }
   0x7   : > { %399 = vst [vmem:[#allocation2] sm:$0xff] (!%p278_p2), %v1503_v7  ;;  %403 = vst [vmem:[#allocation2 + $0x20] sm:$0x3] (!%p278_p2), %v1503_v7  ;;  %v1310_v8 = vpack.c.bf16 (!%p278_p2), %v435_v4, %v433_v2  ;;  %v1248_v9 = vpack.c.bf16 (!%p278_p2), %v1114_v6, %v1112_v5  ;;  %v432_v10 = vld [vmem:[%s2242_s4] sm:$0xff] (!%p278_p2)  ;;  %v434_v11 = vld [vmem:[%s2242_s4 + $0x10] sm:$0xff] (!%p278_p2)  ;;  %vm813_vm4 = vcmask (!%p278_p2), 1045504  }
   0x8   : > { %404 = vst [vmem:[#allocation2 + $0x28] sm:$0x3] (!%p278_p2), %v1503_v7  ;;  %v1117_v12 = vld [vmem:[%s2242_s4 + $0x228] sm:$0xff] (!%p278_p2)  ;;  %1247 = vmatprep.subr.bf16.mxu1 (!%p278_p2), %v1246_v3  ;;  %v1312_v13 = vpack.c.bf16 (!%p278_p2), %v434_v11, %v432_v10  ;;  %v1119_v14 = vld [vmem:[%s2242_s4 + $0x238] sm:$0xff] (!%p278_p2)  ;;  %v1116_v19 = vld [vmem:[%s2242_s4 + $0x220] sm:$0xff] (!%p278_p2) }
   0x9   : > { %v437_v15 = vld [vmem:[%s2242_s4 + $0x28] sm:$0xff] (!%p278_p2)  ;;  %v439_v16 = vld [vmem:[%s2242_s4 + $0x38] sm:$0xff] (!%p278_p2)  ;;  %1311 = vmatprep.subr.bf16.mxu0 (!%p278_p2), %v1310_v8  ;;  %1249 = vmatpush1.bf16.msra.mxu1 (!%p278_p2), %v1248_v9  ;;  %v1250_v17 = vpack.c.bf16 (!%p278_p2), %v1119_v14, %v1117_v12  ;;  %v1118_v20 = vld [vmem:[%s2242_s4 + $0x230] sm:$0xff] (!%p278_p2) }
   0xa   : > { %v1314_v18 = vpack.c.bf16 (!%p278_p2), %v439_v16, %v437_v15  ;;  %v436_v21 = vld [vmem:[%s2242_s4 + $0x20] sm:$0xff] (!%p278_p2)  ;;  %1313 = vmatpush1.bf16.msra.mxu0 (!%p278_p2), %v1312_v13  ;;  %v1252_v22 = vpack.c.bf16 (!%p278_p2), %v1118_v20, %v1116_v19  ;;  %v438_v23 = vld [vmem:[%s2242_s4 + $0x30] sm:$0xff] (!%p278_p2)  ;;  %v1121_v24 = vld [vmem:[%s2242_s4 + $0x248] sm:$0xff] (!%p278_p2) }
   0xb   : > { %v1123_v25 = vld [vmem:[%s2242_s4 + $0x258] sm:$0xff] (!%p278_p2)  ;;  %1251 = vmatprep.subr.bf16.mxu1 (!%p278_p2), %v1250_v17  ;;  %v1316_v26 = vpack.c.bf16 (!%p278_p2), %v438_v23, %v436_v21  ;;  %v441_v28 = vld [vmem:[%s2242_s4 + $0x48] sm:$0xff] (!%p278_p2)  ;;  %v1120_v30 = vld [vmem:[%s2242_s4 + $0x240] sm:$0xff] (!%p278_p2) }
   0xc   : > { %1315 = vmatprep.subr.bf16.mxu0 (!%p278_p2), %v1314_v18  ;;  %v1254_v27 = vpack.c.bf16 (!%p278_p2), %v1123_v25, %v1121_v24  ;;  %v443_v29 = vld [vmem:[%s2242_s4 + $0x58] sm:$0xff] (!%p278_p2)  ;;  %v1122_v32 = vld [vmem:[%s2242_s4 + $0x250] sm:$0xff] (!%p278_p2)  ;;  %v440_v33 = vld [vmem:[%s2242_s4 + $0x40] sm:$0xff] (!%p278_p2) }
   0xd   : > { %v1318_v31 = vpack.c.bf16 %v443_v29, %v441_v28  ;;  %v442_v34 = vld [vmem:[%s2242_s4 + $0x50] sm:$0xff]  ;;  %1253 = vmatpush1.bf16.msra.mxu1 %v1252_v22  ;;  %v1256_v35 = vpack.c.bf16 %v1122_v32, %v1120_v30  ;;  %v1125_v36 = vld [vmem:[%s2242_s4 + $0x268] sm:$0xff]  ;;  %v1127_v37 = vld [vmem:[%s2242_s4 + $0x278] sm:$0xff]  ;;  %s2249_s28 = smov (!%p1763_p3, %s1096_s28), 1 }
   0xe   : > { %v445_v38 = vld [vmem:[%s2242_s4 + $0x68] sm:$0xff]  ;;  %1317 = vmatpush1.bf16.msra.mxu0 %v1316_v26  ;;  %1255 = vmatprep.subr.bf16.mxu1 %v1254_v27  ;;  %v1320_v39 = vpack.c.bf16 %v442_v34, %v440_v33  ;;  %v1258_v40 = vpack.c.bf16 %v1127_v37, %v1125_v36  ;;  %v447_v41 = vld [vmem:[%s2242_s4 + $0x78] sm:$0xff]  ;;  %v1124_v42 = vld [vmem:[%s2242_s4 + $0x260] sm:$0xff]  ;;  %s1822_s16 = sshll.u32 %s2249_s28, 4 }
   0xf   : > { %v1126_v43 = vld [vmem:[%s2242_s4 + $0x270] sm:$0xff]  ;;  %1319 = vmatprep.subr.bf16.mxu0 %v1318_v31  ;;  %v1322_v44 = vpack.c.bf16 %v447_v41, %v445_v38  ;;  %v444_v45 = vld [vmem:[%s2242_s4 + $0x60] sm:$0xff]  ;;  %v1129_v47 = vld [vmem:[%s2242_s4 + $0x288] sm:$0xff]  ;;  %s329_s15 = scalar_lea.vmem %s2238_s0, %s1822_s16  ;;  %s334_s26 = scalar_lea.vmem %s2239_s1, %s1822_s16 }
  0x10   : > { %v446_v46 = vld [vmem:[%s2242_s4 + $0x70] sm:$0xff]  ;;  %v1131_v48 = vld [vmem:[%s2242_s4 + $0x298] sm:$0xff]  ;;  %v449_v49 = vld [vmem:[%s2242_s4 + $0x88] sm:$0xff]  ;;  %v1260_v51 = vpack.c.bf16 %v1126_v43, %v1124_v42  ;;  %s339_s19 = scalar_lea.vmem %s2244_s6, %s1822_s16  ;;  %s344_s22 = scalar_lea.vmem %s2245_s7, %s1822_s16 }
  0x11   : > { %v451_v50 = vld [vmem:[%s2242_s4 + $0x98] sm:$0xff]  ;;  %1257 = vmatpush1.bf16.msra.mxu1 %v1256_v35  ;;  %v1324_v52 = vpack.c.bf16 %v446_v46, %v444_v45  ;;  %v1262_v53 = vpack.c.bf16 %v1131_v48, %v1129_v47  ;;  %v1128_v54 = vld [vmem:[%s2242_s4 + $0x280] sm:$0xff]  ;;  %v1130_v55 = vld [vmem:[%s2242_s4 + $0x290] sm:$0xff]  ;;  %s1109_s16 = sshll.u32 %s2249_s28, 1 }
  0x12   : > { %1321 = vmatpush1.bf16.msra.mxu0 %v1320_v39  ;;  %1259 = vmatprep.subr.bf16.mxu1 %v1258_v40  ;;  %v448_v56 = vld [vmem:[%s2242_s4 + $0x80] sm:$0xff]  ;;  %v1326_v57 = vpack.c.bf16 %v451_v50, %v449_v49  ;;  %v450_v58 = vld [vmem:[%s2242_s4 + $0x90] sm:$0xff]  ;;  %v1133_v59 = vld [vmem:[%s2242_s4 + $0x2a8] sm:$0xff]  ;;  %v1264_v63 = vpack.c.bf16 %v1130_v55, %v1128_v54 }
  0x13   : > { %1323 = vmatprep.subr.bf16.mxu0 %v1322_v44  ;;  %v1135_v60 = vld [vmem:[%s2242_s4 + $0x2b8] sm:$0xff]  ;;  %v453_v61 = vld [vmem:[%s2242_s4 + $0xa8] sm:$0xff]  ;;  %v1328_v0 = vpack.c.bf16 %v450_v58, %v448_v56  ;;  %v1132_v2 = vld [vmem:[%s2242_s4 + $0x2a0] sm:$0xff] }
  0x14   : > { %v455_v62 = vld [vmem:[%s2242_s4 + $0xb8] sm:$0xff]  ;;  %v1266_v1 = vpack.c.bf16 %v1135_v60, %v1133_v59  ;;  %v1134_v3 = vld [vmem:[%s2242_s4 + $0x2b0] sm:$0xff]  ;;  %v452_v4 = vld [vmem:[%s2242_s4 + $0xa0] sm:$0xff] }
  0x15   : > { %1261 = vmatpush1.bf16.msra.mxu1 %v1260_v51  ;;  %v1330_v5 = vpack.c.bf16 %v455_v62, %v453_v61  ;;  %v454_v6 = vld [vmem:[%s2242_s4 + $0xb0] sm:$0xff]  ;;  %v1137_v7 = vld [vmem:[%s2242_s4 + $0x2c8] sm:$0xff]  ;;  %v1139_v8 = vld [vmem:[%s2242_s4 + $0x2d8] sm:$0xff]  ;;  %v1268_v11 = vpack.c.bf16 %v1134_v3, %v1132_v2 }
  0x16   : > { %1325 = vmatpush1.bf16.msra.mxu0 %v1324_v52  ;;  %1263 = vmatprep.subr.bf16.mxu1 %v1262_v53  ;;  %v457_v9 = vld [vmem:[%s2242_s4 + $0xc8] sm:$0xff]  ;;  %v459_v10 = vld [vmem:[%s2242_s4 + $0xd8] sm:$0xff]  ;;  %v1332_v12 = vpack.c.bf16 %v454_v6, %v452_v4  ;;  %v1270_v13 = vpack.c.bf16 %v1139_v8, %v1137_v7  ;;  %v1136_v14 = vld [vmem:[%s2242_s4 + $0x2c0] sm:$0xff] }
  0x17   : > { %1327 = vmatprep.subr.bf16.mxu0 %v1326_v57  ;;  %v1138_v15 = vld [vmem:[%s2242_s4 + $0x2d0] sm:$0xff]  ;;  %v456_v16 = vld [vmem:[%s2242_s4 + $0xc0] sm:$0xff]  ;;  %v1334_v17 = vpack.c.bf16 %v459_v10, %v457_v9  ;;  %v1141_v19 = vld [vmem:[%s2242_s4 + $0x2e8] sm:$0xff] }
  0x18   : > { %v458_v18 = vld [vmem:[%s2242_s4 + $0xd0] sm:$0xff]  ;;  %v1143_v20 = vld [vmem:[%s2242_s4 + $0x2f8] sm:$0xff]  ;;  %v461_v21 = vld [vmem:[%s2242_s4 + $0xe8] sm:$0xff]  ;;  %v1272_v23 = vpack.c.bf16 %v1138_v15, %v1136_v14 }
  0x19   : > { %1265 = vmatpush1.bf16.msra.mxu1 %v1264_v63  ;;  %v463_v22 = vld [vmem:[%s2242_s4 + $0xf8] sm:$0xff]  ;;  %v1336_v24 = vpack.c.bf16 %v458_v18, %v456_v16  ;;  %v1274_v25 = vpack.c.bf16 %v1143_v20, %v1141_v19  ;;  %v1140_v26 = vld [vmem:[%s2242_s4 + $0x2e0] sm:$0xff]  ;;  %v1142_v27 = vld [vmem:[%s2242_s4 + $0x2f0] sm:$0xff] }
  0x1a   : > { %1329 = vmatpush1.bf16.msra.mxu0 %v1328_v0  ;;  %1267 = vmatprep.subr.bf16.mxu1 %v1266_v1  ;;  %v460_v28 = vld [vmem:[%s2242_s4 + $0xe0] sm:$0xff]  ;;  %v1338_v29 = vpack.c.bf16 %v463_v22, %v461_v21  ;;  %v462_v30 = vld [vmem:[%s2242_s4 + $0xf0] sm:$0xff]  ;;  %v1145_v31 = vld [vmem:[%s2242_s4 + $0x308] sm:$0xff]  ;;  %v1276_v35 = vpack.c.bf16 %v1142_v27, %v1140_v26 }
  0x1b   : > { %1331 = vmatprep.subr.bf16.mxu0 %v1330_v5  ;;  %v1147_v32 = vld [vmem:[%s2242_s4 + $0x318] sm:$0xff]  ;;  %v465_v33 = vld [vmem:[%s2242_s4 + $0x108] sm:$0xff]  ;;  %v1340_v36 = vpack.c.bf16 %v462_v30, %v460_v28  ;;  %v1144_v38 = vld [vmem:[%s2242_s4 + $0x300] sm:$0xff] }
  0x1c   : > { %v467_v34 = vld [vmem:[%s2242_s4 + $0x118] sm:$0xff]  ;;  %v1278_v37 = vpack.c.bf16 %v1147_v32, %v1145_v31  ;;  %v1146_v39 = vld [vmem:[%s2242_s4 + $0x310] sm:$0xff]  ;;  %v464_v40 = vld [vmem:[%s2242_s4 + $0x100] sm:$0xff] }
  0x1d   : > { %1269 = vmatpush1.bf16.msra.mxu1 %v1268_v11  ;;  %v1342_v41 = vpack.c.bf16 %v467_v34, %v465_v33  ;;  %v466_v42 = vld [vmem:[%s2242_s4 + $0x110] sm:$0xff]  ;;  %v1149_v43 = vld [vmem:[%s2242_s4 + $0x328] sm:$0xff]  ;;  %v1151_v44 = vld [vmem:[%s2242_s4 + $0x338] sm:$0xff]  ;;  %v1280_v47 = vpack.c.bf16 %v1146_v39, %v1144_v38 }
  0x1e   : > { %1333 = vmatpush1.bf16.msra.mxu0 %v1332_v12  ;;  %1271 = vmatprep.subr.bf16.mxu1 %v1270_v13  ;;  %v469_v45 = vld [vmem:[%s2242_s4 + $0x128] sm:$0xff]  ;;  %v471_v46 = vld [vmem:[%s2242_s4 + $0x138] sm:$0xff]  ;;  %v1344_v48 = vpack.c.bf16 %v466_v42, %v464_v40  ;;  %v1282_v49 = vpack.c.bf16 %v1151_v44, %v1149_v43  ;;  %v1148_v50 = vld [vmem:[%s2242_s4 + $0x320] sm:$0xff] }
  0x1f   : > { %1335 = vmatprep.subr.bf16.mxu0 %v1334_v17  ;;  %v1150_v51 = vld [vmem:[%s2242_s4 + $0x330] sm:$0xff]  ;;  %v468_v52 = vld [vmem:[%s2242_s4 + $0x120] sm:$0xff]  ;;  %v1346_v53 = vpack.c.bf16 %v471_v46, %v469_v45  ;;  %v1153_v55 = vld [vmem:[%s2242_s4 + $0x348] sm:$0xff] }
  0x20   : > { %v470_v54 = vld [vmem:[%s2242_s4 + $0x130] sm:$0xff]  ;;  %v1155_v56 = vld [vmem:[%s2242_s4 + $0x358] sm:$0xff]  ;;  %v473_v57 = vld [vmem:[%s2242_s4 + $0x148] sm:$0xff]  ;;  %v1284_v59 = vpack.c.bf16 %v1150_v51, %v1148_v50 }
  0x21   : > { %1273 = vmatpush1.bf16.msra.mxu1 %v1272_v23  ;;  %v475_v58 = vld [vmem:[%s2242_s4 + $0x158] sm:$0xff]  ;;  %v1348_v60 = vpack.c.bf16 %v470_v54, %v468_v52  ;;  %v1286_v61 = vpack.c.bf16 %v1155_v56, %v1153_v55  ;;  %v1152_v62 = vld [vmem:[%s2242_s4 + $0x340] sm:$0xff]  ;;  %v1154_v63 = vld [vmem:[%s2242_s4 + $0x350] sm:$0xff] }
  0x22   : > { %1337 = vmatpush1.bf16.msra.mxu0 %v1336_v24  ;;  %1275 = vmatprep.subr.bf16.mxu1 %v1274_v25  ;;  %v472_v0 = vld [vmem:[%s2242_s4 + $0x140] sm:$0xff]  ;;  %v1350_v1 = vpack.c.bf16 %v475_v58, %v473_v57  ;;  %v474_v2 = vld [vmem:[%s2242_s4 + $0x150] sm:$0xff]  ;;  %v1157_v3 = vld [vmem:[%s2242_s4 + $0x368] sm:$0xff]  ;;  %v1288_v7 = vpack.c.bf16 %v1154_v63, %v1152_v62 }
  0x23   : > { %1339 = vmatprep.subr.bf16.mxu0 %v1338_v29  ;;  %v1159_v4 = vld [vmem:[%s2242_s4 + $0x378] sm:$0xff]  ;;  %v477_v5 = vld [vmem:[%s2242_s4 + $0x168] sm:$0xff]  ;;  %v1156_v8 = vld [vmem:[%s2242_s4 + $0x360] sm:$0xff]  ;;  %v1352_v11 = vpack.c.bf16 %v474_v2, %v472_v0 }
  0x24   : > { %v479_v6 = vld [vmem:[%s2242_s4 + $0x178] sm:$0xff]  ;;  %v1158_v9 = vld [vmem:[%s2242_s4 + $0x370] sm:$0xff]  ;;  %v476_v10 = vld [vmem:[%s2242_s4 + $0x160] sm:$0xff]  ;;  %v1290_v12 = vpack.c.bf16 %v1159_v4, %v1157_v3 }
  0x25   : > { %1277 = vmatpush1.bf16.msra.mxu1 %v1276_v35  ;;  %v478_v13 = vld [vmem:[%s2242_s4 + $0x170] sm:$0xff]  ;;  %v1161_v14 = vld [vmem:[%s2242_s4 + $0x388] sm:$0xff]  ;;  %v1163_v15 = vld [vmem:[%s2242_s4 + $0x398] sm:$0xff]  ;;  %v1354_v16 = vpack.c.bf16 %v479_v6, %v477_v5  ;;  %v1292_v24 = vpack.c.bf16 %v1158_v9, %v1156_v8 }
  0x26   : > { %1341 = vmatpush1.bf16.msra.mxu0 %v1340_v36  ;;  %1279 = vmatprep.subr.bf16.mxu1 %v1278_v37  ;;  %v481_v17 = vld [vmem:[%s2242_s4 + $0x188] sm:$0xff]  ;;  %v483_v18 = vld [vmem:[%s2242_s4 + $0x198] sm:$0xff]  ;;  %v1880_v19 = vld [vmem:[%s329_s15] sm:$0xff]  ;;  %v1356_v28 = vpack.c.bf16 %v478_v13, %v476_v10  ;;  %v1294_v29 = vpack.c.bf16 %v1163_v15, %v1161_v14 }
  0x27   : > { %1343 = vmatprep.subr.bf16.mxu0 %v1342_v41  ;;  %v1882_v20 = vld [vmem:[%s329_s15 + $0x8] sm:$0xff]  ;;  %v1884_v21 = vld [vmem:[%s334_s26] sm:$0xff]  ;;  %v353_v23 = vmul.f32 %v1880_v19, %v1880_v19  ;;  %v1162_v31 = vld [vmem:[%s2242_s4 + $0x390] sm:$0xff]  ;;  %v1358_v33 = vpack.c.bf16 %v483_v18, %v481_v17 }
  0x28   : > { %v1886_v22 = vld [vmem:[%s334_s26 + $0x8] sm:$0xff]  ;;  %v354_v25 = vmul.f32 %v1882_v20, %v1882_v20  ;;  %v355_v26 = vmul.f32 %v1884_v21, %v1884_v21  ;;  %v1160_v30 = vld [vmem:[%s2242_s4 + $0x380] sm:$0xff]  ;;  %v482_v34 = vld [vmem:[%s2242_s4 + $0x190] sm:$0xff]  ;;  %s348_s26 = scalar_lea.vmem %s2246_s8, %s1109_s16 }
  0x29   : > { %1281 = vmatpush1.bf16.msra.mxu1 %v1280_v47  ;;  %v356_v27 = vmul.f32 %v1886_v22, %v1886_v22  ;;  %v480_v32 = vld [vmem:[%s2242_s4 + $0x180] sm:$0xff]  ;;  %v1165_v35 = vld [vmem:[%s2242_s4 + $0x3a8] sm:$0xff]  ;;  %v1167_v36 = vld [vmem:[%s2242_s4 + $0x3b8] sm:$0xff]  ;;  %v1296_v41 = vpack.c.bf16 %v1162_v31, %v1160_v30 }
  0x2a   : > { %1345 = vmatpush1.bf16.msra.mxu0 %v1344_v48  ;;  %1283 = vmatprep.subr.bf16.mxu1 %v1282_v49  ;;  %v1914_v37 = vadd.f32 %v355_v26, %v353_v23  ;;  %v485_v39 = vld [vmem:[%s2242_s4 + $0x1a8] sm:$0xff]  ;;  %v487_v40 = vld [vmem:[%s2242_s4 + $0x1b8] sm:$0xff]  ;;  %v1360_v42 = vpack.c.bf16 %v482_v34, %v480_v32  ;;  %v1298_v43 = vpack.c.bf16 %v1167_v36, %v1165_v35  ;;  %v1164_v44 = vld [vmem:[%s2242_s4 + $0x3a0] sm:$0xff] }
  0x2b   : > { %1347 = vmatprep.subr.bf16.mxu0 %v1346_v53  ;;  %v1916_v38 = vadd.f32 %v356_v27, %v354_v25  ;;  %v1166_v45 = vld [vmem:[%s2242_s4 + $0x3b0] sm:$0xff]  ;;  %v484_v46 = vld [vmem:[%s2242_s4 + $0x1a0] sm:$0xff]  ;;  %v1362_v49 = vpack.c.bf16 %v487_v40, %v485_v39  ;;  %v1169_v51 = vld [vmem:[%s2242_s4 + $0x3c8] sm:$0xff] }
  0x2c   : > { %vm359_vm0 = vcmp.gt.f32.partialorder %v1914_v37, 0.0  ;;  %v486_v50 = vld [vmem:[%s2242_s4 + $0x1b0] sm:$0xff]  ;;  %v1171_v52 = vld [vmem:[%s2242_s4 + $0x3d8] sm:$0xff]  ;;  %v489_v53 = vld [vmem:[%s2242_s4 + $0x1c8] sm:$0xff]  ;;  %v1300_v55 = vpack.c.bf16 %v1166_v45, %v1164_v44 }
  0x2d   : > { %1285 = vmatpush1.bf16.msra.mxu1 %v1284_v59  ;;  %vm360_vm1 = vcmp.gt.f32.partialorder %v1916_v38, 0.0  ;;  %v361_v47 = vsel %vm359_vm0, %v1914_v37, 1.0  ;;  %v491_v54 = vld [vmem:[%s2242_s4 + $0x1d8] sm:$0xff]  ;;  %v1364_v56 = vpack.c.bf16 %v486_v50, %v484_v46  ;;  %v1302_v57 = vpack.c.bf16 %v1171_v52, %v1169_v51  ;;  %v1168_v58 = vld [vmem:[%s2242_s4 + $0x3c0] sm:$0xff]  ;;  %v1170_v59 = vld [vmem:[%s2242_s4 + $0x3d0] sm:$0xff] }
  0x2e   : > { %1349 = vmatpush1.bf16.msra.mxu0 %v1348_v60  ;;  %1287 = vmatprep.subr.bf16.mxu1 %v1286_v61  ;;  %v362_v48 = vsel %vm360_vm1, %v1916_v38, 1.0  ;;  %1487 = vrsqrt.f32 %v361_v47  ;;  %v488_v60 = vld [vmem:[%s2242_s4 + $0x1c0] sm:$0xff]  ;;  %v1366_v61 = vpack.c.bf16 %v491_v54, %v489_v53  ;;  %v490_v62 = vld [vmem:[%s2242_s4 + $0x1d0] sm:$0xff]  ;;  %v1173_v63 = vld [vmem:[%s2242_s4 + $0x3e8] sm:$0xff]  ;;  %v1304_v3 = vpack.c.bf16 %v1170_v59, %v1168_v58 }
  0x2f   : > { %1351 = vmatprep.subr.bf16.mxu0 %v1350_v1  ;;  %1489 = vrsqrt.f32 %v362_v48  ;;  %v1175_v0 = vld [vmem:[%s2242_s4 + $0x3f8] sm:$0xff]  ;;  %v493_v1 = vld [vmem:[%s2242_s4 + $0x1e8] sm:$0xff]  ;;  %v1368_v4 = vpack.c.bf16 %v490_v62, %v488_v60  ;;  %v1172_v6 = vld [vmem:[%s2242_s4 + $0x3e0] sm:$0xff] }
  0x30   : > { %v495_v2 = vld [vmem:[%s2242_s4 + $0x1f8] sm:$0xff]  ;;  %v1306_v5 = vpack.c.bf16 %v1175_v0, %v1173_v63  ;;  %v492_v8 = vld [vmem:[%s2242_s4 + $0x1e0] sm:$0xff]  ;;  %v494_v10 = vld [vmem:[%s2242_s4 + $0x1f0] sm:$0xff] }
  0x31   : > { %1289 = vmatpush1.bf16.msra.mxu1 %v1288_v7  ;;  %v1174_v7 = vld [vmem:[%s2242_s4 + $0x3f0] sm:$0xff]  ;;  %v1370_v9 = vpack.c.bf16 %v495_v2, %v493_v1  ;;  %v1110_v15 = vld [vmem:[%s2240_s2] ss:$0 sm:$0xff]  ;;  %v1372_v17 = vpack.c.bf16 %v494_v10, %v492_v8  ;;  %v1181_v48 = vld [vmem:[%s2242_s4 + $0x428] sm:$0xff] }
  0x32   : > { %1353 = vmatpush1.bf16.msra.mxu0 %v1352_v11  ;;  %1291 = vmatprep.subr.bf16.mxu1 %v1290_v12  ;;  %v1177_v11 = vld [vmem:[%s2242_s4 + $0x408] sm:$0xff]  ;;  %v1179_v12 = vld [vmem:[%s2242_s4 + $0x418] sm:$0xff]  ;;  %v1308_v14 = vpack.c.bf16 %v1174_v7, %v1172_v6  ;;  %v1111_v25 = vld [vmem:[%s2241_s3] ss:$0 sm:$0xff] }
  0x33   : > { %1355 = vmatprep.subr.bf16.mxu0 %v1354_v16  ;;  %v1374_v23 = vpack.c.bf16 %v1179_v12, %v1177_v11  ;;  %v1180_v53 = vld [vmem:[%s2242_s4 + $0x420] sm:$0xff]  ;;  %v1182_v54 = vld [vmem:[%s2242_s4 + $0x430] sm:$0xff]  ;;  %v1187_v63 = vld [vmem:[%s2242_s4 + $0x458] sm:$0xff] }
  0x34   : > { %v1380_v1 = vpack.c.bf16 %v1182_v54, %v1180_v53  ;;  %v1184_v12 = vld [vmem:[%s2242_s4 + $0x440] sm:$0xff] }
  0x35   : > { %1293 = vmatpush1.bf16.msra.mxu1 %v1292_v24  ;;  %v1208_v54 = vld [vmem:[%s2242_s4 + $0x500] sm:$0xff] }
  0x36   : > { %1357 = vmatpush1.bf16.msra.mxu0 %v1356_v28  ;;  %1295 = vmatprep.subr.bf16.mxu1 %v1294_v29 }
  0x37   : > { %1359 = vmatprep.subr.bf16.mxu0 %v1358_v33 }
  0x38   : > { %v1488_v13 = vpop.eup %1487 }
  0x39   : > { %1297 = vmatpush1.bf16.msra.mxu1 %v1296_v41  ;;  %v1490_v16 = vpop.eup %1489  ;;  %v365_v18 = vmul.f32 %v1488_v13, %v1914_v37  ;;  %v393_v29 = vmul.f32 %v1488_v13, %v1884_v21  ;;  %v387_v30 = vmul.f32 %v1488_v13, %v1880_v19  ;;  %v1176_v37 = vld [vmem:[%s2242_s4 + $0x400] sm:$0xff]  ;;  %v1186_v13 = vld [vmem:[%s2242_s4 + $0x450] sm:$0xff] }
  0x3a   : > { %1361 = vmatpush1.bf16.msra.mxu0 %v1360_v42  ;;  %1299 = vmatprep.subr.bf16.mxu1 %v1298_v43  ;;  %v366_v24 = vmul.f32 %v1490_v16, %v1916_v38  ;;  %v388_v32 = vmul.f32 %v1490_v16, %v1882_v20  ;;  %v394_v33 = vmul.f32 %v1490_v16, %v1886_v22  ;;  %v1178_v38 = vld [vmem:[%s2242_s4 + $0x410] sm:$0xff]  ;;  %v1189_v16 = vld [vmem:[%s2242_s4 + $0x468] sm:$0xff] }
  0x3b   : > { %1363 = vmatprep.subr.bf16.mxu0 %v1362_v49  ;;  %v374_v26 = vmul.f32 %v1110_v15, %v365_v18  ;;  %v1183_v49 = vld [vmem:[%s2242_s4 + $0x438] sm:$0xff]  ;;  %v1376_v52 = vpack.c.bf16 %v1178_v38, %v1176_v37 }
  0x3c   : > { %v375_v27 = vmul.f32 %v1110_v15, %v366_v24  ;;  %v1378_v59 = vpack.c.bf16 %v1183_v49, %v1181_v48  ;;  %v1384_v24 = vpack.c.bf16 %v1186_v13, %v1184_v12  ;;  %v1204_v48 = vld [vmem:[%s2242_s4 + $0x4e0] sm:$0xff]  ;;  %v1206_v49 = vld [vmem:[%s2242_s4 + $0x4f0] sm:$0xff] }
  0x3d   : > { %1301 = vmatpush1.bf16.msra.mxu1 %v1300_v55  ;;  %v383_v28 = vadd.f32 %v1111_v25, %v374_v26  ;;  %v1185_v55 = vld [vmem:[%s2242_s4 + $0x448] sm:$0xff] }
  0x3e   : > { %1365 = vmatpush1.bf16.msra.mxu0 %v1364_v56  ;;  %1303 = vmatprep.subr.bf16.mxu1 %v1302_v57  ;;  %v384_v31 = vadd.f32 %v1111_v25, %v375_v27  ;;  %v1382_v11 = vpack.c.bf16 %v1187_v63, %v1185_v55  ;;  %v1188_v27 = vld [vmem:[%s2242_s4 + $0x460] sm:$0xff]  ;;  %v1210_v55 = vld [vmem:[%s2242_s4 + $0x510] sm:$0xff]  ;;  %v1219_v63 = vld [vmem:[%s2242_s4 + $0x558] sm:$0xff] }
  0x3f   : > { %1367 = vmatprep.subr.bf16.mxu0 %v1366_v61  ;;  %v385_v34 = vmax.f32 %v383_v28, 0.0  ;;  %v1190_v28 = vld [vmem:[%s2242_s4 + $0x470] sm:$0xff] }
  0x40   : > { %v386_v35 = vmax.f32 %v384_v31, 0.0  ;;  %v1388_v31 = vpack.c.bf16 %v1190_v28, %v1188_v27  ;;  %v1235_v27 = vld [vmem:[%s2242_s4 + $0x5d8] sm:$0xff] }
  0x41   : > { %1305 = vmatpush1.bf16.msra.mxu1 %v1304_v3  ;;  %v395_v36 = vmul.f32 %v393_v29, %v385_v34  ;;  %v389_v39 = vmul.f32 %v387_v30, %v385_v34  ;;  %v1193_v29 = vld [vmem:[%s2242_s4 + $0x488] sm:$0xff]  ;;  %v1195_v30 = vld [vmem:[%s2242_s4 + $0x498] sm:$0xff] }
  0x42   : > { %1369 = vmatpush1.bf16.msra.mxu0 %v1368_v4  ;;  %1307 = vmatprep.subr.bf16.mxu1 %v1306_v5  ;;  %v396_v40 = vmul.f32 %v394_v33, %v386_v35  ;;  %v390_v41 = vmul.f32 %v388_v32, %v386_v35  ;;  %v1390_v32 = vpack.c.bf16 %v1195_v30, %v1193_v29  ;;  %v1192_v33 = vld [vmem:[%s2242_s4 + $0x480] sm:$0xff] }
  0x43   : > { %1371 = vmatprep.subr.bf16.mxu0 %v1370_v9  ;;  %v397_v42 = vsel %vm359_vm0, %v395_v36, 0.0  ;;  %v391_v19 = vsel %vm359_vm0, %v389_v39, %v385_v34  ;;  %v1194_v34 = vld [vmem:[%s2242_s4 + $0x490] sm:$0xff]  ;;  %v1199_v36 = vld [vmem:[%s2242_s4 + $0x4b8] sm:$0xff]  ;;  %v1232_v30 = vld [vmem:[%s2242_s4 + $0x5c0] sm:$0xff] }
  0x44   : > { %v398_v21 = vsel %vm360_vm1, %v396_v40, 0.0  ;;  %v411_v20 = vrot.slane %v397_v42, 7  ;;  %v392_v22 = vsel %vm360_vm1, %v390_v41, %v386_v35  ;;  %v410_v43 = vrot.slane %v391_v19, 7  ;;  %v1197_v35 = vld [vmem:[%s2242_s4 + $0x4a8] sm:$0xff]  ;;  %v1196_v41 = vld [vmem:[%s2242_s4 + $0x4a0] sm:$0xff]  ;;  %v1198_v42 = vld [vmem:[%s2242_s4 + $0x4b0] sm:$0xff] }
  0x45   : > { %1309 = vmatpush1.bf16.msra.mxu1 %v1308_v14  ;;  %v414_v44 = vrot.slane %v398_v21, 7  ;;  %v412_v45 = vrot.slane %v392_v22, 7  ;;  %v1392_v39 = vpack.c.bf16 %v1194_v34, %v1192_v33  ;;  %v1394_v40 = vpack.c.bf16 %v1199_v36, %v1197_v35  ;;  %v1201_v19 = vld [vmem:[%s2242_s4 + $0x4c8] sm:$0xff]  ;;  %v1203_v21 = vld [vmem:[%s2242_s4 + $0x4d8] sm:$0xff]  ;;  %v1236_v36 = vld [vmem:[%s2242_s4 + $0x5e0] sm:$0xff] }
  0x46   : > { %1373 = vmatpush1.bf16.msra.mxu0 %v1372_v17  ;;  %1438 = vmatprep.subr.bf16.mxu1 %v1374_v23  ;;  %423 = vst [vmem:[#allocation2 + $0x8] sm:$0xfe] %v411_v20  ;;  %422 = vst [vmem:[#allocation2] sm:$0xfe] %v410_v43  ;;  %v1191_v17 = vld [vmem:[%s2242_s4 + $0x478] sm:$0xff]  ;;  %v1398_v22 = vpack.c.bf16 %v1203_v21, %v1201_v19 }
  0x47   : > { %1375 = vmatprep.subr.bf16.mxu0 %v1374_v23  ;;  %v415_v46 = vsel %vm409_vm2, %v411_v20, %v414_v44  ;;  %v2020_v47 = vsel %vm409_vm2, %v410_v43, %v412_v45  ;;  %426 = vst [vmem:[#allocation2 + $0x20] sm:$0x1] %v412_v45  ;;  %427 = vst [vmem:[#allocation2 + $0x28] sm:$0x1] %v414_v44  ;;  %v1386_v26 = vpack.c.bf16 %v1191_v17, %v1189_v16  ;;  %v1200_v43 = vld [vmem:[%s2242_s4 + $0x4c0] sm:$0xff]  ;;  %v1202_v44 = vld [vmem:[%s2242_s4 + $0x4d0] sm:$0xff] }
  0x48   : > { %v576_v50 = vrot.slane %v415_v46, 1  ;;  %v573_v51 = vrot.slane %v2020_v47, 1  ;;  %v818_v5 = vrot.slane %v415_v46, 2  ;;  %v1396_v20 = vpack.c.bf16 %v1198_v42, %v1196_v41  ;;  %v1205_v45 = vld [vmem:[%s2242_s4 + $0x4e8] sm:$0xff]  ;;  %v1231_v17 = vld [vmem:[%s2242_s4 + $0x5b8] sm:$0xff] }
  0x49   : > { %v1400_v37 = vpack.c.bf16 %v1202_v44, %v1200_v43  ;;  %v1229_v16 = vld [vmem:[%s2242_s4 + $0x5a8] sm:$0xff]  ;;  %v1239_v33 = vld [vmem:[%s2242_s4 + $0x5f8] sm:$0xff]  ;;  %v815_v19 = vrot.slane %v2020_v47, 2 }
  0x4d   : > { %v497_v56 = vld [vmem:[#allocation2 + $0x8] sm:$0xfe]  ;;  %v496_v57 = vld [vmem:[#allocation2] sm:$0xfe] }
  0x4e   : > { %v429_v58 = vld [vmem:[#allocation2 + $0x8] sm:$0xff]  ;;  %v575_v60 = vrot.slane %v497_v56, 1  ;;  %v572_v61 = vrot.slane %v496_v57, 1  ;;  %v428_v62 = vld [vmem:[#allocation2] sm:$0xff]  ;;  %v1215_v57 = vld [vmem:[%s2242_s4 + $0x538] sm:$0xff] }
  0x4f   : > { %727 = vmatprep.mubr.f32.mxu0 %v429_v58  ;;  %v499_v0 = vld [vmem:[#allocation2 + $0x28] sm:$0x1]  ;;  %v498_v3 = vld [vmem:[#allocation2 + $0x20] sm:$0x1]  ;;  %v741_v4 = vld [vmem:[#allocation2 + $0x8] sm:$0xfc]  ;;  %v1408_v58 = vpack.c.bf16 %v1210_v55, %v1208_v54 }
  0x50   : > { %728 = vmatmul.mubr.f32.vlgmr.msra.gmra.mrb[0].mxu0 %v428_v62  ;;  %v580_v2 = vrot.slane %v499_v0, 1  ;;  %v577_v6 = vsel %vm571_vm3, %v575_v60, %v576_v50  ;;  %v574_v7 = vsel %vm571_vm3, %v572_v61, %v573_v51  ;;  %v578_v8 = vrot.slane %v498_v3, 1  ;;  %v743_v10 = vld [vmem:[#allocation2 + $0x28] sm:$0x3]  ;;  %v1212_v60 = vld [vmem:[%s2242_s4 + $0x520] sm:$0xff]  ;;  %v1214_v61 = vld [vmem:[%s2242_s4 + $0x530] sm:$0xff] }
  0x51   : > { %1377 = vmatpush1.bf16.msra.mxu0 %v1376_v52  ;;  %733 = vmatprep.mubr.f32.mxu0 %v415_v46  ;;  %v817_v9 = vrot.slane %v741_v4, 2  ;;  %v822_v15 = vrot.slane %v743_v10, 2  ;;  %v1207_v46 = vld [vmem:[%s2242_s4 + $0x4f8] sm:$0xff]  ;;  %v1213_v56 = vld [vmem:[%s2242_s4 + $0x528] sm:$0xff]  ;;  %v1412_v0 = vpack.c.bf16 %v1214_v61, %v1212_v60  ;;  %v1218_v3 = vld [vmem:[%s2242_s4 + $0x550] sm:$0xff] }
  0x52   : > { %650 = vmatprep.mubr.f32.mxu1 %v577_v6  ;;  %1379 = vmatprep.subr.bf16.mxu0 %v1378_v59  ;;  %v581_v14 = vsel %vm571_vm3, %v576_v50, %v580_v2  ;;  %v579_v18 = vsel %vm571_vm3, %v573_v51, %v578_v8  ;;  %v1402_v38 = vpack.c.bf16 %v1207_v46, %v1205_v45  ;;  %v1209_v50 = vld [vmem:[%s2242_s4 + $0x508] sm:$0xff]  ;;  %v1211_v51 = vld [vmem:[%s2242_s4 + $0x518] sm:$0xff]  ;;  %v1216_v2 = vld [vmem:[%s2242_s4 + $0x540] sm:$0xff] }
  0x53   : > { %651 = vmatmul.mubr.f32.vlgmr.msra.gmra.mrb[0].mxu1 %v574_v7  ;;  %v819_v23 = vsel %vm813_vm4, %v817_v9, %v818_v5  ;;  %v823_v25 = vsel %vm813_vm4, %v818_v5, %v822_v15  ;;  %v1406_v53 = vpack.c.bf16 %v1211_v51, %v1209_v50  ;;  %v1217_v62 = vld [vmem:[%s2242_s4 + $0x548] sm:$0xff]  ;;  %v1223_v5 = vld [vmem:[%s2242_s4 + $0x578] sm:$0xff]  ;;  %v1416_v6 = vpack.c.bf16 %v1218_v3, %v1216_v2  ;;  %v1220_v8 = vld [vmem:[%s2242_s4 + $0x560] sm:$0xff] }
  0x54   : > { %1454 = vmatpush1.bf16.msra.mxu1 %v1376_v52  ;;  %656 = vmatprep.mubr.f32.mxu1 %v581_v14  ;;  %v1404_v52 = vpack.c.bf16 %v1206_v49, %v1204_v48  ;;  %v1221_v4 = vld [vmem:[%s2242_s4 + $0x568] sm:$0xff]  ;;  %v1222_v9 = vld [vmem:[%s2242_s4 + $0x570] sm:$0xff]  ;;  %v1224_v14 = vld [vmem:[%s2242_s4 + $0x580] sm:$0xff]  ;;  %v911_v50 = vlaneseq }
  0x55   : > { %1439 = vmatprep.subr.bf16.mxu1 %v1378_v59  ;;  %1381 = vmatpush1.bf16.msra.mxu0 %v1380_v1  ;;  %v1410_v59 = vpack.c.bf16 %v1215_v57, %v1213_v56  ;;  %v1418_v7 = vpack.c.bf16 %v1223_v5, %v1221_v4  ;;  %v1225_v10 = vld [vmem:[%s2242_s4 + $0x588] sm:$0xff]  ;;  %v1420_v12 = vpack.c.bf16 %v1222_v9, %v1220_v8  ;;  %v1226_v15 = vld [vmem:[%s2242_s4 + $0x590] sm:$0xff]  ;;  %v742_v21 = vld [vmem:[#allocation2 + $0x20] sm:$0x3] }
  0x56   : > { %1383 = vmatprep.subr.bf16.mxu0 %v1382_v11  ;;  %734 = vmatmul.mubr.f32.gmra.mrb[2].mxu0 %v2020_v47  ;;  %v912_v51 = vshrl.u32 %v911_v50, 7 }
  0x57   : > { %657 = vmatmul.mubr.f32.gmra.mrb[2].mxu1 %v579_v18  ;;  %892 = vmatprep.mubr.f32.mxu0 %v819_v23  ;;  %v1424_v18 = vpack.c.bf16 %v1226_v15, %v1224_v14  ;;  %v1426_v23 = vpack.c.bf16 %v1231_v17, %v1229_v16 }
  0x58   : > { %1455 = vmatpush1.bf16.msra.mxu1 %v1380_v1  ;;  %898 = vmatprep.mubr.f32.mxu1 %v823_v25  ;;  %v1414_v1 = vpack.c.bf16 %v1219_v63, %v1217_v62  ;;  %v1230_v25 = vld [vmem:[%s2242_s4 + $0x5b0] sm:$0xff]  ;;  %v917_v54 = vsub.s32 1, %v912_v51 }
  0x59   : > { %1440 = vmatprep.subr.bf16.mxu1 %v1382_v11  ;;  %1385 = vmatpush1.bf16.msra.mxu0 %v1384_v24  ;;  %v1227_v11 = vld [vmem:[%s2242_s4 + $0x598] sm:$0xff] }
  0x5a   : > { %1387 = vmatprep.subr.bf16.mxu0 %v1386_v26  ;;  %v1422_v13 = vpack.c.bf16 %v1227_v11, %v1225_v10 }
  0x5c   : > { %1456 = vmatpush1.bf16.msra.mxu1 %v1384_v24  ;;  %v1228_v24 = vld [vmem:[%s2242_s4 + $0x5a0] sm:$0xff] }
  0x5d   : > { %1441 = vmatprep.subr.bf16.mxu1 %v1386_v26  ;;  %1389 = vmatpush1.bf16.msra.mxu0 %v1388_v31  ;;  %v1233_v26 = vld [vmem:[%s2242_s4 + $0x5c8] sm:$0xff]  ;;  %v1428_v28 = vpack.c.bf16 %v1230_v25, %v1228_v24 }
  0x5e   : > { %1391 = vmatprep.subr.bf16.mxu0 %v1390_v32  ;;  %v1430_v29 = vpack.c.bf16 %v1235_v27, %v1233_v26 }
  0x60   : > { %1457 = vmatpush1.bf16.msra.mxu1 %v1388_v31  ;;  %v1234_v31 = vld [vmem:[%s2242_s4 + $0x5d0] sm:$0xff] }
  0x61   : > { %1442 = vmatprep.subr.bf16.mxu1 %v1390_v32  ;;  %1393 = vmatpush1.bf16.msra.mxu0 %v1392_v39  ;;  %v1237_v32 = vld [vmem:[%s2242_s4 + $0x5e8] sm:$0xff]  ;;  %v1432_v34 = vpack.c.bf16 %v1234_v31, %v1232_v30 }
  0x62   : > { %1395 = vmatprep.subr.bf16.mxu0 %v1394_v40  ;;  %v1434_v35 = vpack.c.bf16 %v1239_v33, %v1237_v32 }
  0x64   : > { %1458 = vmatpush1.bf16.msra.mxu1 %v1392_v39  ;;  %v1238_v39 = vld [vmem:[%s2242_s4 + $0x5f0] sm:$0xff] }
  0x65   : > { %1443 = vmatprep.subr.bf16.mxu1 %v1394_v40  ;;  %1397 = vmatpush1.bf16.msra.mxu0 %v1396_v20  ;;  %v740_v40 = vld [vmem:[#allocation2] sm:$0xfc]  ;;  %v1436_v41 = vpack.c.bf16 %v1238_v39, %v1236_v36 }
  0x66   : > { %1399 = vmatprep.subr.bf16.mxu0 %v1398_v22  ;;  %v814_v42 = vrot.slane %v740_v40, 2 }
  0x68   : > { %1459 = vmatpush1.bf16.msra.mxu1 %v1396_v20  ;;  %v820_v20 = vrot.slane %v742_v21, 2 }
  0x69   : > { %1444 = vmatprep.subr.bf16.mxu1 %v1398_v22  ;;  %1401 = vmatpush1.bf16.msra.mxu0 %v1400_v37  ;;  %v816_v22 = vsel %vm813_vm4, %v814_v42, %v815_v19 }
  0x6a   : > { %1403 = vmatprep.subr.bf16.mxu0 %v1402_v38  ;;  %v821_v43 = vsel %vm813_vm4, %v815_v19, %v820_v20 }
  0x6c   : > { %1460 = vmatpush1.bf16.msra.mxu1 %v1400_v37 }
  0x6d   : > { %1445 = vmatprep.subr.bf16.mxu1 %v1402_v38  ;;  %1405 = vmatpush1.bf16.msra.mxu0 %v1404_v52 }
  0x6e   : > { %1407 = vmatprep.subr.bf16.mxu0 %v1406_v53 }
  0x70   : > { %1461 = vmatpush1.bf16.msra.mxu1 %v1404_v52  ;;  %v913_v52 = vsub.s32 0, %v912_v51 }
  0x71   : > { %1446 = vmatprep.subr.bf16.mxu1 %v1406_v53  ;;  %1409 = vmatpush1.bf16.msra.mxu0 %v1408_v58  ;;  %v909_v53 = vld [vmem:[%s2243_s5] sm:$0x3] }
  0x72   : > { %1411 = vmatprep.subr.bf16.mxu0 %v1410_v59  ;;  %v914_v55 = vrot.slane %v909_v53, %v913_v52  ;;  %v918_v57 = vrot.slane %v909_v53, %v917_v54 }
  0x74   : > { %1462 = vmatpush1.bf16.msra.mxu1 %v1408_v58 }
  0x75   : > { %1447 = vmatprep.subr.bf16.mxu1 %v1410_v59  ;;  %1413 = vmatpush1.bf16.msra.mxu0 %v1412_v0 }
  0x76   : > { %1415 = vmatprep.subr.bf16.mxu0 %v1414_v1 }
  0x78   : > { %1463 = vmatpush1.bf16.msra.mxu1 %v1412_v0 }
  0x79   : > { %1448 = vmatprep.subr.bf16.mxu1 %v1414_v1  ;;  %1417 = vmatpush1.bf16.msra.mxu0 %v1416_v6 }
  0x7a   : > { %1419 = vmatprep.subr.bf16.mxu0 %v1418_v7 }
  0x7c   : > { %1464 = vmatpush1.bf16.msra.mxu1 %v1416_v6 }
  0x7d   : > { %1449 = vmatprep.subr.bf16.mxu1 %v1418_v7  ;;  %1421 = vmatpush1.bf16.msra.mxu0 %v1420_v12 }
  0x7e   : > { %1423 = vmatprep.subr.bf16.mxu0 %v1422_v13 }
  0x80   : > { %1465 = vmatpush1.bf16.msra.mxu1 %v1420_v12 }
  0x81   : > { %1450 = vmatprep.subr.bf16.mxu1 %v1422_v13  ;;  %1425 = vmatpush1.bf16.msra.mxu0 %v1424_v18 }
  0x82   : > { %1427 = vmatprep.subr.bf16.mxu0 %v1426_v23 }
  0x84   : > { %1466 = vmatpush1.bf16.msra.mxu1 %v1424_v18 }
  0x85   : > { %1451 = vmatprep.subr.bf16.mxu1 %v1426_v23  ;;  %1429 = vmatpush1.bf16.msra.mxu0 %v1428_v28 }
  0x86   : > { %1431 = vmatprep.subr.bf16.mxu0 %v1430_v29 }
  0x88   : > { %1467 = vmatpush1.bf16.msra.mxu1 %v1428_v28 }
  0x89   : > { %1452 = vmatprep.subr.bf16.mxu1 %v1430_v29  ;;  %1433 = vmatpush1.bf16.msra.mxu0 %v1432_v34 }
  0x8a   : > { %1435 = vmatprep.subr.bf16.mxu0 %v1434_v35 }
  0x8c   : > { %1468 = vmatpush1.bf16.msra.mxu1 %v1432_v34 }
  0x8d   : > { %1453 = vmatprep.subr.bf16.mxu1 %v1434_v35  ;;  %1437 = vmatpush1.bf16.msra.mxu0 %v1436_v41 }
  0x90   : > { %1469 = vmatpush1.bf16.msra.mxu1 %v1436_v41  ;;  %893 = vmatmul.mubr.f32.vlgmr.msra.gmra.mrb[0].mxu0 %v816_v22 }
  0x93   : > { %899 = vmatmul.mubr.f32.vlgmr.msra.gmra.mrb[4].mxu1 %v821_v43 }
 0x126   : > { %v652_v44 = vpop.f32.mrb[0].mxu1 }
 0x127   : > { %v654_v45 = vpop.f32.mrb[1].mxu1 }
 0x129   : > { %v735_v46 = vpop.f32.mrb[2].mxu0 }
 0x12a   : > { %v658_v37 = vpop.f32.mrb[2].mxu1  ;;  %v737_v38 = vpop.f32.mrb[3].mxu0 }
 0x12b   : > { %v736_v47 = vadd.f32 %v735_v46, %v658_v37  ;;  %v660_v48 = vpop.f32.mrb[3].mxu1 }
 0x12c   : > { %v738_v49 = vadd.f32 %v737_v38, %v660_v48 }
 0x163   : > { %v894_v56 = vpop.f32.mrb[0].mxu0 }
 0x164   : > { %v1470_v58 = vadd.f32 %v894_v56, %v652_v44  ;;  %v896_v59 = vpop.f32.mrb[1].mxu0 }
 0x165   : > { %v1471_v60 = vadd.f32 %v896_v59, %v654_v45 }
 0x166   : > { %v921_v61 = vadd.f32 %v1470_v58, %v914_v55  ;;  %v900_v62 = vpop.f32.mrb[4].mxu1 }
 0x167   : > { %v907_v63 = vadd.f32 %v900_v62, %v736_v47  ;;  %v922_v0 = vadd.f32 %v1471_v60, %v918_v57  ;;  %v902_v1 = vpop.f32.mrb[5].mxu1 }
 0x168   : > { %925 = vst [vmem:[%s339_s19] sm:$0xff] %v921_v61  ;;  %v929_v2 = vmul.f32 %v921_v61, %v921_v61  ;;  %v908_v3 = vadd.f32 %v902_v1, %v738_v49 }
 0x169   : > { %v923_v4 = vadd.f32 %v914_v55, %v907_v63  ;;  %927 = vst [vmem:[%s344_s22] sm:$0xff] %v922_v0  ;;  %v931_v5 = vmul.f32 %v922_v0, %v922_v0 }
 0x16a   : > { %v924_v6 = vadd.f32 %v918_v57, %v908_v3 }
 0x16b   : > { %926 = vst [vmem:[%s339_s19 + $0x8] sm:$0xff] %v923_v4  ;;  %v930_v7 = vmul.f32 %v923_v4, %v923_v4  ;;  %v933_v8 = vadd.f32 %v931_v5, %v929_v2 }
 0x16c   : > { %928 = vst [vmem:[%s344_s22 + $0x8] sm:$0xff] %v924_v6  ;;  %v932_v9 = vmul.f32 %v924_v6, %v924_v6 }
 0x16d   : > { %1491 = vrsqrt.f32 %v933_v8  ;;  %vm937_vm5 = vcmp.eq.f32.partialorder %v933_v8, inf  ;;  %v940_v17 = vand.u32 2147483648, %v933_v8  ;;  %vm939_vm6 = vcmp.eq.f32.partialorder %v933_v8, 0.0 }
 0x16e   : > { %v934_v10 = vadd.f32 %v932_v9, %v930_v7 }
 0x170   : > { %1493 = vrsqrt.f32 %v934_v10  ;;  %v956_v11 = vadd.f32 %v934_v10, %v933_v8  ;;  %vm944_vm7 = vcmp.eq.f32.partialorder %v934_v10, inf  ;;  %v947_v25 = vand.u32 2147483648, %v934_v10 }
 0x171   : > { %vm946_vm8 = vcmp.eq.f32.partialorder %v934_v10, 0.0 }
 0x172   : > { %v957_v13 = vrot.slane %v956_v11, 4 }
 0x174   : > { %v958_v23 = vadd.f32 %v957_v13, %v956_v11 }
 0x176   : > { %v959_v29 = vrot.slane %v958_v23, 2 }
 0x177   : > { %v1492_v12 = vpop.eup %1491 }
 0x178   : > { %v936_v14 = vmul.f32 %v1492_v12, %v933_v8  ;;  %v960_v32 = vadd.f32 %v959_v29, %v958_v23 }
 0x17a   : > { %v1494_v15 = vpop.eup %1493  ;;  %v938_v16 = vsel %vm937_vm5, %v933_v8, %v936_v14  ;;  %v961_v35 = vrot.slane %v960_v32, 1 }
 0x17b   : > { %v943_v18 = vmul.f32 %v1494_v15, %v934_v10  ;;  %v941_v24 = vsel %vm939_vm6, %v940_v17, %v938_v16 }
 0x17c   : > { %v962_v40 = vadd.f32 %v961_v35, %v960_v32 }
 0x17d   : > { %v945_v26 = vsel %vm944_vm7, %v934_v10, %v943_v18 }
 0x17e   : > { %v948_v27 = vsel %vm946_vm8, %v947_v25, %v945_v26 }
 0x17f   : > { %v949_v28 = vadd.f32 %v948_v27, %v941_v24 }
 0x181   : > { %v950_v30 = vrot.slane %v949_v28, 4 }
 0x183   : > { %v951_v31 = vadd.f32 %v950_v30, %v949_v28 }
 0x185   : > { %v952_v33 = vrot.slane %v951_v31, 2 }
 0x187   : > { %v953_v34 = vadd.f32 %v952_v33, %v951_v31 }
 0x189   : > { %v954_v36 = vrot.slane %v953_v34, 1 }
 0x18b   : > { %v955_v39 = vadd.f32 %v954_v36, %v953_v34 }
 0x18d   : > { %v963_v41 = vsel %vm409_vm2, %v955_v39, %v962_v40 }
 0x18e   : > { %964 = vst [vmem:[%s348_s26] sm:$0x3] %v963_v41 }
 0x18f PF: > { %s19_s27 = sadd.s32 1, %s1501_s27  }
 0x190   : > { %p16_p4 = scmp.ge.s32.totalorder %s19_s27, 4  }
 0x192   :  { %18 = sbr.rel (!%p16_p4) target bundleno = 1 (0x1), region = 103 }

</bundles_post_ra>
